<compile_context>
chip_gen: v5e
topology: v5e:2x2
jax: 0.10.0
libtpu: 0.0.40
codegen_flags: <defaults>
</compile_context>

<pallas_src>
import functools
import math

import jax
import jax.numpy as jnp
from jax.experimental import pallas as pl
from jax.experimental.pallas import tpu as pltpu


# ----------------------------------------------------------------------------
# in-kernel helpers
# ----------------------------------------------------------------------------
def _layernorm(x, g, b, eps=1e-6):
    # matches the custom LayerNorm of the reference repo:
    #   g * (x - mean) / (std_unbiased + eps) + b
    mean = jnp.mean(x, axis=-1, keepdims=True)
    d = x - mean
    n = x.shape[-1]
    var = jnp.sum(d * d, axis=-1, keepdims=True) / (n - 1)
    inv = pl.reciprocal(jnp.sqrt(var) + eps, approx=True)
    return g * d * inv + b


def _softmax(s):
    s = s - jnp.max(s, axis=-1, keepdims=True)
    e = jnp.exp(s)
    return e * pl.reciprocal(jnp.sum(e, axis=-1, keepdims=True), approx=True)


def _encoder_layer(x, bias, vec, wqkv, wout, num_heads):
    """One pre-norm transformer encoder layer on a flat (N, D) activation block.

    vec  : (10, D) rows = [ln1_g, ln1_b, ln2_g, ln2_b, bq, bk, bv, bo, b1, b2]
    wqkv : (D, 3D) packed [wq | wk | wv]
    wout : (3D, D) packed [wo ; w1 ; w2]            (requires ff == D)
    bias : (N, N)  additive attention bias (0 keep / -1e9 drop); encodes the key
                   mask AND the block-diagonal batch structure of the flat rows.
    """
    N, D = x.shape
    dk = D // num_heads
    scale = 1.0 / math.sqrt(dk)

    # ---- self-attention sublayer (pre-norm) ----
    xn = _layernorm(x, vec[0:1], vec[1:2])
    qkv = jnp.dot(xn, wqkv, preferred_element_type=jnp.float32)        # (N, 3D)
    q = qkv[:, 0:D] + vec[4:5]
    k = qkv[:, D:2 * D] + vec[5:6]
    v = qkv[:, 2 * D:3 * D] + vec[6:7]

    attn = jnp.zeros((N, D), jnp.float32)
    for h in range(num_heads):                    # unrolled; no head concat needed
        lo = h * dk
        qh = q[:, lo:lo + dk]
        kh = k[:, lo:lo + dk]
        vh = v[:, lo:lo + dk]
        s = jax.lax.dot_general(qh, kh, (((1,), (1,)), ((), ())),
                                preferred_element_type=jnp.float32)    # (N, N)
        p = _softmax(s * scale + bias)
        pv = jnp.dot(p, vh, preferred_element_type=jnp.float32)        # (N, dk)
        attn = attn + jnp.dot(pv, wout[lo:lo + dk, :],
                              preferred_element_type=jnp.float32)      # += pv @ wo_h
    x = x + attn + vec[7:8]

    # ---- feed-forward sublayer (pre-norm) ----
    xn2 = _layernorm(x, vec[2:3], vec[3:4])
    h1 = jnp.maximum(jnp.dot(xn2, wout[D:2 * D, :],
                             preferred_element_type=jnp.float32) + vec[8:9], 0.0)
    h2 = jnp.dot(h1, wout[2 * D:3 * D, :],
                 preferred_element_type=jnp.float32) + vec[9:10]
    return x + h2


# ----------------------------------------------------------------------------
# Pallas kernels
# ----------------------------------------------------------------------------
def linear_kernel(x_ref, w_ref, b_ref, o_ref):
    # fallback path only (bottle_layer == 0)
    o_ref[...] = (jnp.dot(x_ref[...], w_ref[...],
                          preferred_element_type=jnp.float32) + b_ref[...])


def unimodal_stack_kernel(xin_ref, pw_ref, aux_ref, bias_ref, vec_ref, wqkv_ref,
                          wout_ref, o_ref, xs_ref, *, num_heads, batch, seq):
    # grid = (modality, layer); activation carried in VMEM scratch across layers.
    # At l == 0 the input projection + cls-token prepend are done in-kernel:
    #   aux rows: [proj bias, cls token];  xin / pw are zero-padded to a common dim.
    l = pl.program_id(1)
    sp = seq + 1

    @pl.when(l == 0)
    def _():
        proj = (jnp.dot(xin_ref[0], pw_ref[0], preferred_element_type=jnp.float32)
                + aux_ref[0, 0:1])                                     # (B*S, D)
        for b in range(batch):
            r = b * sp
            xs_ref[r:r + 1, :] = aux_ref[0, 1:2]                       # cls token
            xs_ref[r + 1:r + sp, :] = proj[b * seq:(b + 1) * seq, :]

    y = _encoder_layer(xs_ref[...], bias_ref[...], vec_ref[0, 0],
                       wqkv_ref[0, 0], wout_ref[0, 0], num_heads)
    xs_ref[...] = y

    @pl.when(l == pl.num_programs(1) - 1)
    def _():
        o_ref[0] = y


def bottleneck_stack_kernel(av_ref, bot0_ref, bias_ref, vec_ref, wqkv_ref, wout_ref,
                            lnf_ref, hw_ref, hb_ref,
                            logits_ref, bot_ref,
                            xa_ref, xv_ref, *, num_heads, batch, nb, sp):
    # grid = (layer,).  Both modalities are processed per step so the bottleneck
    # tokens can be averaged in-kernel.  Row layout per modality scratch (flat):
    #   batch b occupies rows [b*nbp, (b+1)*nbp): first nb rows = bottleneck tokens,
    #   remaining sp rows = [cls, tokens...].
    l = pl.program_id(0)
    nbp = nb + sp

    @pl.when(l == 0)
    def _():
        for b in range(batch):
            r = b * nbp
            xa_ref[r:r + nb, :] = bot0_ref[0]
            xv_ref[r:r + nb, :] = bot0_ref[0]
            xa_ref[r + nb:r + nbp, :] = av_ref[0, b * sp:(b + 1) * sp, :]
            xv_ref[r + nb:r + nbp, :] = av_ref[1, b * sp:(b + 1) * sp, :]

    bias = bias_ref[...]
    ya = _encoder_layer(xa_ref[...], bias, vec_ref[0, 0], wqkv_ref[0, 0],
                        wout_ref[0, 0], num_heads)
    yv = _encoder_layer(xv_ref[...], bias, vec_ref[1, 0], wqkv_ref[1, 0],
                        wout_ref[1, 0], num_heads)

    # write layer outputs back, then overwrite the bottleneck rows with the
    # cross-modal average so the next layer sees the fused tokens.
    xa_ref[...] = ya
    xv_ref[...] = yv
    bots = []
    for b in range(batch):
        r = b * nbp
        fused = (ya[r:r + nb, :] + yv[r:r + nb, :]) * 0.5
        bots.append(fused)
        xa_ref[r:r + nb, :] = fused
        xv_ref[r:r + nb, :] = fused

    @pl.when(l == pl.num_programs(0) - 1)
    def _():
        # outputs: bottleneck tokens + (LayerNorm of cls rows -> classifier head).
        for b in range(batch):
            bot_ref[b] = bots[b]
        a_cls = jnp.concatenate(
            [ya[b * nbp + nb:b * nbp + nb + 1, :] for b in range(batch)], axis=0)
        v_cls = jnp.concatenate(
            [yv[b * nbp + nb:b * nbp + nb + 1, :] for b in range(batch)], axis=0)
        a_n = _layernorm(a_cls, lnf_ref[0:1], lnf_ref[1:2])
        v_n = _layernorm(v_cls, lnf_ref[2:3], lnf_ref[3:4])
        pooled = (a_n + v_n) * 0.5          # head(cat).mean(dim=1) == head(mean)
        logits_ref[...] = (jnp.dot(pooled, hw_ref[...],
                                   preferred_element_type=jnp.float32) + hb_ref[...])


# ----------------------------------------------------------------------------
# pallas_call wrappers
# ----------------------------------------------------------------------------
def pallas_linear(x, w, b):
    n, din = x.shape
    dout = w.shape[1]
    return pl.pallas_call(
        linear_kernel,
        out_shape=jax.ShapeDtypeStruct((n, dout), jnp.float32),
        grid=(1,),
        in_specs=[pl.BlockSpec((n, din), lambda i: (0, 0)),
                  pl.BlockSpec((din, dout), lambda i: (0, 0)),
                  pl.BlockSpec((1, dout), lambda i: (0, 0))],
        out_specs=pl.BlockSpec((n, dout), lambda i: (0, 0)),
    )(x, w, b)


def pallas_unimodal_stack(xin, pw, aux, bias, vecs, wqkv, wout, *,
                          num_heads, batch, seq):
    p = pw.shape[1]
    d = pw.shape[2]
    sp = seq + 1
    n = batch * sp
    lu = vecs.shape[1]
    return pl.pallas_call(
        functools.partial(unimodal_stack_kernel, num_heads=num_heads,
                          batch=batch, seq=seq),
        out_shape=jax.ShapeDtypeStruct((2, n, d), jnp.float32),
        grid=(2, lu),
        in_specs=[
            pl.BlockSpec((1, batch * seq, p), lambda m, l: (m, 0, 0)),  # raw inputs
            pl.BlockSpec((1, p, d), lambda m, l: (m, 0, 0)),            # proj weight
            pl.BlockSpec((1, 2, d), lambda m, l: (m, 0, 0)),            # proj bias+cls
            pl.BlockSpec((n, n), lambda m, l: (0, 0)),                  # mask bias
            pl.BlockSpec((1, 1, 10, d), lambda m, l: (m, l, 0, 0)),     # LN + biases
            pl.BlockSpec((1, 1, d, 3 * d), lambda m, l: (m, l, 0, 0)),  # fused QKV
            pl.BlockSpec((1, 1, 3 * d, d), lambda m, l: (m, l, 0, 0)),  # wo/w1/w2
        ],
        out_specs=pl.BlockSpec((1, n, d), lambda m, l: (m, 0, 0)),
        scratch_shapes=[pltpu.VMEM((n, d), jnp.float32)],
        compiler_params=pltpu.CompilerParams(
            dimension_semantics=("parallel", "arbitrary")),
    )(xin, pw, aux, bias, vecs, wqkv, wout)


def pallas_bottleneck_stack(av, bot0, bias, vecs, wqkv, wout, lnf, head_w, head_b,
                            *, num_heads, batch, nb, sp):
    lb = vecs.shape[1]
    d = av.shape[-1]
    n2 = batch * (nb + sp)
    c = head_w.shape[1]
    kernel = functools.partial(bottleneck_stack_kernel, num_heads=num_heads,
                               batch=batch, nb=nb, sp=sp)
    return pl.pallas_call(
        kernel,
        out_shape=(jax.ShapeDtypeStruct((batch, c), jnp.float32),
                   jax.ShapeDtypeStruct((batch, nb, d), jnp.float32)),
        grid=(lb,),
        in_specs=[
            pl.BlockSpec((2, batch * sp, d), lambda l: (0, 0, 0)),     # a/v activations
            pl.BlockSpec((1, nb, d), lambda l: (0, 0, 0)),             # initial bot token
            pl.BlockSpec((n2, n2), lambda l: (0, 0)),                  # mask bias
            pl.BlockSpec((2, 1, 10, d), lambda l: (0, l, 0, 0)),       # LN + biases
            pl.BlockSpec((2, 1, d, 3 * d), lambda l: (0, l, 0, 0)),    # fused QKV
            pl.BlockSpec((2, 1, 3 * d, d), lambda l: (0, l, 0, 0)),    # wo/w1/w2
            pl.BlockSpec((4, d), lambda l: (0, 0)),                    # norma/normv
            pl.BlockSpec((d, c), lambda l: (0, 0)),                    # head w
            pl.BlockSpec((1, c), lambda l: (0, 0)),                    # head b
        ],
        out_specs=(pl.BlockSpec((batch, c), lambda l: (0, 0)),
                   pl.BlockSpec((batch, nb, d), lambda l: (0, 0, 0))),
        scratch_shapes=[pltpu.VMEM((n2, d), jnp.float32),
                        pltpu.VMEM((n2, d), jnp.float32)],
        compiler_params=pltpu.CompilerParams(dimension_semantics=("arbitrary",)),
    )(av, bot0, bias, vecs, wqkv, wout, lnf, head_w, head_b)


# ----------------------------------------------------------------------------
# host-side glue
# ----------------------------------------------------------------------------
def make_mask_bias(mask):
    """mask: (B, S) float key-mask (nonzero = keep) -> (B*S, B*S) additive bias
    that also blocks cross-batch attention (flat-row batching)."""
    B, S = mask.shape
    n = B * S
    key_ok = mask.reshape(1, n) != 0
    bid = jnp.arange(n, dtype=jnp.int32) // S
    same = bid[:, None] == bid[None, :]
    return jnp.where(jnp.logical_and(same, key_ok), 0.0, -1e9).astype(jnp.float32)


# ----------------------------------------------------------------------------
# parameter construction (deterministic, synthetic)
# ----------------------------------------------------------------------------
def _init_linear(key, din, dout):
    k1, k2 = jax.random.split(key)
    bound = 1.0 / math.sqrt(din)
    w = jax.random.uniform(k1, (din, dout), jnp.float32, -bound, bound)
    b = jax.random.uniform(k2, (1, dout), jnp.float32, -bound, bound)
    return w, b


def _init_encoder_layer(key, d, ff):
    ks = jax.random.split(key, 6)
    wq, bq = _init_linear(ks[0], d, d)
    wk, bk = _init_linear(ks[1], d, d)
    wv, bv = _init_linear(ks[2], d, d)
    wo, bo = _init_linear(ks[3], d, d)
    w1, b1 = _init_linear(ks[4], d, ff)
    w2, b2 = _init_linear(ks[5], ff, d)
    return dict(
        ln1_g=jnp.ones((1, d), jnp.float32), ln1_b=jnp.zeros((1, d), jnp.float32),
        wq=wq, bq=bq, wk=wk, bk=bk, wv=wv, bv=bv, wo=wo, bo=bo,
        ln2_g=jnp.ones((1, d), jnp.float32), ln2_b=jnp.zeros((1, d), jnp.float32),
        w1=w1, b1=b1, w2=w2, b2=b2,
    )


def _pack_layer(p):
    vec = jnp.concatenate([p["ln1_g"], p["ln1_b"], p["ln2_g"], p["ln2_b"],
                           p["bq"], p["bk"], p["bv"], p["bo"],
                           p["b1"], p["b2"]], axis=0)                 # (10, D)
    wqkv = jnp.concatenate([p["wq"], p["wk"], p["wv"]], axis=1)       # (D, 3D)
    wout = jnp.concatenate([p["wo"], p["w1"], p["w2"]], axis=0)       # (3D, D)  (ff == D)
    return vec, wqkv, wout


def _stack_layers(audio_layers, video_layers, lo, hi):
    if hi <= lo:
        return None, None, None
    vecs, wqkvs, wouts = [], [], []
    for layers in (audio_layers, video_layers):          # modality 0 = audio, 1 = video
        packed = [_pack_layer(layers[i]) for i in range(lo, hi)]
        vecs.append(jnp.stack([q[0] for q in packed]))
        wqkvs.append(jnp.stack([q[1] for q in packed]))
        wouts.append(jnp.stack([q[2] for q in packed]))
    return jnp.stack(vecs), jnp.stack(wqkvs), jnp.stack(wouts)


def init_mbt_params(key, a_dim, v_dim, embed_dim, num_bottle_token,
                    num_layers, num_class, bottle_layer):
    keys = jax.random.split(key, 2 * num_layers + 8)
    ff = embed_dim   # module sets ff = embed_dim (required by the [wo;w1;w2] packing)
    video_layers = [_init_encoder_layer(keys[2 + i], embed_dim, ff)
                    for i in range(num_layers)]
    audio_layers = [_init_encoder_layer(keys[2 + num_layers + i], embed_dim, ff)
                    for i in range(num_layers)]
    uni_vecs, uni_wqkv, uni_wout = _stack_layers(audio_layers, video_layers,
                                                 0, bottle_layer)
    bot_vecs, bot_wqkv, bot_wout = _stack_layers(audio_layers, video_layers,
                                                 bottle_layer, num_layers)
    params = dict(
        audio_prj=_init_linear(keys[0], a_dim, embed_dim),
        video_prj=_init_linear(keys[1], v_dim, embed_dim),
        uni_vecs=uni_vecs, uni_wqkv=uni_wqkv, uni_wout=uni_wout,
        bot_vecs=bot_vecs, bot_wqkv=bot_wqkv, bot_wout=bot_wout,
        mask_cls=jnp.ones((1, 1), jnp.float32),
        mask_bot=jnp.ones((1, num_bottle_token), jnp.float32),
        bot_token=0.02 * jax.random.truncated_normal(
            keys[-4], -2.0, 2.0, (1, num_bottle_token, embed_dim), jnp.float32),
        acls_token=0.02 * jax.random.truncated_normal(
            keys[-3], -2.0, 2.0, (1, 1, embed_dim), jnp.float32),
        vcls_token=0.02 * jax.random.truncated_normal(
            keys[-2], -2.0, 2.0, (1, 1, embed_dim), jnp.float32),
        lnf=jnp.concatenate([jnp.ones((1, embed_dim), jnp.float32),    # norma g
                             jnp.zeros((1, embed_dim), jnp.float32),   # norma b
                             jnp.ones((1, embed_dim), jnp.float32),    # normv g
                             jnp.zeros((1, embed_dim), jnp.float32)],  # normv b
                            axis=0),
        head=_init_linear(keys[-1], embed_dim, num_class),
    )
    return params


# ----------------------------------------------------------------------------
# MBT forward (mirrors MBT.forward, project_type='minimal', eval mode)
# ----------------------------------------------------------------------------
def mbt_forward(params, a, v, m, *, num_bottle_token, bottle_layer,
                num_layers, num_head):
    B, S, a_dim = a.shape
    v_dim = v.shape[-1]
    wa, ba = params["audio_prj"]
    wv_, bv_ = params["video_prj"]
    D = wa.shape[1]
    Sp = S + 1
    assert D % num_head == 0
    # the final cls-LayerNorm + head are folded into the bottleneck-stack kernel,
    # so at least one bottleneck layer is required (module default: 7 < 10).
    assert 0 <= bottle_layer < num_layers

    mask1 = jnp.concatenate([jnp.broadcast_to(params["mask_cls"], (B, 1)),
                             m.astype(jnp.float32)], axis=1)    # (B, Sp)
    bias1 = make_mask_bias(mask1)                               # (B*Sp, B*Sp)

    if bottle_layer > 0:
        # ---- unimodal stack (projection + cls prepend fused into step 0) ----
        P = max(a_dim, v_dim)
        a_flat = jnp.pad(a.reshape(B * S, a_dim), ((0, 0), (0, P - a_dim)))
        v_flat = jnp.pad(v.reshape(B * S, v_dim), ((0, 0), (0, P - v_dim)))
        xin = jnp.stack([a_flat, v_flat], axis=0)                        # (2, B*S, P)
        pw = jnp.stack([jnp.pad(wa, ((0, P - a_dim), (0, 0))),
                        jnp.pad(wv_, ((0, P - v_dim), (0, 0)))], axis=0)  # (2, P, D)
        aux = jnp.stack(
            [jnp.concatenate([ba, params["acls_token"][0]], axis=0),
             jnp.concatenate([bv_, params["vcls_token"][0]], axis=0)],
            axis=0)                                                      # (2, 2, D)
        x_stack = pallas_unimodal_stack(
            xin, pw, aux, bias1, params["uni_vecs"], params["uni_wqkv"],
            params["uni_wout"], num_heads=num_head, batch=B, seq=S)
    else:
        # fallback: standalone projection + host-side cls prepend (no unimodal layers)
        a_p = pallas_linear(a.reshape(B * S, a_dim), wa, ba).reshape(B, S, D)
        v_p = pallas_linear(v.reshape(B * S, v_dim), wv_, bv_).reshape(B, S, D)
        acls = jnp.broadcast_to(params["acls_token"], (B, 1, D))
        vcls = jnp.broadcast_to(params["vcls_token"], (B, 1, D))
        a_x = jnp.concatenate([acls, a_p], axis=1).reshape(B * Sp, D)
        v_x = jnp.concatenate([vcls, v_p], axis=1).reshape(B * Sp, D)
        x_stack = jnp.stack([a_x, v_x], axis=0)

    # ---- bottleneck stack + final cls LayerNorm + classifier head: one kernel ----
    NB = num_bottle_token
    mask2 = jnp.concatenate([jnp.broadcast_to(params["mask_bot"], (B, NB)), mask1],
                            axis=1)                             # (B, NB+Sp)
    bias2 = make_mask_bias(mask2)
    head_w, head_b = params["head"]
    logits, bot = pallas_bottleneck_stack(
        x_stack, params["bot_token"], bias2,
        params["bot_vecs"], params["bot_wqkv"], params["bot_wout"],
        params["lnf"], head_w, head_b,
        num_heads=num_head, batch=B, nb=NB, sp=Sp)
    return logits, bot


# ----------------------------------------------------------------------------
# main
# ----------------------------------------------------------------------------
if __name__ == "__main__":
    # small config consistent with the module structure
    B, SEQ = 2, 8
    A_DIM, V_DIM, EMBED = 12, 20, 32
    NUM_BOTTLE, BOTTLE_LAYER, NUM_LAYERS = 4, 2, 4
    NUM_HEAD, NUM_CLASS = 4, 2

    root = jax.random.PRNGKey(0)
    kp, ka, kv = jax.random.split(root, 3)
    params = init_mbt_params(kp, A_DIM, V_DIM, EMBED, NUM_BOTTLE,
                             NUM_LAYERS, NUM_CLASS, BOTTLE_LAYER)

    a = jax.random.normal(ka, (B, SEQ, A_DIM), jnp.float32)
    v = jax.random.normal(kv, (B, SEQ, V_DIM), jnp.float32)
    m = jnp.ones((B, SEQ), jnp.float32)   # attention key-mask (1 = keep)

    fwd = jax.jit(functools.partial(
        mbt_forward, num_bottle_token=NUM_BOTTLE, bottle_layer=BOTTLE_LAYER,
        num_layers=NUM_LAYERS, num_head=NUM_HEAD))

    out, bot = fwd(params, a, v, m)
    jax.block_until_ready((out, bot))

    assert out.shape == (B, NUM_CLASS)
    assert bot.shape == (B, NUM_BOTTLE, EMBED)
    assert bool(jnp.all(jnp.isfinite(out))) and bool(jnp.all(jnp.isfinite(bot)))
    print("KERNEL_OK")
</pallas_src>

<mosaic_0001>
module attributes {stable_mosaic.version = 11 : i64} {
  func.func @unimodal_stack_kernel(%arg0: i32, %arg1: i32, %arg2: memref<1x16x20xf32, #tpu.memory_space<vmem>>, %arg3: memref<1x20x32xf32, #tpu.memory_space<vmem>>, %arg4: memref<1x2x32xf32, #tpu.memory_space<vmem>>, %arg5: memref<18x18xf32, #tpu.memory_space<vmem>>, %arg6: memref<1x1x10x32xf32, #tpu.memory_space<vmem>>, %arg7: memref<1x1x32x96xf32, #tpu.memory_space<vmem>>, %arg8: memref<1x1x96x32xf32, #tpu.memory_space<vmem>>, %arg9: memref<1x18x32xf32, #tpu.memory_space<vmem>>, %arg10: memref<18x32xf32, #tpu.memory_space<vmem>>) attributes {dimension_semantics = [#tpu.dimension_semantics<parallel>, #tpu.dimension_semantics<arbitrary>], iteration_bounds = array<i64: 2, 2>, scalar_prefetch = 0 : i64, scratch_operands = 1 : i64, tpu.core_type = #tpu.core_type<tc>, window_params = [{transform_indices = @transform_0, window_bounds = array<i64: 1, 16, 20>}, {transform_indices = @transform_1, window_bounds = array<i64: 1, 20, 32>}, {transform_indices = @transform_2, window_bounds = array<i64: 1, 2, 32>}, {pipeline_mode = #tpu.pipeline_mode<synchronous>, transform_indices = @transform_3, window_bounds = array<i64: 18, 18>}, {transform_indices = @transform_4, window_bounds = array<i64: 1, 1, 10, 32>}, {transform_indices = @transform_5, window_bounds = array<i64: 1, 1, 32, 96>}, {transform_indices = @transform_6, window_bounds = array<i64: 1, 1, 96, 32>}, {transform_indices = @transform_7, window_bounds = array<i64: 1, 18, 32>}]} {
    %c0_i32 = arith.constant 0 : i32
    %0 = arith.cmpi eq, %arg1, %c0_i32 : i32
    %1 = arith.extui %0 : i1 to i32
    %c0_i32_0 = arith.constant 0 : i32
    %2 = arith.cmpi ne, %1, %c0_i32_0 : i32
    scf.if %2 {
      %c0_57 = arith.constant 0 : index
      %c0_58 = arith.constant 0 : index
      %c0_59 = arith.constant 0 : index
      %176 = vector.load %arg2[%c0_57, %c0_58, %c0_59] : memref<1x16x20xf32, #tpu.memory_space<vmem>>, vector<1x16x20xf32>
      %177 = vector.shape_cast %176 : vector<1x16x20xf32> to vector<16x20xf32>
      %c0_60 = arith.constant 0 : index
      %c0_61 = arith.constant 0 : index
      %c0_62 = arith.constant 0 : index
      %178 = vector.load %arg3[%c0_60, %c0_61, %c0_62] : memref<1x20x32xf32, #tpu.memory_space<vmem>>, vector<1x20x32xf32>
      %179 = vector.shape_cast %178 : vector<1x20x32xf32> to vector<20x32xf32>
      %cst_63 = arith.constant dense<0.000000e+00> : vector<16x32xf32>
      %180 = tpu.matmul %177, %179, %cst_63 {dimension_numbers = #tpu.dot_dimension_numbers<[1], [0], [0], [1], [0, 0, 1, 1], [], []>} : vector<16x20xf32>, vector<20x32xf32>, vector<16x32xf32> -> vector<16x32xf32>
      %c0_64 = arith.constant 0 : index
      %c0_65 = arith.constant 0 : index
      %c0_66 = arith.constant 0 : index
      %181 = vector.load %arg4[%c0_64, %c0_65, %c0_66] : memref<1x2x32xf32, #tpu.memory_space<vmem>>, vector<1x1x32xf32>
      %182 = vector.shape_cast %181 : vector<1x1x32xf32> to vector<1x32xf32>
      %183 = vector.broadcast %182 : vector<1x32xf32> to vector<16x32xf32>
      %184 = arith.addf %180, %183 : vector<16x32xf32>
      %c0_67 = arith.constant 0 : index
      %c1 = arith.constant 1 : index
      %c0_68 = arith.constant 0 : index
      %185 = vector.load %arg4[%c0_67, %c1, %c0_68] : memref<1x2x32xf32, #tpu.memory_space<vmem>>, vector<1x1x32xf32>
      %186 = vector.shape_cast %185 : vector<1x1x32xf32> to vector<1x32xf32>
      %c0_69 = arith.constant 0 : index
      %c0_70 = arith.constant 0 : index
      %187 = vector.load %arg10[%c0_69, %c0_70] : memref<18x32xf32, #tpu.memory_space<vmem>>, vector<1x32xf32>
      tpu.vector_store %arg10[%c0_69, %c0_70], %186 {strides = array<i32>} : memref<18x32xf32, #tpu.memory_space<vmem>>, vector<1x32xf32>,
      %188 = vector.extract_strided_slice %184 {offsets = [0, 0], sizes = [8, 32], strides = [1, 1]} : vector<16x32xf32> to vector<8x32xf32>
      %c1_71 = arith.constant 1 : index
      %c0_72 = arith.constant 0 : index
      %189 = vector.load %arg10[%c1_71, %c0_72] : memref<18x32xf32, #tpu.memory_space<vmem>>, vector<8x32xf32>
      tpu.vector_store %arg10[%c1_71, %c0_72], %188 {strides = array<i32>} : memref<18x32xf32, #tpu.memory_space<vmem>>, vector<8x32xf32>,
      %c0_73 = arith.constant 0 : index
      %c1_74 = arith.constant 1 : index
      %c0_75 = arith.constant 0 : index
      %190 = vector.load %arg4[%c0_73, %c1_74, %c0_75] : memref<1x2x32xf32, #tpu.memory_space<vmem>>, vector<1x1x32xf32>
      %191 = vector.shape_cast %190 : vector<1x1x32xf32> to vector<1x32xf32>
      %c9 = arith.constant 9 : index
      %c0_76 = arith.constant 0 : index
      %192 = vector.load %arg10[%c9, %c0_76] : memref<18x32xf32, #tpu.memory_space<vmem>>, vector<1x32xf32>
      tpu.vector_store %arg10[%c9, %c0_76], %191 {strides = array<i32>} : memref<18x32xf32, #tpu.memory_space<vmem>>, vector<1x32xf32>,
      %193 = vector.extract_strided_slice %184 {offsets = [8, 0], sizes = [8, 32], strides = [1, 1]} : vector<16x32xf32> to vector<8x32xf32>
      %c10 = arith.constant 10 : index
      %c0_77 = arith.constant 0 : index
      %194 = vector.load %arg10[%c10, %c0_77] : memref<18x32xf32, #tpu.memory_space<vmem>>, vector<8x32xf32>
      tpu.vector_store %arg10[%c10, %c0_77], %193 {strides = array<i32>} : memref<18x32xf32, #tpu.memory_space<vmem>>, vector<8x32xf32>,
    } else {
    }
    %c0 = arith.constant 0 : index
    %c0_1 = arith.constant 0 : index
    %3 = vector.load %arg10[%c0, %c0_1] : memref<18x32xf32, #tpu.memory_space<vmem>>, vector<18x32xf32>
    %c0_2 = arith.constant 0 : index
    %c0_3 = arith.constant 0 : index
    %4 = vector.load %arg5[%c0_2, %c0_3] : memref<18x18xf32, #tpu.memory_space<vmem>>, vector<18x18xf32>
    %c0_4 = arith.constant 0 : index
    %c0_5 = arith.constant 0 : index
    %c0_6 = arith.constant 0 : index
    %c0_7 = arith.constant 0 : index
    %5 = vector.load %arg6[%c0_4, %c0_5, %c0_6, %c0_7] : memref<1x1x10x32xf32, #tpu.memory_space<vmem>>, vector<1x1x10x32xf32>
    %6 = vector.shape_cast %5 : vector<1x1x10x32xf32> to vector<10x32xf32>
    %c0_8 = arith.constant 0 : index
    %c0_9 = arith.constant 0 : index
    %c0_10 = arith.constant 0 : index
    %c0_11 = arith.constant 0 : index
    %7 = vector.load %arg7[%c0_8, %c0_9, %c0_10, %c0_11] : memref<1x1x32x96xf32, #tpu.memory_space<vmem>>, vector<1x1x32x96xf32>
    %8 = vector.shape_cast %7 : vector<1x1x32x96xf32> to vector<32x96xf32>
    %c0_12 = arith.constant 0 : index
    %c0_13 = arith.constant 0 : index
    %c0_14 = arith.constant 0 : index
    %c0_15 = arith.constant 0 : index
    %9 = vector.load %arg8[%c0_12, %c0_13, %c0_14, %c0_15] : memref<1x1x96x32xf32, #tpu.memory_space<vmem>>, vector<1x1x96x32xf32>
    %10 = vector.shape_cast %9 : vector<1x1x96x32xf32> to vector<96x32xf32>
    %11 = vector.extract_strided_slice %6 {offsets = [0, 0], sizes = [1, 32], strides = [1, 1]} : vector<10x32xf32> to vector<1x32xf32>
    %12 = vector.extract_strided_slice %6 {offsets = [1, 0], sizes = [1, 32], strides = [1, 1]} : vector<10x32xf32> to vector<1x32xf32>
    %cst = arith.constant dense<0.000000e+00> : vector<18xf32>
    %13 = vector.multi_reduction <add>, %3, %cst [1] : vector<18x32xf32> to vector<18xf32>
    %14 = vector.shape_cast %13 : vector<18xf32> to vector<18x1xf32>
    %cst_16 = arith.constant 3.200000e+01 : f32
    %15 = vector.broadcast %cst_16 : f32 to vector<18x1xf32>
    %16 = arith.divf %14, %15 : vector<18x1xf32>
    %17 = vector.broadcast %16 : vector<18x1xf32> to vector<18x32xf32>
    %18 = arith.subf %3, %17 : vector<18x32xf32>
    %19 = arith.mulf %18, %18 : vector<18x32xf32>
    %cst_17 = arith.constant dense<0.000000e+00> : vector<18xf32>
    %20 = vector.multi_reduction <add>, %19, %cst_17 [1] : vector<18x32xf32> to vector<18xf32>
    %21 = vector.shape_cast %20 : vector<18xf32> to vector<18x1xf32>
    %cst_18 = arith.constant 3.100000e+01 : f32
    %22 = vector.broadcast %cst_18 : f32 to vector<18x1xf32>
    %23 = arith.divf %21, %22 : vector<18x1xf32>
    %24 = math.sqrt %23 : vector<18x1xf32>
    %cst_19 = arith.constant 9.99999997E-7 : f32
    %25 = vector.broadcast %cst_19 : f32 to vector<18x1xf32>
    %26 = arith.addf %24, %25 : vector<18x1xf32>
    %27 = tpu.reciprocal %26 {approx = true} : vector<18x1xf32> -> vector<18x1xf32>
    %28 = vector.broadcast %11 : vector<1x32xf32> to vector<18x32xf32>
    %29 = arith.mulf %28, %18 : vector<18x32xf32>
    %30 = vector.broadcast %27 : vector<18x1xf32> to vector<18x32xf32>
    %31 = arith.mulf %29, %30 : vector<18x32xf32>
    %32 = vector.broadcast %12 : vector<1x32xf32> to vector<18x32xf32>
    %33 = arith.addf %31, %32 : vector<18x32xf32>
    %cst_20 = arith.constant dense<0.000000e+00> : vector<18x96xf32>
    %34 = tpu.matmul %33, %8, %cst_20 {dimension_numbers = #tpu.dot_dimension_numbers<[1], [0], [0], [1], [0, 0, 1, 1], [], []>} : vector<18x32xf32>, vector<32x96xf32>, vector<18x96xf32> -> vector<18x96xf32>
    %35 = vector.extract_strided_slice %34 {offsets = [0, 0], sizes = [18, 32], strides = [1, 1]} : vector<18x96xf32> to vector<18x32xf32>
    %36 = vector.extract_strided_slice %6 {offsets = [4, 0], sizes = [1, 32], strides = [1, 1]} : vector<10x32xf32> to vector<1x32xf32>
    %37 = vector.broadcast %36 : vector<1x32xf32> to vector<18x32xf32>
    %38 = arith.addf %35, %37 : vector<18x32xf32>
    %39 = vector.extract_strided_slice %34 {offsets = [0, 32], sizes = [18, 32], strides = [1, 1]} : vector<18x96xf32> to vector<18x32xf32>
    %40 = vector.extract_strided_slice %6 {offsets = [5, 0], sizes = [1, 32], strides = [1, 1]} : vector<10x32xf32> to vector<1x32xf32>
    %41 = vector.broadcast %40 : vector<1x32xf32> to vector<18x32xf32>
    %42 = arith.addf %39, %41 : vector<18x32xf32>
    %43 = vector.extract_strided_slice %34 {offsets = [0, 64], sizes = [18, 32], strides = [1, 1]} : vector<18x96xf32> to vector<18x32xf32>
    %44 = vector.extract_strided_slice %6 {offsets = [6, 0], sizes = [1, 32], strides = [1, 1]} : vector<10x32xf32> to vector<1x32xf32>
    %45 = vector.broadcast %44 : vector<1x32xf32> to vector<18x32xf32>
    %46 = arith.addf %43, %45 : vector<18x32xf32>
    %cst_21 = arith.constant 0.000000e+00 : f32
    %47 = vector.broadcast %cst_21 : f32 to vector<18x32xf32>
    %48 = vector.extract_strided_slice %38 {offsets = [0, 0], sizes = [18, 8], strides = [1, 1]} : vector<18x32xf32> to vector<18x8xf32>
    %49 = vector.extract_strided_slice %42 {offsets = [0, 0], sizes = [18, 8], strides = [1, 1]} : vector<18x32xf32> to vector<18x8xf32>
    %50 = vector.extract_strided_slice %46 {offsets = [0, 0], sizes = [18, 8], strides = [1, 1]} : vector<18x32xf32> to vector<18x8xf32>
    %cst_22 = arith.constant dense<0.000000e+00> : vector<18x18xf32>
    %51 = tpu.matmul %48, %49, %cst_22 {dimension_numbers = #tpu.dot_dimension_numbers<[1], [1], [0], [0], [0, 0, 1, 0], [], []>} : vector<18x8xf32>, vector<18x8xf32>, vector<18x18xf32> -> vector<18x18xf32>
    %cst_23 = arith.constant 0.353553385 : f32
    %52 = vector.broadcast %cst_23 : f32 to vector<18x18xf32>
    %53 = arith.mulf %51, %52 : vector<18x18xf32>
    %54 = arith.addf %53, %4 : vector<18x18xf32>
    %cst_24 = arith.constant dense<0xFF800000> : vector<18xf32>
    %55 = vector.multi_reduction <maximumf>, %54, %cst_24 [1] : vector<18x18xf32> to vector<18xf32>
    %56 = vector.shape_cast %55 : vector<18xf32> to vector<18x1xf32>
    %57 = vector.broadcast %56 : vector<18x1xf32> to vector<18x18xf32>
    %58 = arith.subf %54, %57 : vector<18x18xf32>
    %59 = math.exp %58 : vector<18x18xf32>
    %cst_25 = arith.constant dense<0.000000e+00> : vector<18xf32>
    %60 = vector.multi_reduction <add>, %59, %cst_25 [1] : vector<18x18xf32> to vector<18xf32>
    %61 = vector.shape_cast %60 : vector<18xf32> to vector<18x1xf32>
    %62 = tpu.reciprocal %61 {approx = true} : vector<18x1xf32> -> vector<18x1xf32>
    %63 = vector.broadcast %62 : vector<18x1xf32> to vector<18x18xf32>
    %64 = arith.mulf %59, %63 : vector<18x18xf32>
    %cst_26 = arith.constant dense<0.000000e+00> : vector<18x8xf32>
    %65 = tpu.matmul %64, %50, %cst_26 {dimension_numbers = #tpu.dot_dimension_numbers<[1], [0], [0], [1], [0, 0, 1, 1], [], []>} : vector<18x18xf32>, vector<18x8xf32>, vector<18x8xf32> -> vector<18x8xf32>
    %66 = vector.extract_strided_slice %10 {offsets = [0, 0], sizes = [8, 32], strides = [1, 1]} : vector<96x32xf32> to vector<8x32xf32>
    %cst_27 = arith.constant dense<0.000000e+00> : vector<18x32xf32>
    %67 = tpu.matmul %65, %66, %cst_27 {dimension_numbers = #tpu.dot_dimension_numbers<[1], [0], [0], [1], [0, 0, 1, 1], [], []>} : vector<18x8xf32>, vector<8x32xf32>, vector<18x32xf32> -> vector<18x32xf32>
    %68 = arith.addf %47, %67 : vector<18x32xf32>
    %69 = vector.extract_strided_slice %38 {offsets = [0, 8], sizes = [18, 8], strides = [1, 1]} : vector<18x32xf32> to vector<18x8xf32>
    %70 = vector.extract_strided_slice %42 {offsets = [0, 8], sizes = [18, 8], strides = [1, 1]} : vector<18x32xf32> to vector<18x8xf32>
    %71 = vector.extract_strided_slice %46 {offsets = [0, 8], sizes = [18, 8], strides = [1, 1]} : vector<18x32xf32> to vector<18x8xf32>
    %cst_28 = arith.constant dense<0.000000e+00> : vector<18x18xf32>
    %72 = tpu.matmul %69, %70, %cst_28 {dimension_numbers = #tpu.dot_dimension_numbers<[1], [1], [0], [0], [0, 0, 1, 0], [], []>} : vector<18x8xf32>, vector<18x8xf32>, vector<18x18xf32> -> vector<18x18xf32>
    %cst_29 = arith.constant 0.353553385 : f32
    %73 = vector.broadcast %cst_29 : f32 to vector<18x18xf32>
    %74 = arith.mulf %72, %73 : vector<18x18xf32>
    %75 = arith.addf %74, %4 : vector<18x18xf32>
    %cst_30 = arith.constant dense<0xFF800000> : vector<18xf32>
    %76 = vector.multi_reduction <maximumf>, %75, %cst_30 [1] : vector<18x18xf32> to vector<18xf32>
    %77 = vector.shape_cast %76 : vector<18xf32> to vector<18x1xf32>
    %78 = vector.broadcast %77 : vector<18x1xf32> to vector<18x18xf32>
    %79 = arith.subf %75, %78 : vector<18x18xf32>
    %80 = math.exp %79 : vector<18x18xf32>
    %cst_31 = arith.constant dense<0.000000e+00> : vector<18xf32>
    %81 = vector.multi_reduction <add>, %80, %cst_31 [1] : vector<18x18xf32> to vector<18xf32>
    %82 = vector.shape_cast %81 : vector<18xf32> to vector<18x1xf32>
    %83 = tpu.reciprocal %82 {approx = true} : vector<18x1xf32> -> vector<18x1xf32>
    %84 = vector.broadcast %83 : vector<18x1xf32> to vector<18x18xf32>
    %85 = arith.mulf %80, %84 : vector<18x18xf32>
    %cst_32 = arith.constant dense<0.000000e+00> : vector<18x8xf32>
    %86 = tpu.matmul %85, %71, %cst_32 {dimension_numbers = #tpu.dot_dimension_numbers<[1], [0], [0], [1], [0, 0, 1, 1], [], []>} : vector<18x18xf32>, vector<18x8xf32>, vector<18x8xf32> -> vector<18x8xf32>
    %87 = vector.extract_strided_slice %10 {offsets = [8, 0], sizes = [8, 32], strides = [1, 1]} : vector<96x32xf32> to vector<8x32xf32>
    %cst_33 = arith.constant dense<0.000000e+00> : vector<18x32xf32>
    %88 = tpu.matmul %86, %87, %cst_33 {dimension_numbers = #tpu.dot_dimension_numbers<[1], [0], [0], [1], [0, 0, 1, 1], [], []>} : vector<18x8xf32>, vector<8x32xf32>, vector<18x32xf32> -> vector<18x32xf32>
    %89 = arith.addf %68, %88 : vector<18x32xf32>
    %90 = vector.extract_strided_slice %38 {offsets = [0, 16], sizes = [18, 8], strides = [1, 1]} : vector<18x32xf32> to vector<18x8xf32>
    %91 = vector.extract_strided_slice %42 {offsets = [0, 16], sizes = [18, 8], strides = [1, 1]} : vector<18x32xf32> to vector<18x8xf32>
    %92 = vector.extract_strided_slice %46 {offsets = [0, 16], sizes = [18, 8], strides = [1, 1]} : vector<18x32xf32> to vector<18x8xf32>
    %cst_34 = arith.constant dense<0.000000e+00> : vector<18x18xf32>
    %93 = tpu.matmul %90, %91, %cst_34 {dimension_numbers = #tpu.dot_dimension_numbers<[1], [1], [0], [0], [0, 0, 1, 0], [], []>} : vector<18x8xf32>, vector<18x8xf32>, vector<18x18xf32> -> vector<18x18xf32>
    %cst_35 = arith.constant 0.353553385 : f32
    %94 = vector.broadcast %cst_35 : f32 to vector<18x18xf32>
    %95 = arith.mulf %93, %94 : vector<18x18xf32>
    %96 = arith.addf %95, %4 : vector<18x18xf32>
    %cst_36 = arith.constant dense<0xFF800000> : vector<18xf32>
    %97 = vector.multi_reduction <maximumf>, %96, %cst_36 [1] : vector<18x18xf32> to vector<18xf32>
    %98 = vector.shape_cast %97 : vector<18xf32> to vector<18x1xf32>
    %99 = vector.broadcast %98 : vector<18x1xf32> to vector<18x18xf32>
    %100 = arith.subf %96, %99 : vector<18x18xf32>
    %101 = math.exp %100 : vector<18x18xf32>
    %cst_37 = arith.constant dense<0.000000e+00> : vector<18xf32>
    %102 = vector.multi_reduction <add>, %101, %cst_37 [1] : vector<18x18xf32> to vector<18xf32>
    %103 = vector.shape_cast %102 : vector<18xf32> to vector<18x1xf32>
    %104 = tpu.reciprocal %103 {approx = true} : vector<18x1xf32> -> vector<18x1xf32>
    %105 = vector.broadcast %104 : vector<18x1xf32> to vector<18x18xf32>
    %106 = arith.mulf %101, %105 : vector<18x18xf32>
    %cst_38 = arith.constant dense<0.000000e+00> : vector<18x8xf32>
    %107 = tpu.matmul %106, %92, %cst_38 {dimension_numbers = #tpu.dot_dimension_numbers<[1], [0], [0], [1], [0, 0, 1, 1], [], []>} : vector<18x18xf32>, vector<18x8xf32>, vector<18x8xf32> -> vector<18x8xf32>
    %108 = vector.extract_strided_slice %10 {offsets = [16, 0], sizes = [8, 32], strides = [1, 1]} : vector<96x32xf32> to vector<8x32xf32>
    %cst_39 = arith.constant dense<0.000000e+00> : vector<18x32xf32>
    %109 = tpu.matmul %107, %108, %cst_39 {dimension_numbers = #tpu.dot_dimension_numbers<[1], [0], [0], [1], [0, 0, 1, 1], [], []>} : vector<18x8xf32>, vector<8x32xf32>, vector<18x32xf32> -> vector<18x32xf32>
    %110 = arith.addf %89, %109 : vector<18x32xf32>
    %111 = vector.extract_strided_slice %38 {offsets = [0, 24], sizes = [18, 8], strides = [1, 1]} : vector<18x32xf32> to vector<18x8xf32>
    %112 = vector.extract_strided_slice %42 {offsets = [0, 24], sizes = [18, 8], strides = [1, 1]} : vector<18x32xf32> to vector<18x8xf32>
    %113 = vector.extract_strided_slice %46 {offsets = [0, 24], sizes = [18, 8], strides = [1, 1]} : vector<18x32xf32> to vector<18x8xf32>
    %cst_40 = arith.constant dense<0.000000e+00> : vector<18x18xf32>
    %114 = tpu.matmul %111, %112, %cst_40 {dimension_numbers = #tpu.dot_dimension_numbers<[1], [1], [0], [0], [0, 0, 1, 0], [], []>} : vector<18x8xf32>, vector<18x8xf32>, vector<18x18xf32> -> vector<18x18xf32>
    %cst_41 = arith.constant 0.353553385 : f32
    %115 = vector.broadcast %cst_41 : f32 to vector<18x18xf32>
    %116 = arith.mulf %114, %115 : vector<18x18xf32>
    %117 = arith.addf %116, %4 : vector<18x18xf32>
    %cst_42 = arith.constant dense<0xFF800000> : vector<18xf32>
    %118 = vector.multi_reduction <maximumf>, %117, %cst_42 [1] : vector<18x18xf32> to vector<18xf32>
    %119 = vector.shape_cast %118 : vector<18xf32> to vector<18x1xf32>
    %120 = vector.broadcast %119 : vector<18x1xf32> to vector<18x18xf32>
    %121 = arith.subf %117, %120 : vector<18x18xf32>
    %122 = math.exp %121 : vector<18x18xf32>
    %cst_43 = arith.constant dense<0.000000e+00> : vector<18xf32>
    %123 = vector.multi_reduction <add>, %122, %cst_43 [1] : vector<18x18xf32> to vector<18xf32>
    %124 = vector.shape_cast %123 : vector<18xf32> to vector<18x1xf32>
    %125 = tpu.reciprocal %124 {approx = true} : vector<18x1xf32> -> vector<18x1xf32>
    %126 = vector.broadcast %125 : vector<18x1xf32> to vector<18x18xf32>
    %127 = arith.mulf %122, %126 : vector<18x18xf32>
    %cst_44 = arith.constant dense<0.000000e+00> : vector<18x8xf32>
    %128 = tpu.matmul %127, %113, %cst_44 {dimension_numbers = #tpu.dot_dimension_numbers<[1], [0], [0], [1], [0, 0, 1, 1], [], []>} : vector<18x18xf32>, vector<18x8xf32>, vector<18x8xf32> -> vector<18x8xf32>
    %129 = vector.extract_strided_slice %10 {offsets = [24, 0], sizes = [8, 32], strides = [1, 1]} : vector<96x32xf32> to vector<8x32xf32>
    %cst_45 = arith.constant dense<0.000000e+00> : vector<18x32xf32>
    %130 = tpu.matmul %128, %129, %cst_45 {dimension_numbers = #tpu.dot_dimension_numbers<[1], [0], [0], [1], [0, 0, 1, 1], [], []>} : vector<18x8xf32>, vector<8x32xf32>, vector<18x32xf32> -> vector<18x32xf32>
    %131 = arith.addf %110, %130 : vector<18x32xf32>
    %132 = arith.addf %3, %131 : vector<18x32xf32>
    %133 = vector.extract_strided_slice %6 {offsets = [7, 0], sizes = [1, 32], strides = [1, 1]} : vector<10x32xf32> to vector<1x32xf32>
    %134 = vector.broadcast %133 : vector<1x32xf32> to vector<18x32xf32>
    %135 = arith.addf %132, %134 : vector<18x32xf32>
    %136 = vector.extract_strided_slice %6 {offsets = [2, 0], sizes = [1, 32], strides = [1, 1]} : vector<10x32xf32> to vector<1x32xf32>
    %137 = vector.extract_strided_slice %6 {offsets = [3, 0], sizes = [1, 32], strides = [1, 1]} : vector<10x32xf32> to vector<1x32xf32>
    %cst_46 = arith.constant dense<0.000000e+00> : vector<18xf32>
    %138 = vector.multi_reduction <add>, %135, %cst_46 [1] : vector<18x32xf32> to vector<18xf32>
    %139 = vector.shape_cast %138 : vector<18xf32> to vector<18x1xf32>
    %cst_47 = arith.constant 3.200000e+01 : f32
    %140 = vector.broadcast %cst_47 : f32 to vector<18x1xf32>
    %141 = arith.divf %139, %140 : vector<18x1xf32>
    %142 = vector.broadcast %141 : vector<18x1xf32> to vector<18x32xf32>
    %143 = arith.subf %135, %142 : vector<18x32xf32>
    %144 = arith.mulf %143, %143 : vector<18x32xf32>
    %cst_48 = arith.constant dense<0.000000e+00> : vector<18xf32>
    %145 = vector.multi_reduction <add>, %144, %cst_48 [1] : vector<18x32xf32> to vector<18xf32>
    %146 = vector.shape_cast %145 : vector<18xf32> to vector<18x1xf32>
    %cst_49 = arith.constant 3.100000e+01 : f32
    %147 = vector.broadcast %cst_49 : f32 to vector<18x1xf32>
    %148 = arith.divf %146, %147 : vector<18x1xf32>
    %149 = math.sqrt %148 : vector<18x1xf32>
    %cst_50 = arith.constant 9.99999997E-7 : f32
    %150 = vector.broadcast %cst_50 : f32 to vector<18x1xf32>
    %151 = arith.addf %149, %150 : vector<18x1xf32>
    %152 = tpu.reciprocal %151 {approx = true} : vector<18x1xf32> -> vector<18x1xf32>
    %153 = vector.broadcast %136 : vector<1x32xf32> to vector<18x32xf32>
    %154 = arith.mulf %153, %143 : vector<18x32xf32>
    %155 = vector.broadcast %152 : vector<18x1xf32> to vector<18x32xf32>
    %156 = arith.mulf %154, %155 : vector<18x32xf32>
    %157 = vector.broadcast %137 : vector<1x32xf32> to vector<18x32xf32>
    %158 = arith.addf %156, %157 : vector<18x32xf32>
    %159 = vector.extract_strided_slice %10 {offsets = [32, 0], sizes = [32, 32], strides = [1, 1]} : vector<96x32xf32> to vector<32x32xf32>
    %cst_51 = arith.constant dense<0.000000e+00> : vector<18x32xf32>
    %160 = tpu.matmul %158, %159, %cst_51 {dimension_numbers = #tpu.dot_dimension_numbers<[1], [0], [0], [1], [0, 0, 1, 1], [], []>} : vector<18x32xf32>, vector<32x32xf32>, vector<18x32xf32> -> vector<18x32xf32>
    %161 = vector.extract_strided_slice %6 {offsets = [8, 0], sizes = [1, 32], strides = [1, 1]} : vector<10x32xf32> to vector<1x32xf32>
    %162 = vector.broadcast %161 : vector<1x32xf32> to vector<18x32xf32>
    %163 = arith.addf %160, %162 : vector<18x32xf32>
    %cst_52 = arith.constant 0.000000e+00 : f32
    %164 = vector.broadcast %cst_52 : f32 to vector<18x32xf32>
    %165 = arith.maximumf %163, %164 : vector<18x32xf32>
    %166 = vector.extract_strided_slice %10 {offsets = [64, 0], sizes = [32, 32], strides = [1, 1]} : vector<96x32xf32> to vector<32x32xf32>
    %cst_53 = arith.constant dense<0.000000e+00> : vector<18x32xf32>
    %167 = tpu.matmul %165, %166, %cst_53 {dimension_numbers = #tpu.dot_dimension_numbers<[1], [0], [0], [1], [0, 0, 1, 1], [], []>} : vector<18x32xf32>, vector<32x32xf32>, vector<18x32xf32> -> vector<18x32xf32>
    %168 = vector.extract_strided_slice %6 {offsets = [9, 0], sizes = [1, 32], strides = [1, 1]} : vector<10x32xf32> to vector<1x32xf32>
    %169 = vector.broadcast %168 : vector<1x32xf32> to vector<18x32xf32>
    %170 = arith.addf %167, %169 : vector<18x32xf32>
    %171 = arith.addf %135, %170 : vector<18x32xf32>
    %c0_54 = arith.constant 0 : index
    %c0_55 = arith.constant 0 : index
    %172 = vector.load %arg10[%c0_54, %c0_55] : memref<18x32xf32, #tpu.memory_space<vmem>>, vector<18x32xf32>
    tpu.vector_store %arg10[%c0_54, %c0_55], %171 {strides = array<i32>} : memref<18x32xf32, #tpu.memory_space<vmem>>, vector<18x32xf32>,
    %c1_i32 = arith.constant 1 : i32
    %173 = arith.cmpi eq, %arg1, %c1_i32 : i32
    %174 = arith.extui %173 : i1 to i32
    %c0_i32_56 = arith.constant 0 : i32
    %175 = arith.cmpi ne, %174, %c0_i32_56 : i32
    scf.if %175 {
      %c0_57 = arith.constant 0 : index
      %c0_58 = arith.constant 0 : index
      %c0_59 = arith.constant 0 : index
      %176 = vector.load %arg9[%c0_57, %c0_58, %c0_59] : memref<1x18x32xf32, #tpu.memory_space<vmem>>, vector<1x18x32xf32>
      %177 = vector.shape_cast %176 : vector<1x18x32xf32> to vector<18x32xf32>
      %178 = vector.shape_cast %171 : vector<18x32xf32> to vector<1x18x32xf32>
      tpu.vector_store %arg9[%c0_57, %c0_58, %c0_59], %178 {strides = array<i32>} : memref<1x18x32xf32, #tpu.memory_space<vmem>>, vector<1x18x32xf32>,
    } else {
    }
    return
  }
  func.func @transform_0(%arg0: i32, %arg1: i32) -> (i32, i32, i32) {
    %c0_i32 = arith.constant 0 : i32
    %c0_i32_0 = arith.constant 0 : i32
    %c0_i32_1 = arith.constant 0 : i32
    return %arg0, %c0_i32, %c0_i32_0 : i32, i32, i32
  }
  func.func @transform_1(%arg0: i32, %arg1: i32) -> (i32, i32, i32) {
    %c0_i32 = arith.constant 0 : i32
    %c0_i32_0 = arith.constant 0 : i32
    %c0_i32_1 = arith.constant 0 : i32
    return %arg0, %c0_i32, %c0_i32_0 : i32, i32, i32
  }
  func.func @transform_2(%arg0: i32, %arg1: i32) -> (i32, i32, i32) {
    %c0_i32 = arith.constant 0 : i32
    %c0_i32_0 = arith.constant 0 : i32
    %c0_i32_1 = arith.constant 0 : i32
    return %arg0, %c0_i32, %c0_i32_0 : i32, i32, i32
  }
  func.func @transform_3(%arg0: i32, %arg1: i32) -> (i32, i32) {
    %c0_i32 = arith.constant 0 : i32
    %c0_i32_0 = arith.constant 0 : i32
    %c0_i32_1 = arith.constant 0 : i32
    return %c0_i32, %c0_i32_0 : i32, i32
  }
  func.func @transform_4(%arg0: i32, %arg1: i32) -> (i32, i32, i32, i32) {
    %c0_i32 = arith.constant 0 : i32
    %c0_i32_0 = arith.constant 0 : i32
    %c0_i32_1 = arith.constant 0 : i32
    return %arg0, %arg1, %c0_i32, %c0_i32_0 : i32, i32, i32, i32
  }
  func.func @transform_5(%arg0: i32, %arg1: i32) -> (i32, i32, i32, i32) {
    %c0_i32 = arith.constant 0 : i32
    %c0_i32_0 = arith.constant 0 : i32
    %c0_i32_1 = arith.constant 0 : i32
    return %arg0, %arg1, %c0_i32, %c0_i32_0 : i32, i32, i32, i32
  }
  func.func @transform_6(%arg0: i32, %arg1: i32) -> (i32, i32, i32, i32) {
    %c0_i32 = arith.constant 0 : i32
    %c0_i32_0 = arith.constant 0 : i32
    %c0_i32_1 = arith.constant 0 : i32
    return %arg0, %arg1, %c0_i32, %c0_i32_0 : i32, i32, i32, i32
  }
  func.func @transform_7(%arg0: i32, %arg1: i32) -> (i32, i32, i32) {
    %c0_i32 = arith.constant 0 : i32
    %c0_i32_0 = arith.constant 0 : i32
    %c0_i32_1 = arith.constant 0 : i32
    return %arg0, %c0_i32, %c0_i32_0 : i32, i32, i32
  }
}

module attributes {stable_mosaic.version = 11 : i64} {
  func.func @bottleneck_stack_kernel(%arg0: i32, %arg1: memref<2x18x32xf32, #tpu.memory_space<vmem>>, %arg2: memref<1x4x32xf32, #tpu.memory_space<vmem>>, %arg3: memref<26x26xf32, #tpu.memory_space<vmem>>, %arg4: memref<2x1x10x32xf32, #tpu.memory_space<vmem>>, %arg5: memref<2x1x32x96xf32, #tpu.memory_space<vmem>>, %arg6: memref<2x1x96x32xf32, #tpu.memory_space<vmem>>, %arg7: memref<4x32xf32, #tpu.memory_space<vmem>>, %arg8: memref<32x2xf32, #tpu.memory_space<vmem>>, %arg9: memref<1x2xf32, #tpu.memory_space<vmem>>, %arg10: memref<2x2xf32, #tpu.memory_space<vmem>>, %arg11: memref<2x4x32xf32, #tpu.memory_space<vmem>>, %arg12: memref<26x32xf32, #tpu.memory_space<vmem>>, %arg13: memref<26x32xf32, #tpu.memory_space<vmem>>) attributes {dimension_semantics = [#tpu.dimension_semantics<arbitrary>], iteration_bounds = array<i64: 2>, scalar_prefetch = 0 : i64, scratch_operands = 2 : i64, tpu.core_type = #tpu.core_type<tc>, window_params = [{pipeline_mode = #tpu.pipeline_mode<synchronous>, transform_indices = @transform_0, window_bounds = array<i64: 2, 18, 32>}, {pipeline_mode = #tpu.pipeline_mode<synchronous>, transform_indices = @transform_1, window_bounds = array<i64: 1, 4, 32>}, {pipeline_mode = #tpu.pipeline_mode<synchronous>, transform_indices = @transform_2, window_bounds = array<i64: 26, 26>}, {transform_indices = @transform_3, window_bounds = array<i64: 2, 1, 10, 32>}, {transform_indices = @transform_4, window_bounds = array<i64: 2, 1, 32, 96>}, {transform_indices = @transform_5, window_bounds = array<i64: 2, 1, 96, 32>}, {pipeline_mode = #tpu.pipeline_mode<synchronous>, transform_indices = @transform_6, window_bounds = array<i64: 4, 32>}, {pipeline_mode = #tpu.pipeline_mode<synchronous>, transform_indices = @transform_7, window_bounds = array<i64: 32, 2>}, {pipeline_mode = #tpu.pipeline_mode<synchronous>, transform_indices = @transform_8, window_bounds = array<i64: 1, 2>}, {pipeline_mode = #tpu.pipeline_mode<synchronous>, transform_indices = @transform_9, window_bounds = array<i64: 2, 2>}, {pipeline_mode = #tpu.pipeline_mode<synchronous>, transform_indices = @transform_10, window_bounds = array<i64: 2, 4, 32>}]} {
    %c0_i32 = arith.constant 0 : i32
    %0 = arith.cmpi eq, %arg0, %c0_i32 : i32
    %1 = arith.extui %0 : i1 to i32
    %c0_i32_0 = arith.constant 0 : i32
    %2 = arith.cmpi ne, %1, %c0_i32_0 : i32
    scf.if %2 {
      %c0_120 = arith.constant 0 : index
      %c0_121 = arith.constant 0 : index
      %c0_122 = arith.constant 0 : index
      %359 = vector.load %arg2[%c0_120, %c0_121, %c0_122] : memref<1x4x32xf32, #tpu.memory_space<vmem>>, vector<1x4x32xf32>
      %360 = vector.shape_cast %359 : vector<1x4x32xf32> to vector<4x32xf32>
      %c0_123 = arith.constant 0 : index
      %c0_124 = arith.constant 0 : index
      %361 = vector.load %arg12[%c0_123, %c0_124] : memref<26x32xf32, #tpu.memory_space<vmem>>, vector<4x32xf32>
      tpu.vector_store %arg12[%c0_123, %c0_124], %360 {strides = array<i32>} : memref<26x32xf32, #tpu.memory_space<vmem>>, vector<4x32xf32>,
      %c0_125 = arith.constant 0 : index
      %c0_126 = arith.constant 0 : index
      %c0_127 = arith.constant 0 : index
      %362 = vector.load %arg2[%c0_125, %c0_126, %c0_127] : memref<1x4x32xf32, #tpu.memory_space<vmem>>, vector<1x4x32xf32>
      %363 = vector.shape_cast %362 : vector<1x4x32xf32> to vector<4x32xf32>
      %c0_128 = arith.constant 0 : index
      %c0_129 = arith.constant 0 : index
      %364 = vector.load %arg13[%c0_128, %c0_129] : memref<26x32xf32, #tpu.memory_space<vmem>>, vector<4x32xf32>
      tpu.vector_store %arg13[%c0_128, %c0_129], %363 {strides = array<i32>} : memref<26x32xf32, #tpu.memory_space<vmem>>, vector<4x32xf32>,
      %c0_130 = arith.constant 0 : index
      %c0_131 = arith.constant 0 : index
      %c0_132 = arith.constant 0 : index
      %365 = vector.load %arg1[%c0_130, %c0_131, %c0_132] : memref<2x18x32xf32, #tpu.memory_space<vmem>>, vector<1x9x32xf32>
      %366 = vector.shape_cast %365 : vector<1x9x32xf32> to vector<9x32xf32>
      %c4 = arith.constant 4 : index
      %c0_133 = arith.constant 0 : index
      %367 = vector.load %arg12[%c4, %c0_133] : memref<26x32xf32, #tpu.memory_space<vmem>>, vector<9x32xf32>
      tpu.vector_store %arg12[%c4, %c0_133], %366 {strides = array<i32>} : memref<26x32xf32, #tpu.memory_space<vmem>>, vector<9x32xf32>,
      %c1_134 = arith.constant 1 : index
      %c0_135 = arith.constant 0 : index
      %c0_136 = arith.constant 0 : index
      %368 = vector.load %arg1[%c1_134, %c0_135, %c0_136] : memref<2x18x32xf32, #tpu.memory_space<vmem>>, vector<1x9x32xf32>
      %369 = vector.shape_cast %368 : vector<1x9x32xf32> to vector<9x32xf32>
      %c4_137 = arith.constant 4 : index
      %c0_138 = arith.constant 0 : index
      %370 = vector.load %arg13[%c4_137, %c0_138] : memref<26x32xf32, #tpu.memory_space<vmem>>, vector<9x32xf32>
      tpu.vector_store %arg13[%c4_137, %c0_138], %369 {strides = array<i32>} : memref<26x32xf32, #tpu.memory_space<vmem>>, vector<9x32xf32>,
      %c0_139 = arith.constant 0 : index
      %c0_140 = arith.constant 0 : index
      %c0_141 = arith.constant 0 : index
      %371 = vector.load %arg2[%c0_139, %c0_140, %c0_141] : memref<1x4x32xf32, #tpu.memory_space<vmem>>, vector<1x4x32xf32>
      %372 = vector.shape_cast %371 : vector<1x4x32xf32> to vector<4x32xf32>
      %c13_142 = arith.constant 13 : index
      %c0_143 = arith.constant 0 : index
      %373 = vector.load %arg12[%c13_142, %c0_143] : memref<26x32xf32, #tpu.memory_space<vmem>>, vector<4x32xf32>
      tpu.vector_store %arg12[%c13_142, %c0_143], %372 {strides = array<i32>} : memref<26x32xf32, #tpu.memory_space<vmem>>, vector<4x32xf32>,
      %c0_144 = arith.constant 0 : index
      %c0_145 = arith.constant 0 : index
      %c0_146 = arith.constant 0 : index
      %374 = vector.load %arg2[%c0_144, %c0_145, %c0_146] : memref<1x4x32xf32, #tpu.memory_space<vmem>>, vector<1x4x32xf32>
      %375 = vector.shape_cast %374 : vector<1x4x32xf32> to vector<4x32xf32>
      %c13_147 = arith.constant 13 : index
      %c0_148 = arith.constant 0 : index
      %376 = vector.load %arg13[%c13_147, %c0_148] : memref<26x32xf32, #tpu.memory_space<vmem>>, vector<4x32xf32>
      tpu.vector_store %arg13[%c13_147, %c0_148], %375 {strides = array<i32>} : memref<26x32xf32, #tpu.memory_space<vmem>>, vector<4x32xf32>,
      %c0_149 = arith.constant 0 : index
      %c9 = arith.constant 9 : index
      %c0_150 = arith.constant 0 : index
      %377 = vector.load %arg1[%c0_149, %c9, %c0_150] : memref<2x18x32xf32, #tpu.memory_space<vmem>>, vector<1x9x32xf32>
      %378 = vector.shape_cast %377 : vector<1x9x32xf32> to vector<9x32xf32>
      %c17 = arith.constant 17 : index
      %c0_151 = arith.constant 0 : index
      %379 = vector.load %arg12[%c17, %c0_151] : memref<26x32xf32, #tpu.memory_space<vmem>>, vector<9x32xf32>
      tpu.vector_store %arg12[%c17, %c0_151], %378 {strides = array<i32>} : memref<26x32xf32, #tpu.memory_space<vmem>>, vector<9x32xf32>,
      %c1_152 = arith.constant 1 : index
      %c9_153 = arith.constant 9 : index
      %c0_154 = arith.constant 0 : index
      %380 = vector.load %arg1[%c1_152, %c9_153, %c0_154] : memref<2x18x32xf32, #tpu.memory_space<vmem>>, vector<1x9x32xf32>
      %381 = vector.shape_cast %380 : vector<1x9x32xf32> to vector<9x32xf32>
      %c17_155 = arith.constant 17 : index
      %c0_156 = arith.constant 0 : index
      %382 = vector.load %arg13[%c17_155, %c0_156] : memref<26x32xf32, #tpu.memory_space<vmem>>, vector<9x32xf32>
      tpu.vector_store %arg13[%c17_155, %c0_156], %381 {strides = array<i32>} : memref<26x32xf32, #tpu.memory_space<vmem>>, vector<9x32xf32>,
    } else {
    }
    %c0 = arith.constant 0 : index
    %c0_1 = arith.constant 0 : index
    %3 = vector.load %arg3[%c0, %c0_1] : memref<26x26xf32, #tpu.memory_space<vmem>>, vector<26x26xf32>
    %c0_2 = arith.constant 0 : index
    %c0_3 = arith.constant 0 : index
    %4 = vector.load %arg12[%c0_2, %c0_3] : memref<26x32xf32, #tpu.memory_space<vmem>>, vector<26x32xf32>
    %c0_4 = arith.constant 0 : index
    %c0_5 = arith.constant 0 : index
    %c0_6 = arith.constant 0 : index
    %c0_7 = arith.constant 0 : index
    %5 = vector.load %arg4[%c0_4, %c0_5, %c0_6, %c0_7] : memref<2x1x10x32xf32, #tpu.memory_space<vmem>>, vector<1x1x10x32xf32>
    %6 = vector.shape_cast %5 : vector<1x1x10x32xf32> to vector<10x32xf32>
    %c0_8 = arith.constant 0 : index
    %c0_9 = arith.constant 0 : index
    %c0_10 = arith.constant 0 : index
    %c0_11 = arith.constant 0 : index
    %7 = vector.load %arg5[%c0_8, %c0_9, %c0_10, %c0_11] : memref<2x1x32x96xf32, #tpu.memory_space<vmem>>, vector<1x1x32x96xf32>
    %8 = vector.shape_cast %7 : vector<1x1x32x96xf32> to vector<32x96xf32>
    %c0_12 = arith.constant 0 : index
    %c0_13 = arith.constant 0 : index
    %c0_14 = arith.constant 0 : index
    %c0_15 = arith.constant 0 : index
    %9 = vector.load %arg6[%c0_12, %c0_13, %c0_14, %c0_15] : memref<2x1x96x32xf32, #tpu.memory_space<vmem>>, vector<1x1x96x32xf32>
    %10 = vector.shape_cast %9 : vector<1x1x96x32xf32> to vector<96x32xf32>
    %11 = vector.extract_strided_slice %6 {offsets = [0, 0], sizes = [1, 32], strides = [1, 1]} : vector<10x32xf32> to vector<1x32xf32>
    %12 = vector.extract_strided_slice %6 {offsets = [1, 0], sizes = [1, 32], strides = [1, 1]} : vector<10x32xf32> to vector<1x32xf32>
    %cst = arith.constant dense<0.000000e+00> : vector<26xf32>
    %13 = vector.multi_reduction <add>, %4, %cst [1] : vector<26x32xf32> to vector<26xf32>
    %14 = vector.shape_cast %13 : vector<26xf32> to vector<26x1xf32>
    %cst_16 = arith.constant 3.200000e+01 : f32
    %15 = vector.broadcast %cst_16 : f32 to vector<26x1xf32>
    %16 = arith.divf %14, %15 : vector<26x1xf32>
    %17 = vector.broadcast %16 : vector<26x1xf32> to vector<26x32xf32>
    %18 = arith.subf %4, %17 : vector<26x32xf32>
    %19 = arith.mulf %18, %18 : vector<26x32xf32>
    %cst_17 = arith.constant dense<0.000000e+00> : vector<26xf32>
    %20 = vector.multi_reduction <add>, %19, %cst_17 [1] : vector<26x32xf32> to vector<26xf32>
    %21 = vector.shape_cast %20 : vector<26xf32> to vector<26x1xf32>
    %cst_18 = arith.constant 3.100000e+01 : f32
    %22 = vector.broadcast %cst_18 : f32 to vector<26x1xf32>
    %23 = arith.divf %21, %22 : vector<26x1xf32>
    %24 = math.sqrt %23 : vector<26x1xf32>
    %cst_19 = arith.constant 9.99999997E-7 : f32
    %25 = vector.broadcast %cst_19 : f32 to vector<26x1xf32>
    %26 = arith.addf %24, %25 : vector<26x1xf32>
    %27 = tpu.reciprocal %26 {approx = true} : vector<26x1xf32> -> vector<26x1xf32>
    %28 = vector.broadcast %11 : vector<1x32xf32> to vector<26x32xf32>
    %29 = arith.mulf %28, %18 : vector<26x32xf32>
    %30 = vector.broadcast %27 : vector<26x1xf32> to vector<26x32xf32>
    %31 = arith.mulf %29, %30 : vector<26x32xf32>
    %32 = vector.broadcast %12 : vector<1x32xf32> to vector<26x32xf32>
    %33 = arith.addf %31, %32 : vector<26x32xf32>
    %cst_20 = arith.constant dense<0.000000e+00> : vector<26x96xf32>
    %34 = tpu.matmul %33, %8, %cst_20 {dimension_numbers = #tpu.dot_dimension_numbers<[1], [0], [0], [1], [0, 0, 1, 1], [], []>} : vector<26x32xf32>, vector<32x96xf32>, vector<26x96xf32> -> vector<26x96xf32>
    %35 = vector.extract_strided_slice %34 {offsets = [0, 0], sizes = [26, 32], strides = [1, 1]} : vector<26x96xf32> to vector<26x32xf32>
    %36 = vector.extract_strided_slice %6 {offsets = [4, 0], sizes = [1, 32], strides = [1, 1]} : vector<10x32xf32> to vector<1x32xf32>
    %37 = vector.broadcast %36 : vector<1x32xf32> to vector<26x32xf32>
    %38 = arith.addf %35, %37 : vector<26x32xf32>
    %39 = vector.extract_strided_slice %34 {offsets = [0, 32], sizes = [26, 32], strides = [1, 1]} : vector<26x96xf32> to vector<26x32xf32>
    %40 = vector.extract_strided_slice %6 {offsets = [5, 0], sizes = [1, 32], strides = [1, 1]} : vector<10x32xf32> to vector<1x32xf32>
    %41 = vector.broadcast %40 : vector<1x32xf32> to vector<26x32xf32>
    %42 = arith.addf %39, %41 : vector<26x32xf32>
    %43 = vector.extract_strided_slice %34 {offsets = [0, 64], sizes = [26, 32], strides = [1, 1]} : vector<26x96xf32> to vector<26x32xf32>
    %44 = vector.extract_strided_slice %6 {offsets = [6, 0], sizes = [1, 32], strides = [1, 1]} : vector<10x32xf32> to vector<1x32xf32>
    %45 = vector.broadcast %44 : vector<1x32xf32> to vector<26x32xf32>
    %46 = arith.addf %43, %45 : vector<26x32xf32>
    %cst_21 = arith.constant 0.000000e+00 : f32
    %47 = vector.broadcast %cst_21 : f32 to vector<26x32xf32>
    %48 = vector.extract_strided_slice %38 {offsets = [0, 0], sizes = [26, 8], strides = [1, 1]} : vector<26x32xf32> to vector<26x8xf32>
    %49 = vector.extract_strided_slice %42 {offsets = [0, 0], sizes = [26, 8], strides = [1, 1]} : vector<26x32xf32> to vector<26x8xf32>
    %50 = vector.extract_strided_slice %46 {offsets = [0, 0], sizes = [26, 8], strides = [1, 1]} : vector<26x32xf32> to vector<26x8xf32>
    %cst_22 = arith.constant dense<0.000000e+00> : vector<26x26xf32>
    %51 = tpu.matmul %48, %49, %cst_22 {dimension_numbers = #tpu.dot_dimension_numbers<[1], [1], [0], [0], [0, 0, 1, 0], [], []>} : vector<26x8xf32>, vector<26x8xf32>, vector<26x26xf32> -> vector<26x26xf32>
    %cst_23 = arith.constant 0.353553385 : f32
    %52 = vector.broadcast %cst_23 : f32 to vector<26x26xf32>
    %53 = arith.mulf %51, %52 : vector<26x26xf32>
    %54 = arith.addf %53, %3 : vector<26x26xf32>
    %cst_24 = arith.constant dense<0xFF800000> : vector<26xf32>
    %55 = vector.multi_reduction <maximumf>, %54, %cst_24 [1] : vector<26x26xf32> to vector<26xf32>
    %56 = vector.shape_cast %55 : vector<26xf32> to vector<26x1xf32>
    %57 = vector.broadcast %56 : vector<26x1xf32> to vector<26x26xf32>
    %58 = arith.subf %54, %57 : vector<26x26xf32>
    %59 = math.exp %58 : vector<26x26xf32>
    %cst_25 = arith.constant dense<0.000000e+00> : vector<26xf32>
    %60 = vector.multi_reduction <add>, %59, %cst_25 [1] : vector<26x26xf32> to vector<26xf32>
    %61 = vector.shape_cast %60 : vector<26xf32> to vector<26x1xf32>
    %62 = tpu.reciprocal %61 {approx = true} : vector<26x1xf32> -> vector<26x1xf32>
    %63 = vector.broadcast %62 : vector<26x1xf32> to vector<26x26xf32>
    %64 = arith.mulf %59, %63 : vector<26x26xf32>
    %cst_26 = arith.constant dense<0.000000e+00> : vector<26x8xf32>
    %65 = tpu.matmul %64, %50, %cst_26 {dimension_numbers = #tpu.dot_dimension_numbers<[1], [0], [0], [1], [0, 0, 1, 1], [], []>} : vector<26x26xf32>, vector<26x8xf32>, vector<26x8xf32> -> vector<26x8xf32>
    %66 = vector.extract_strided_slice %10 {offsets = [0, 0], sizes = [8, 32], strides = [1, 1]} : vector<96x32xf32> to vector<8x32xf32>
    %cst_27 = arith.constant dense<0.000000e+00> : vector<26x32xf32>
    %67 = tpu.matmul %65, %66, %cst_27 {dimension_numbers = #tpu.dot_dimension_numbers<[1], [0], [0], [1], [0, 0, 1, 1], [], []>} : vector<26x8xf32>, vector<8x32xf32>, vector<26x32xf32> -> vector<26x32xf32>
    %68 = arith.addf %47, %67 : vector<26x32xf32>
    %69 = vector.extract_strided_slice %38 {offsets = [0, 8], sizes = [26, 8], strides = [1, 1]} : vector<26x32xf32> to vector<26x8xf32>
    %70 = vector.extract_strided_slice %42 {offsets = [0, 8], sizes = [26, 8], strides = [1, 1]} : vector<26x32xf32> to vector<26x8xf32>
    %71 = vector.extract_strided_slice %46 {offsets = [0, 8], sizes = [26, 8], strides = [1, 1]} : vector<26x32xf32> to vector<26x8xf32>
    %cst_28 = arith.constant dense<0.000000e+00> : vector<26x26xf32>
    %72 = tpu.matmul %69, %70, %cst_28 {dimension_numbers = #tpu.dot_dimension_numbers<[1], [1], [0], [0], [0, 0, 1, 0], [], []>} : vector<26x8xf32>, vector<26x8xf32>, vector<26x26xf32> -> vector<26x26xf32>
    %cst_29 = arith.constant 0.353553385 : f32
    %73 = vector.broadcast %cst_29 : f32 to vector<26x26xf32>
    %74 = arith.mulf %72, %73 : vector<26x26xf32>
    %75 = arith.addf %74, %3 : vector<26x26xf32>
    %cst_30 = arith.constant dense<0xFF800000> : vector<26xf32>
    %76 = vector.multi_reduction <maximumf>, %75, %cst_30 [1] : vector<26x26xf32> to vector<26xf32>
    %77 = vector.shape_cast %76 : vector<26xf32> to vector<26x1xf32>
    %78 = vector.broadcast %77 : vector<26x1xf32> to vector<26x26xf32>
    %79 = arith.subf %75, %78 : vector<26x26xf32>
    %80 = math.exp %79 : vector<26x26xf32>
    %cst_31 = arith.constant dense<0.000000e+00> : vector<26xf32>
    %81 = vector.multi_reduction <add>, %80, %cst_31 [1] : vector<26x26xf32> to vector<26xf32>
    %82 = vector.shape_cast %81 : vector<26xf32> to vector<26x1xf32>
    %83 = tpu.reciprocal %82 {approx = true} : vector<26x1xf32> -> vector<26x1xf32>
    %84 = vector.broadcast %83 : vector<26x1xf32> to vector<26x26xf32>
    %85 = arith.mulf %80, %84 : vector<26x26xf32>
    %cst_32 = arith.constant dense<0.000000e+00> : vector<26x8xf32>
    %86 = tpu.matmul %85, %71, %cst_32 {dimension_numbers = #tpu.dot_dimension_numbers<[1], [0], [0], [1], [0, 0, 1, 1], [], []>} : vector<26x26xf32>, vector<26x8xf32>, vector<26x8xf32> -> vector<26x8xf32>
    %87 = vector.extract_strided_slice %10 {offsets = [8, 0], sizes = [8, 32], strides = [1, 1]} : vector<96x32xf32> to vector<8x32xf32>
    %cst_33 = arith.constant dense<0.000000e+00> : vector<26x32xf32>
    %88 = tpu.matmul %86, %87, %cst_33 {dimension_numbers = #tpu.dot_dimension_numbers<[1], [0], [0], [1], [0, 0, 1, 1], [], []>} : vector<26x8xf32>, vector<8x32xf32>, vector<26x32xf32> -> vector<26x32xf32>
    %89 = arith.addf %68, %88 : vector<26x32xf32>
    %90 = vector.extract_strided_slice %38 {offsets = [0, 16], sizes = [26, 8], strides = [1, 1]} : vector<26x32xf32> to vector<26x8xf32>
    %91 = vector.extract_strided_slice %42 {offsets = [0, 16], sizes = [26, 8], strides = [1, 1]} : vector<26x32xf32> to vector<26x8xf32>
    %92 = vector.extract_strided_slice %46 {offsets = [0, 16], sizes = [26, 8], strides = [1, 1]} : vector<26x32xf32> to vector<26x8xf32>
    %cst_34 = arith.constant dense<0.000000e+00> : vector<26x26xf32>
    %93 = tpu.matmul %90, %91, %cst_34 {dimension_numbers = #tpu.dot_dimension_numbers<[1], [1], [0], [0], [0, 0, 1, 0], [], []>} : vector<26x8xf32>, vector<26x8xf32>, vector<26x26xf32> -> vector<26x26xf32>
    %cst_35 = arith.constant 0.353553385 : f32
    %94 = vector.broadcast %cst_35 : f32 to vector<26x26xf32>
    %95 = arith.mulf %93, %94 : vector<26x26xf32>
    %96 = arith.addf %95, %3 : vector<26x26xf32>
    %cst_36 = arith.constant dense<0xFF800000> : vector<26xf32>
    %97 = vector.multi_reduction <maximumf>, %96, %cst_36 [1] : vector<26x26xf32> to vector<26xf32>
    %98 = vector.shape_cast %97 : vector<26xf32> to vector<26x1xf32>
    %99 = vector.broadcast %98 : vector<26x1xf32> to vector<26x26xf32>
    %100 = arith.subf %96, %99 : vector<26x26xf32>
    %101 = math.exp %100 : vector<26x26xf32>
    %cst_37 = arith.constant dense<0.000000e+00> : vector<26xf32>
    %102 = vector.multi_reduction <add>, %101, %cst_37 [1] : vector<26x26xf32> to vector<26xf32>
    %103 = vector.shape_cast %102 : vector<26xf32> to vector<26x1xf32>
    %104 = tpu.reciprocal %103 {approx = true} : vector<26x1xf32> -> vector<26x1xf32>
    %105 = vector.broadcast %104 : vector<26x1xf32> to vector<26x26xf32>
    %106 = arith.mulf %101, %105 : vector<26x26xf32>
    %cst_38 = arith.constant dense<0.000000e+00> : vector<26x8xf32>
    %107 = tpu.matmul %106, %92, %cst_38 {dimension_numbers = #tpu.dot_dimension_numbers<[1], [0], [0], [1], [0, 0, 1, 1], [], []>} : vector<26x26xf32>, vector<26x8xf32>, vector<26x8xf32> -> vector<26x8xf32>
    %108 = vector.extract_strided_slice %10 {offsets = [16, 0], sizes = [8, 32], strides = [1, 1]} : vector<96x32xf32> to vector<8x32xf32>
    %cst_39 = arith.constant dense<0.000000e+00> : vector<26x32xf32>
    %109 = tpu.matmul %107, %108, %cst_39 {dimension_numbers = #tpu.dot_dimension_numbers<[1], [0], [0], [1], [0, 0, 1, 1], [], []>} : vector<26x8xf32>, vector<8x32xf32>, vector<26x32xf32> -> vector<26x32xf32>
    %110 = arith.addf %89, %109 : vector<26x32xf32>
    %111 = vector.extract_strided_slice %38 {offsets = [0, 24], sizes = [26, 8], strides = [1, 1]} : vector<26x32xf32> to vector<26x8xf32>
    %112 = vector.extract_strided_slice %42 {offsets = [0, 24], sizes = [26, 8], strides = [1, 1]} : vector<26x32xf32> to vector<26x8xf32>
    %113 = vector.extract_strided_slice %46 {offsets = [0, 24], sizes = [26, 8], strides = [1, 1]} : vector<26x32xf32> to vector<26x8xf32>
    %cst_40 = arith.constant dense<0.000000e+00> : vector<26x26xf32>
    %114 = tpu.matmul %111, %112, %cst_40 {dimension_numbers = #tpu.dot_dimension_numbers<[1], [1], [0], [0], [0, 0, 1, 0], [], []>} : vector<26x8xf32>, vector<26x8xf32>, vector<26x26xf32> -> vector<26x26xf32>
    %cst_41 = arith.constant 0.353553385 : f32
    %115 = vector.broadcast %cst_41 : f32 to vector<26x26xf32>
    %116 = arith.mulf %114, %115 : vector<26x26xf32>
    %117 = arith.addf %116, %3 : vector<26x26xf32>
    %cst_42 = arith.constant dense<0xFF800000> : vector<26xf32>
    %118 = vector.multi_reduction <maximumf>, %117, %cst_42 [1] : vector<26x26xf32> to vector<26xf32>
    %119 = vector.shape_cast %118 : vector<26xf32> to vector<26x1xf32>
    %120 = vector.broadcast %119 : vector<26x1xf32> to vector<26x26xf32>
    %121 = arith.subf %117, %120 : vector<26x26xf32>
    %122 = math.exp %121 : vector<26x26xf32>
    %cst_43 = arith.constant dense<0.000000e+00> : vector<26xf32>
    %123 = vector.multi_reduction <add>, %122, %cst_43 [1] : vector<26x26xf32> to vector<26xf32>
    %124 = vector.shape_cast %123 : vector<26xf32> to vector<26x1xf32>
    %125 = tpu.reciprocal %124 {approx = true} : vector<26x1xf32> -> vector<26x1xf32>
    %126 = vector.broadcast %125 : vector<26x1xf32> to vector<26x26xf32>
    %127 = arith.mulf %122, %126 : vector<26x26xf32>
    %cst_44 = arith.constant dense<0.000000e+00> : vector<26x8xf32>
    %128 = tpu.matmul %127, %113, %cst_44 {dimension_numbers = #tpu.dot_dimension_numbers<[1], [0], [0], [1], [0, 0, 1, 1], [], []>} : vector<26x26xf32>, vector<26x8xf32>, vector<26x8xf32> -> vector<26x8xf32>
    %129 = vector.extract_strided_slice %10 {offsets = [24, 0], sizes = [8, 32], strides = [1, 1]} : vector<96x32xf32> to vector<8x32xf32>
    %cst_45 = arith.constant dense<0.000000e+00> : vector<26x32xf32>
    %130 = tpu.matmul %128, %129, %cst_45 {dimension_numbers = #tpu.dot_dimension_numbers<[1], [0], [0], [1], [0, 0, 1, 1], [], []>} : vector<26x8xf32>, vector<8x32xf32>, vector<26x32xf32> -> vector<26x32xf32>
    %131 = arith.addf %110, %130 : vector<26x32xf32>
    %132 = arith.addf %4, %131 : vector<26x32xf32>
    %133 = vector.extract_strided_slice %6 {offsets = [7, 0], sizes = [1, 32], strides = [1, 1]} : vector<10x32xf32> to vector<1x32xf32>
    %134 = vector.broadcast %133 : vector<1x32xf32> to vector<26x32xf32>
    %135 = arith.addf %132, %134 : vector<26x32xf32>
    %136 = vector.extract_strided_slice %6 {offsets = [2, 0], sizes = [1, 32], strides = [1, 1]} : vector<10x32xf32> to vector<1x32xf32>
    %137 = vector.extract_strided_slice %6 {offsets = [3, 0], sizes = [1, 32], strides = [1, 1]} : vector<10x32xf32> to vector<1x32xf32>
    %cst_46 = arith.constant dense<0.000000e+00> : vector<26xf32>
    %138 = vector.multi_reduction <add>, %135, %cst_46 [1] : vector<26x32xf32> to vector<26xf32>
    %139 = vector.shape_cast %138 : vector<26xf32> to vector<26x1xf32>
    %cst_47 = arith.constant 3.200000e+01 : f32
    %140 = vector.broadcast %cst_47 : f32 to vector<26x1xf32>
    %141 = arith.divf %139, %140 : vector<26x1xf32>
    %142 = vector.broadcast %141 : vector<26x1xf32> to vector<26x32xf32>
    %143 = arith.subf %135, %142 : vector<26x32xf32>
    %144 = arith.mulf %143, %143 : vector<26x32xf32>
    %cst_48 = arith.constant dense<0.000000e+00> : vector<26xf32>
    %145 = vector.multi_reduction <add>, %144, %cst_48 [1] : vector<26x32xf32> to vector<26xf32>
    %146 = vector.shape_cast %145 : vector<26xf32> to vector<26x1xf32>
    %cst_49 = arith.constant 3.100000e+01 : f32
    %147 = vector.broadcast %cst_49 : f32 to vector<26x1xf32>
    %148 = arith.divf %146, %147 : vector<26x1xf32>
    %149 = math.sqrt %148 : vector<26x1xf32>
    %cst_50 = arith.constant 9.99999997E-7 : f32
    %150 = vector.broadcast %cst_50 : f32 to vector<26x1xf32>
    %151 = arith.addf %149, %150 : vector<26x1xf32>
    %152 = tpu.reciprocal %151 {approx = true} : vector<26x1xf32> -> vector<26x1xf32>
    %153 = vector.broadcast %136 : vector<1x32xf32> to vector<26x32xf32>
    %154 = arith.mulf %153, %143 : vector<26x32xf32>
    %155 = vector.broadcast %152 : vector<26x1xf32> to vector<26x32xf32>
    %156 = arith.mulf %154, %155 : vector<26x32xf32>
    %157 = vector.broadcast %137 : vector<1x32xf32> to vector<26x32xf32>
    %158 = arith.addf %156, %157 : vector<26x32xf32>
    %159 = vector.extract_strided_slice %10 {offsets = [32, 0], sizes = [32, 32], strides = [1, 1]} : vector<96x32xf32> to vector<32x32xf32>
    %cst_51 = arith.constant dense<0.000000e+00> : vector<26x32xf32>
    %160 = tpu.matmul %158, %159, %cst_51 {dimension_numbers = #tpu.dot_dimension_numbers<[1], [0], [0], [1], [0, 0, 1, 1], [], []>} : vector<26x32xf32>, vector<32x32xf32>, vector<26x32xf32> -> vector<26x32xf32>
    %161 = vector.extract_strided_slice %6 {offsets = [8, 0], sizes = [1, 32], strides = [1, 1]} : vector<10x32xf32> to vector<1x32xf32>
    %162 = vector.broadcast %161 : vector<1x32xf32> to vector<26x32xf32>
    %163 = arith.addf %160, %162 : vector<26x32xf32>
    %cst_52 = arith.constant 0.000000e+00 : f32
    %164 = vector.broadcast %cst_52 : f32 to vector<26x32xf32>
    %165 = arith.maximumf %163, %164 : vector<26x32xf32>
    %166 = vector.extract_strided_slice %10 {offsets = [64, 0], sizes = [32, 32], strides = [1, 1]} : vector<96x32xf32> to vector<32x32xf32>
    %cst_53 = arith.constant dense<0.000000e+00> : vector<26x32xf32>
    %167 = tpu.matmul %165, %166, %cst_53 {dimension_numbers = #tpu.dot_dimension_numbers<[1], [0], [0], [1], [0, 0, 1, 1], [], []>} : vector<26x32xf32>, vector<32x32xf32>, vector<26x32xf32> -> vector<26x32xf32>
    %168 = vector.extract_strided_slice %6 {offsets = [9, 0], sizes = [1, 32], strides = [1, 1]} : vector<10x32xf32> to vector<1x32xf32>
    %169 = vector.broadcast %168 : vector<1x32xf32> to vector<26x32xf32>
    %170 = arith.addf %167, %169 : vector<26x32xf32>
    %171 = arith.addf %135, %170 : vector<26x32xf32>
    %c0_54 = arith.constant 0 : index
    %c0_55 = arith.constant 0 : index
    %172 = vector.load %arg13[%c0_54, %c0_55] : memref<26x32xf32, #tpu.memory_space<vmem>>, vector<26x32xf32>
    %c1 = arith.constant 1 : index
    %c0_56 = arith.constant 0 : index
    %c0_57 = arith.constant 0 : index
    %c0_58 = arith.constant 0 : index
    %173 = vector.load %arg4[%c1, %c0_56, %c0_57, %c0_58] : memref<2x1x10x32xf32, #tpu.memory_space<vmem>>, vector<1x1x10x32xf32>
    %174 = vector.shape_cast %173 : vector<1x1x10x32xf32> to vector<10x32xf32>
    %c1_59 = arith.constant 1 : index
    %c0_60 = arith.constant 0 : index
    %c0_61 = arith.constant 0 : index
    %c0_62 = arith.constant 0 : index
    %175 = vector.load %arg5[%c1_59, %c0_60, %c0_61, %c0_62] : memref<2x1x32x96xf32, #tpu.memory_space<vmem>>, vector<1x1x32x96xf32>
    %176 = vector.shape_cast %175 : vector<1x1x32x96xf32> to vector<32x96xf32>
    %c1_63 = arith.constant 1 : index
    %c0_64 = arith.constant 0 : index
    %c0_65 = arith.constant 0 : index
    %c0_66 = arith.constant 0 : index
    %177 = vector.load %arg6[%c1_63, %c0_64, %c0_65, %c0_66] : memref<2x1x96x32xf32, #tpu.memory_space<vmem>>, vector<1x1x96x32xf32>
    %178 = vector.shape_cast %177 : vector<1x1x96x32xf32> to vector<96x32xf32>
    %179 = vector.extract_strided_slice %174 {offsets = [0, 0], sizes = [1, 32], strides = [1, 1]} : vector<10x32xf32> to vector<1x32xf32>
    %180 = vector.extract_strided_slice %174 {offsets = [1, 0], sizes = [1, 32], strides = [1, 1]} : vector<10x32xf32> to vector<1x32xf32>
    %cst_67 = arith.constant dense<0.000000e+00> : vector<26xf32>
    %181 = vector.multi_reduction <add>, %172, %cst_67 [1] : vector<26x32xf32> to vector<26xf32>
    %182 = vector.shape_cast %181 : vector<26xf32> to vector<26x1xf32>
    %cst_68 = arith.constant 3.200000e+01 : f32
    %183 = vector.broadcast %cst_68 : f32 to vector<26x1xf32>
    %184 = arith.divf %182, %183 : vector<26x1xf32>
    %185 = vector.broadcast %184 : vector<26x1xf32> to vector<26x32xf32>
    %186 = arith.subf %172, %185 : vector<26x32xf32>
    %187 = arith.mulf %186, %186 : vector<26x32xf32>
    %cst_69 = arith.constant dense<0.000000e+00> : vector<26xf32>
    %188 = vector.multi_reduction <add>, %187, %cst_69 [1] : vector<26x32xf32> to vector<26xf32>
    %189 = vector.shape_cast %188 : vector<26xf32> to vector<26x1xf32>
    %cst_70 = arith.constant 3.100000e+01 : f32
    %190 = vector.broadcast %cst_70 : f32 to vector<26x1xf32>
    %191 = arith.divf %189, %190 : vector<26x1xf32>
    %192 = math.sqrt %191 : vector<26x1xf32>
    %cst_71 = arith.constant 9.99999997E-7 : f32
    %193 = vector.broadcast %cst_71 : f32 to vector<26x1xf32>
    %194 = arith.addf %192, %193 : vector<26x1xf32>
    %195 = tpu.reciprocal %194 {approx = true} : vector<26x1xf32> -> vector<26x1xf32>
    %196 = vector.broadcast %179 : vector<1x32xf32> to vector<26x32xf32>
    %197 = arith.mulf %196, %186 : vector<26x32xf32>
    %198 = vector.broadcast %195 : vector<26x1xf32> to vector<26x32xf32>
    %199 = arith.mulf %197, %198 : vector<26x32xf32>
    %200 = vector.broadcast %180 : vector<1x32xf32> to vector<26x32xf32>
    %201 = arith.addf %199, %200 : vector<26x32xf32>
    %cst_72 = arith.constant dense<0.000000e+00> : vector<26x96xf32>
    %202 = tpu.matmul %201, %176, %cst_72 {dimension_numbers = #tpu.dot_dimension_numbers<[1], [0], [0], [1], [0, 0, 1, 1], [], []>} : vector<26x32xf32>, vector<32x96xf32>, vector<26x96xf32> -> vector<26x96xf32>
    %203 = vector.extract_strided_slice %202 {offsets = [0, 0], sizes = [26, 32], strides = [1, 1]} : vector<26x96xf32> to vector<26x32xf32>
    %204 = vector.extract_strided_slice %174 {offsets = [4, 0], sizes = [1, 32], strides = [1, 1]} : vector<10x32xf32> to vector<1x32xf32>
    %205 = vector.broadcast %204 : vector<1x32xf32> to vector<26x32xf32>
    %206 = arith.addf %203, %205 : vector<26x32xf32>
    %207 = vector.extract_strided_slice %202 {offsets = [0, 32], sizes = [26, 32], strides = [1, 1]} : vector<26x96xf32> to vector<26x32xf32>
    %208 = vector.extract_strided_slice %174 {offsets = [5, 0], sizes = [1, 32], strides = [1, 1]} : vector<10x32xf32> to vector<1x32xf32>
    %209 = vector.broadcast %208 : vector<1x32xf32> to vector<26x32xf32>
    %210 = arith.addf %207, %209 : vector<26x32xf32>
    %211 = vector.extract_strided_slice %202 {offsets = [0, 64], sizes = [26, 32], strides = [1, 1]} : vector<26x96xf32> to vector<26x32xf32>
    %212 = vector.extract_strided_slice %174 {offsets = [6, 0], sizes = [1, 32], strides = [1, 1]} : vector<10x32xf32> to vector<1x32xf32>
    %213 = vector.broadcast %212 : vector<1x32xf32> to vector<26x32xf32>
    %214 = arith.addf %211, %213 : vector<26x32xf32>
    %cst_73 = arith.constant 0.000000e+00 : f32
    %215 = vector.broadcast %cst_73 : f32 to vector<26x32xf32>
    %216 = vector.extract_strided_slice %206 {offsets = [0, 0], sizes = [26, 8], strides = [1, 1]} : vector<26x32xf32> to vector<26x8xf32>
    %217 = vector.extract_strided_slice %210 {offsets = [0, 0], sizes = [26, 8], strides = [1, 1]} : vector<26x32xf32> to vector<26x8xf32>
    %218 = vector.extract_strided_slice %214 {offsets = [0, 0], sizes = [26, 8], strides = [1, 1]} : vector<26x32xf32> to vector<26x8xf32>
    %cst_74 = arith.constant dense<0.000000e+00> : vector<26x26xf32>
    %219 = tpu.matmul %216, %217, %cst_74 {dimension_numbers = #tpu.dot_dimension_numbers<[1], [1], [0], [0], [0, 0, 1, 0], [], []>} : vector<26x8xf32>, vector<26x8xf32>, vector<26x26xf32> -> vector<26x26xf32>
    %cst_75 = arith.constant 0.353553385 : f32
    %220 = vector.broadcast %cst_75 : f32 to vector<26x26xf32>
    %221 = arith.mulf %219, %220 : vector<26x26xf32>
    %222 = arith.addf %221, %3 : vector<26x26xf32>
    %cst_76 = arith.constant dense<0xFF800000> : vector<26xf32>
    %223 = vector.multi_reduction <maximumf>, %222, %cst_76 [1] : vector<26x26xf32> to vector<26xf32>
    %224 = vector.shape_cast %223 : vector<26xf32> to vector<26x1xf32>
    %225 = vector.broadcast %224 : vector<26x1xf32> to vector<26x26xf32>
    %226 = arith.subf %222, %225 : vector<26x26xf32>
    %227 = math.exp %226 : vector<26x26xf32>
    %cst_77 = arith.constant dense<0.000000e+00> : vector<26xf32>
    %228 = vector.multi_reduction <add>, %227, %cst_77 [1] : vector<26x26xf32> to vector<26xf32>
    %229 = vector.shape_cast %228 : vector<26xf32> to vector<26x1xf32>
    %230 = tpu.reciprocal %229 {approx = true} : vector<26x1xf32> -> vector<26x1xf32>
    %231 = vector.broadcast %230 : vector<26x1xf32> to vector<26x26xf32>
    %232 = arith.mulf %227, %231 : vector<26x26xf32>
    %cst_78 = arith.constant dense<0.000000e+00> : vector<26x8xf32>
    %233 = tpu.matmul %232, %218, %cst_78 {dimension_numbers = #tpu.dot_dimension_numbers<[1], [0], [0], [1], [0, 0, 1, 1], [], []>} : vector<26x26xf32>, vector<26x8xf32>, vector<26x8xf32> -> vector<26x8xf32>
    %234 = vector.extract_strided_slice %178 {offsets = [0, 0], sizes = [8, 32], strides = [1, 1]} : vector<96x32xf32> to vector<8x32xf32>
    %cst_79 = arith.constant dense<0.000000e+00> : vector<26x32xf32>
    %235 = tpu.matmul %233, %234, %cst_79 {dimension_numbers = #tpu.dot_dimension_numbers<[1], [0], [0], [1], [0, 0, 1, 1], [], []>} : vector<26x8xf32>, vector<8x32xf32>, vector<26x32xf32> -> vector<26x32xf32>
    %236 = arith.addf %215, %235 : vector<26x32xf32>
    %237 = vector.extract_strided_slice %206 {offsets = [0, 8], sizes = [26, 8], strides = [1, 1]} : vector<26x32xf32> to vector<26x8xf32>
    %238 = vector.extract_strided_slice %210 {offsets = [0, 8], sizes = [26, 8], strides = [1, 1]} : vector<26x32xf32> to vector<26x8xf32>
    %239 = vector.extract_strided_slice %214 {offsets = [0, 8], sizes = [26, 8], strides = [1, 1]} : vector<26x32xf32> to vector<26x8xf32>
    %cst_80 = arith.constant dense<0.000000e+00> : vector<26x26xf32>
    %240 = tpu.matmul %237, %238, %cst_80 {dimension_numbers = #tpu.dot_dimension_numbers<[1], [1], [0], [0], [0, 0, 1, 0], [], []>} : vector<26x8xf32>, vector<26x8xf32>, vector<26x26xf32> -> vector<26x26xf32>
    %cst_81 = arith.constant 0.353553385 : f32
    %241 = vector.broadcast %cst_81 : f32 to vector<26x26xf32>
    %242 = arith.mulf %240, %241 : vector<26x26xf32>
    %243 = arith.addf %242, %3 : vector<26x26xf32>
    %cst_82 = arith.constant dense<0xFF800000> : vector<26xf32>
    %244 = vector.multi_reduction <maximumf>, %243, %cst_82 [1] : vector<26x26xf32> to vector<26xf32>
    %245 = vector.shape_cast %244 : vector<26xf32> to vector<26x1xf32>
    %246 = vector.broadcast %245 : vector<26x1xf32> to vector<26x26xf32>
    %247 = arith.subf %243, %246 : vector<26x26xf32>
    %248 = math.exp %247 : vector<26x26xf32>
    %cst_83 = arith.constant dense<0.000000e+00> : vector<26xf32>
    %249 = vector.multi_reduction <add>, %248, %cst_83 [1] : vector<26x26xf32> to vector<26xf32>
    %250 = vector.shape_cast %249 : vector<26xf32> to vector<26x1xf32>
    %251 = tpu.reciprocal %250 {approx = true} : vector<26x1xf32> -> vector<26x1xf32>
    %252 = vector.broadcast %251 : vector<26x1xf32> to vector<26x26xf32>
    %253 = arith.mulf %248, %252 : vector<26x26xf32>
    %cst_84 = arith.constant dense<0.000000e+00> : vector<26x8xf32>
    %254 = tpu.matmul %253, %239, %cst_84 {dimension_numbers = #tpu.dot_dimension_numbers<[1], [0], [0], [1], [0, 0, 1, 1], [], []>} : vector<26x26xf32>, vector<26x8xf32>, vector<26x8xf32> -> vector<26x8xf32>
    %255 = vector.extract_strided_slice %178 {offsets = [8, 0], sizes = [8, 32], strides = [1, 1]} : vector<96x32xf32> to vector<8x32xf32>
    %cst_85 = arith.constant dense<0.000000e+00> : vector<26x32xf32>
    %256 = tpu.matmul %254, %255, %cst_85 {dimension_numbers = #tpu.dot_dimension_numbers<[1], [0], [0], [1], [0, 0, 1, 1], [], []>} : vector<26x8xf32>, vector<8x32xf32>, vector<26x32xf32> -> vector<26x32xf32>
    %257 = arith.addf %236, %256 : vector<26x32xf32>
    %258 = vector.extract_strided_slice %206 {offsets = [0, 16], sizes = [26, 8], strides = [1, 1]} : vector<26x32xf32> to vector<26x8xf32>
    %259 = vector.extract_strided_slice %210 {offsets = [0, 16], sizes = [26, 8], strides = [1, 1]} : vector<26x32xf32> to vector<26x8xf32>
    %260 = vector.extract_strided_slice %214 {offsets = [0, 16], sizes = [26, 8], strides = [1, 1]} : vector<26x32xf32> to vector<26x8xf32>
    %cst_86 = arith.constant dense<0.000000e+00> : vector<26x26xf32>
    %261 = tpu.matmul %258, %259, %cst_86 {dimension_numbers = #tpu.dot_dimension_numbers<[1], [1], [0], [0], [0, 0, 1, 0], [], []>} : vector<26x8xf32>, vector<26x8xf32>, vector<26x26xf32> -> vector<26x26xf32>
    %cst_87 = arith.constant 0.353553385 : f32
    %262 = vector.broadcast %cst_87 : f32 to vector<26x26xf32>
    %263 = arith.mulf %261, %262 : vector<26x26xf32>
    %264 = arith.addf %263, %3 : vector<26x26xf32>
    %cst_88 = arith.constant dense<0xFF800000> : vector<26xf32>
    %265 = vector.multi_reduction <maximumf>, %264, %cst_88 [1] : vector<26x26xf32> to vector<26xf32>
    %266 = vector.shape_cast %265 : vector<26xf32> to vector<26x1xf32>
    %267 = vector.broadcast %266 : vector<26x1xf32> to vector<26x26xf32>
    %268 = arith.subf %264, %267 : vector<26x26xf32>
    %269 = math.exp %268 : vector<26x26xf32>
    %cst_89 = arith.constant dense<0.000000e+00> : vector<26xf32>
    %270 = vector.multi_reduction <add>, %269, %cst_89 [1] : vector<26x26xf32> to vector<26xf32>
    %271 = vector.shape_cast %270 : vector<26xf32> to vector<26x1xf32>
    %272 = tpu.reciprocal %271 {approx = true} : vector<26x1xf32> -> vector<26x1xf32>
    %273 = vector.broadcast %272 : vector<26x1xf32> to vector<26x26xf32>
    %274 = arith.mulf %269, %273 : vector<26x26xf32>
    %cst_90 = arith.constant dense<0.000000e+00> : vector<26x8xf32>
    %275 = tpu.matmul %274, %260, %cst_90 {dimension_numbers = #tpu.dot_dimension_numbers<[1], [0], [0], [1], [0, 0, 1, 1], [], []>} : vector<26x26xf32>, vector<26x8xf32>, vector<26x8xf32> -> vector<26x8xf32>
    %276 = vector.extract_strided_slice %178 {offsets = [16, 0], sizes = [8, 32], strides = [1, 1]} : vector<96x32xf32> to vector<8x32xf32>
    %cst_91 = arith.constant dense<0.000000e+00> : vector<26x32xf32>
    %277 = tpu.matmul %275, %276, %cst_91 {dimension_numbers = #tpu.dot_dimension_numbers<[1], [0], [0], [1], [0, 0, 1, 1], [], []>} : vector<26x8xf32>, vector<8x32xf32>, vector<26x32xf32> -> vector<26x32xf32>
    %278 = arith.addf %257, %277 : vector<26x32xf32>
    %279 = vector.extract_strided_slice %206 {offsets = [0, 24], sizes = [26, 8], strides = [1, 1]} : vector<26x32xf32> to vector<26x8xf32>
    %280 = vector.extract_strided_slice %210 {offsets = [0, 24], sizes = [26, 8], strides = [1, 1]} : vector<26x32xf32> to vector<26x8xf32>
    %281 = vector.extract_strided_slice %214 {offsets = [0, 24], sizes = [26, 8], strides = [1, 1]} : vector<26x32xf32> to vector<26x8xf32>
    %cst_92 = arith.constant dense<0.000000e+00> : vector<26x26xf32>
    %282 = tpu.matmul %279, %280, %cst_92 {dimension_numbers = #tpu.dot_dimension_numbers<[1], [1], [0], [0], [0, 0, 1, 0], [], []>} : vector<26x8xf32>, vector<26x8xf32>, vector<26x26xf32> -> vector<26x26xf32>
    %cst_93 = arith.constant 0.353553385 : f32
    %283 = vector.broadcast %cst_93 : f32 to vector<26x26xf32>
    %284 = arith.mulf %282, %283 : vector<26x26xf32>
    %285 = arith.addf %284, %3 : vector<26x26xf32>
    %cst_94 = arith.constant dense<0xFF800000> : vector<26xf32>
    %286 = vector.multi_reduction <maximumf>, %285, %cst_94 [1] : vector<26x26xf32> to vector<26xf32>
    %287 = vector.shape_cast %286 : vector<26xf32> to vector<26x1xf32>
    %288 = vector.broadcast %287 : vector<26x1xf32> to vector<26x26xf32>
    %289 = arith.subf %285, %288 : vector<26x26xf32>
    %290 = math.exp %289 : vector<26x26xf32>
    %cst_95 = arith.constant dense<0.000000e+00> : vector<26xf32>
    %291 = vector.multi_reduction <add>, %290, %cst_95 [1] : vector<26x26xf32> to vector<26xf32>
    %292 = vector.shape_cast %291 : vector<26xf32> to vector<26x1xf32>
    %293 = tpu.reciprocal %292 {approx = true} : vector<26x1xf32> -> vector<26x1xf32>
    %294 = vector.broadcast %293 : vector<26x1xf32> to vector<26x26xf32>
    %295 = arith.mulf %290, %294 : vector<26x26xf32>
    %cst_96 = arith.constant dense<0.000000e+00> : vector<26x8xf32>
    %296 = tpu.matmul %295, %281, %cst_96 {dimension_numbers = #tpu.dot_dimension_numbers<[1], [0], [0], [1], [0, 0, 1, 1], [], []>} : vector<26x26xf32>, vector<26x8xf32>, vector<26x8xf32> -> vector<26x8xf32>
    %297 = vector.extract_strided_slice %178 {offsets = [24, 0], sizes = [8, 32], strides = [1, 1]} : vector<96x32xf32> to vector<8x32xf32>
    %cst_97 = arith.constant dense<0.000000e+00> : vector<26x32xf32>
    %298 = tpu.matmul %296, %297, %cst_97 {dimension_numbers = #tpu.dot_dimension_numbers<[1], [0], [0], [1], [0, 0, 1, 1], [], []>} : vector<26x8xf32>, vector<8x32xf32>, vector<26x32xf32> -> vector<26x32xf32>
    %299 = arith.addf %278, %298 : vector<26x32xf32>
    %300 = arith.addf %172, %299 : vector<26x32xf32>
    %301 = vector.extract_strided_slice %174 {offsets = [7, 0], sizes = [1, 32], strides = [1, 1]} : vector<10x32xf32> to vector<1x32xf32>
    %302 = vector.broadcast %301 : vector<1x32xf32> to vector<26x32xf32>
    %303 = arith.addf %300, %302 : vector<26x32xf32>
    %304 = vector.extract_strided_slice %174 {offsets = [2, 0], sizes = [1, 32], strides = [1, 1]} : vector<10x32xf32> to vector<1x32xf32>
    %305 = vector.extract_strided_slice %174 {offsets = [3, 0], sizes = [1, 32], strides = [1, 1]} : vector<10x32xf32> to vector<1x32xf32>
    %cst_98 = arith.constant dense<0.000000e+00> : vector<26xf32>
    %306 = vector.multi_reduction <add>, %303, %cst_98 [1] : vector<26x32xf32> to vector<26xf32>
    %307 = vector.shape_cast %306 : vector<26xf32> to vector<26x1xf32>
    %cst_99 = arith.constant 3.200000e+01 : f32
    %308 = vector.broadcast %cst_99 : f32 to vector<26x1xf32>
    %309 = arith.divf %307, %308 : vector<26x1xf32>
    %310 = vector.broadcast %309 : vector<26x1xf32> to vector<26x32xf32>
    %311 = arith.subf %303, %310 : vector<26x32xf32>
    %312 = arith.mulf %311, %311 : vector<26x32xf32>
    %cst_100 = arith.constant dense<0.000000e+00> : vector<26xf32>
    %313 = vector.multi_reduction <add>, %312, %cst_100 [1] : vector<26x32xf32> to vector<26xf32>
    %314 = vector.shape_cast %313 : vector<26xf32> to vector<26x1xf32>
    %cst_101 = arith.constant 3.100000e+01 : f32
    %315 = vector.broadcast %cst_101 : f32 to vector<26x1xf32>
    %316 = arith.divf %314, %315 : vector<26x1xf32>
    %317 = math.sqrt %316 : vector<26x1xf32>
    %cst_102 = arith.constant 9.99999997E-7 : f32
    %318 = vector.broadcast %cst_102 : f32 to vector<26x1xf32>
    %319 = arith.addf %317, %318 : vector<26x1xf32>
    %320 = tpu.reciprocal %319 {approx = true} : vector<26x1xf32> -> vector<26x1xf32>
    %321 = vector.broadcast %304 : vector<1x32xf32> to vector<26x32xf32>
    %322 = arith.mulf %321, %311 : vector<26x32xf32>
    %323 = vector.broadcast %320 : vector<26x1xf32> to vector<26x32xf32>
    %324 = arith.mulf %322, %323 : vector<26x32xf32>
    %325 = vector.broadcast %305 : vector<1x32xf32> to vector<26x32xf32>
    %326 = arith.addf %324, %325 : vector<26x32xf32>
    %327 = vector.extract_strided_slice %178 {offsets = [32, 0], sizes = [32, 32], strides = [1, 1]} : vector<96x32xf32> to vector<32x32xf32>
    %cst_103 = arith.constant dense<0.000000e+00> : vector<26x32xf32>
    %328 = tpu.matmul %326, %327, %cst_103 {dimension_numbers = #tpu.dot_dimension_numbers<[1], [0], [0], [1], [0, 0, 1, 1], [], []>} : vector<26x32xf32>, vector<32x32xf32>, vector<26x32xf32> -> vector<26x32xf32>
    %329 = vector.extract_strided_slice %174 {offsets = [8, 0], sizes = [1, 32], strides = [1, 1]} : vector<10x32xf32> to vector<1x32xf32>
    %330 = vector.broadcast %329 : vector<1x32xf32> to vector<26x32xf32>
    %331 = arith.addf %328, %330 : vector<26x32xf32>
    %cst_104 = arith.constant 0.000000e+00 : f32
    %332 = vector.broadcast %cst_104 : f32 to vector<26x32xf32>
    %333 = arith.maximumf %331, %332 : vector<26x32xf32>
    %334 = vector.extract_strided_slice %178 {offsets = [64, 0], sizes = [32, 32], strides = [1, 1]} : vector<96x32xf32> to vector<32x32xf32>
    %cst_105 = arith.constant dense<0.000000e+00> : vector<26x32xf32>
    %335 = tpu.matmul %333, %334, %cst_105 {dimension_numbers = #tpu.dot_dimension_numbers<[1], [0], [0], [1], [0, 0, 1, 1], [], []>} : vector<26x32xf32>, vector<32x32xf32>, vector<26x32xf32> -> vector<26x32xf32>
    %336 = vector.extract_strided_slice %174 {offsets = [9, 0], sizes = [1, 32], strides = [1, 1]} : vector<10x32xf32> to vector<1x32xf32>
    %337 = vector.broadcast %336 : vector<1x32xf32> to vector<26x32xf32>
    %338 = arith.addf %335, %337 : vector<26x32xf32>
    %339 = arith.addf %303, %338 : vector<26x32xf32>
    %c0_106 = arith.constant 0 : index
    %c0_107 = arith.constant 0 : index
    %340 = vector.load %arg12[%c0_106, %c0_107] : memref<26x32xf32, #tpu.memory_space<vmem>>, vector<26x32xf32>
    tpu.vector_store %arg12[%c0_106, %c0_107], %171 {strides = array<i32>} : memref<26x32xf32, #tpu.memory_space<vmem>>, vector<26x32xf32>,
    %c0_108 = arith.constant 0 : index
    %c0_109 = arith.constant 0 : index
    %341 = vector.load %arg13[%c0_108, %c0_109] : memref<26x32xf32, #tpu.memory_space<vmem>>, vector<26x32xf32>
    tpu.vector_store %arg13[%c0_108, %c0_109], %339 {strides = array<i32>} : memref<26x32xf32, #tpu.memory_space<vmem>>, vector<26x32xf32>,
    %342 = vector.extract_strided_slice %171 {offsets = [0, 0], sizes = [4, 32], strides = [1, 1]} : vector<26x32xf32> to vector<4x32xf32>
    %343 = vector.extract_strided_slice %339 {offsets = [0, 0], sizes = [4, 32], strides = [1, 1]} : vector<26x32xf32> to vector<4x32xf32>
    %344 = arith.addf %342, %343 : vector<4x32xf32>
    %cst_110 = arith.constant 5.000000e-01 : f32
    %345 = vector.broadcast %cst_110 : f32 to vector<4x32xf32>
    %346 = arith.mulf %344, %345 : vector<4x32xf32>
    %c0_111 = arith.constant 0 : index
    %c0_112 = arith.constant 0 : index
    %347 = vector.load %arg12[%c0_111, %c0_112] : memref<26x32xf32, #tpu.memory_space<vmem>>, vector<4x32xf32>
    tpu.vector_store %arg12[%c0_111, %c0_112], %346 {strides = array<i32>} : memref<26x32xf32, #tpu.memory_space<vmem>>, vector<4x32xf32>,
    %c0_113 = arith.constant 0 : index
    %c0_114 = arith.constant 0 : index
    %348 = vector.load %arg13[%c0_113, %c0_114] : memref<26x32xf32, #tpu.memory_space<vmem>>, vector<4x32xf32>
    tpu.vector_store %arg13[%c0_113, %c0_114], %346 {strides = array<i32>} : memref<26x32xf32, #tpu.memory_space<vmem>>, vector<4x32xf32>,
    %349 = vector.extract_strided_slice %171 {offsets = [13, 0], sizes = [4, 32], strides = [1, 1]} : vector<26x32xf32> to vector<4x32xf32>
    %350 = vector.extract_strided_slice %339 {offsets = [13, 0], sizes = [4, 32], strides = [1, 1]} : vector<26x32xf32> to vector<4x32xf32>
    %351 = arith.addf %349, %350 : vector<4x32xf32>
    %cst_115 = arith.constant 5.000000e-01 : f32
    %352 = vector.broadcast %cst_115 : f32 to vector<4x32xf32>
    %353 = arith.mulf %351, %352 : vector<4x32xf32>
    %c13 = arith.constant 13 : index
    %c0_116 = arith.constant 0 : index
    %354 = vector.load %arg12[%c13, %c0_116] : memref<26x32xf32, #tpu.memory_space<vmem>>, vector<4x32xf32>
    tpu.vector_store %arg12[%c13, %c0_116], %353 {strides = array<i32>} : memref<26x32xf32, #tpu.memory_space<vmem>>, vector<4x32xf32>,
    %c13_117 = arith.constant 13 : index
    %c0_118 = arith.constant 0 : index
    %355 = vector.load %arg13[%c13_117, %c0_118] : memref<26x32xf32, #tpu.memory_space<vmem>>, vector<4x32xf32>
    tpu.vector_store %arg13[%c13_117, %c0_118], %353 {strides = array<i32>} : memref<26x32xf32, #tpu.memory_space<vmem>>, vector<4x32xf32>,
    %c1_i32 = arith.constant 1 : i32
    %356 = arith.cmpi eq, %arg0, %c1_i32 : i32
    %357 = arith.extui %356 : i1 to i32
    %c0_i32_119 = arith.constant 0 : i32
    %358 = arith.cmpi ne, %357, %c0_i32_119 : i32
    scf.if %358 {
      %c0_120 = arith.constant 0 : index
      %c0_121 = arith.constant 0 : index
      %c0_122 = arith.constant 0 : index
      %359 = vector.load %arg11[%c0_120, %c0_121, %c0_122] : memref<2x4x32xf32, #tpu.memory_space<vmem>>, vector<1x4x32xf32>
      %360 = vector.shape_cast %359 : vector<1x4x32xf32> to vector<4x32xf32>
      %361 = vector.shape_cast %346 : vector<4x32xf32> to vector<1x4x32xf32>
      tpu.vector_store %arg11[%c0_120, %c0_121, %c0_122], %361 {strides = array<i32>} : memref<2x4x32xf32, #tpu.memory_space<vmem>>, vector<1x4x32xf32>,
      %c1_123 = arith.constant 1 : index
      %c0_124 = arith.constant 0 : index
      %c0_125 = arith.constant 0 : index
      %362 = vector.load %arg11[%c1_123, %c0_124, %c0_125] : memref<2x4x32xf32, #tpu.memory_space<vmem>>, vector<1x4x32xf32>
      %363 = vector.shape_cast %362 : vector<1x4x32xf32> to vector<4x32xf32>
      %364 = vector.shape_cast %353 : vector<4x32xf32> to vector<1x4x32xf32>
      tpu.vector_store %arg11[%c1_123, %c0_124, %c0_125], %364 {strides = array<i32>} : memref<2x4x32xf32, #tpu.memory_space<vmem>>, vector<1x4x32xf32>,
      %365 = vector.extract_strided_slice %171 {offsets = [4, 0], sizes = [1, 32], strides = [1, 1]} : vector<26x32xf32> to vector<1x32xf32>
      %366 = vector.extract_strided_slice %171 {offsets = [17, 0], sizes = [1, 32], strides = [1, 1]} : vector<26x32xf32> to vector<1x32xf32>
      %367 = tpu.concatenate %365, %366 in 0 : vector<1x32xf32>, vector<1x32xf32> -> vector<2x32xf32>
      %368 = vector.extract_strided_slice %339 {offsets = [4, 0], sizes = [1, 32], strides = [1, 1]} : vector<26x32xf32> to vector<1x32xf32>
      %369 = vector.extract_strided_slice %339 {offsets = [17, 0], sizes = [1, 32], strides = [1, 1]} : vector<26x32xf32> to vector<1x32xf32>
      %370 = tpu.concatenate %368, %369 in 0 : vector<1x32xf32>, vector<1x32xf32> -> vector<2x32xf32>
      %c0_126 = arith.constant 0 : index
      %c0_127 = arith.constant 0 : index
      %371 = vector.load %arg7[%c0_126, %c0_127] : memref<4x32xf32, #tpu.memory_space<vmem>>, vector<1x32xf32>
      %c1_128 = arith.constant 1 : index
      %c0_129 = arith.constant 0 : index
      %372 = vector.load %arg7[%c1_128, %c0_129] : memref<4x32xf32, #tpu.memory_space<vmem>>, vector<1x32xf32>
      %cst_130 = arith.constant dense<0.000000e+00> : vector<2xf32>
      %373 = vector.multi_reduction <add>, %367, %cst_130 [1] : vector<2x32xf32> to vector<2xf32>
      %374 = vector.shape_cast %373 : vector<2xf32> to vector<2x1xf32>
      %cst_131 = arith.constant 3.200000e+01 : f32
      %375 = vector.broadcast %cst_131 : f32 to vector<2x1xf32>
      %376 = arith.divf %374, %375 : vector<2x1xf32>
      %377 = vector.broadcast %376 : vector<2x1xf32> to vector<2x32xf32>
      %378 = arith.subf %367, %377 : vector<2x32xf32>
      %379 = arith.mulf %378, %378 : vector<2x32xf32>
      %cst_132 = arith.constant dense<0.000000e+00> : vector<2xf32>
      %380 = vector.multi_reduction <add>, %379, %cst_132 [1] : vector<2x32xf32> to vector<2xf32>
      %381 = vector.shape_cast %380 : vector<2xf32> to vector<2x1xf32>
      %cst_133 = arith.constant 3.100000e+01 : f32
      %382 = vector.broadcast %cst_133 : f32 to vector<2x1xf32>
      %383 = arith.divf %381, %382 : vector<2x1xf32>
      %384 = math.sqrt %383 : vector<2x1xf32>
      %cst_134 = arith.constant 9.99999997E-7 : f32
      %385 = vector.broadcast %cst_134 : f32 to vector<2x1xf32>
      %386 = arith.addf %384, %385 : vector<2x1xf32>
      %387 = tpu.reciprocal %386 {approx = true} : vector<2x1xf32> -> vector<2x1xf32>
      %388 = vector.broadcast %371 : vector<1x32xf32> to vector<2x32xf32>
      %389 = arith.mulf %388, %378 : vector<2x32xf32>
      %390 = vector.broadcast %387 : vector<2x1xf32> to vector<2x32xf32>
      %391 = arith.mulf %389, %390 : vector<2x32xf32>
      %392 = vector.broadcast %372 : vector<1x32xf32> to vector<2x32xf32>
      %393 = arith.addf %391, %392 : vector<2x32xf32>
      %c2 = arith.constant 2 : index
      %c0_135 = arith.constant 0 : index
      %394 = vector.load %arg7[%c2, %c0_135] : memref<4x32xf32, #tpu.memory_space<vmem>>, vector<1x32xf32>
      %c3 = arith.constant 3 : index
      %c0_136 = arith.constant 0 : index
      %395 = vector.load %arg7[%c3, %c0_136] : memref<4x32xf32, #tpu.memory_space<vmem>>, vector<1x32xf32>
      %cst_137 = arith.constant dense<0.000000e+00> : vector<2xf32>
      %396 = vector.multi_reduction <add>, %370, %cst_137 [1] : vector<2x32xf32> to vector<2xf32>
      %397 = vector.shape_cast %396 : vector<2xf32> to vector<2x1xf32>
      %cst_138 = arith.constant 3.200000e+01 : f32
      %398 = vector.broadcast %cst_138 : f32 to vector<2x1xf32>
      %399 = arith.divf %397, %398 : vector<2x1xf32>
      %400 = vector.broadcast %399 : vector<2x1xf32> to vector<2x32xf32>
      %401 = arith.subf %370, %400 : vector<2x32xf32>
      %402 = arith.mulf %401, %401 : vector<2x32xf32>
      %cst_139 = arith.constant dense<0.000000e+00> : vector<2xf32>
      %403 = vector.multi_reduction <add>, %402, %cst_139 [1] : vector<2x32xf32> to vector<2xf32>
      %404 = vector.shape_cast %403 : vector<2xf32> to vector<2x1xf32>
      %cst_140 = arith.constant 3.100000e+01 : f32
      %405 = vector.broadcast %cst_140 : f32 to vector<2x1xf32>
      %406 = arith.divf %404, %405 : vector<2x1xf32>
      %407 = math.sqrt %406 : vector<2x1xf32>
      %cst_141 = arith.constant 9.99999997E-7 : f32
      %408 = vector.broadcast %cst_141 : f32 to vector<2x1xf32>
      %409 = arith.addf %407, %408 : vector<2x1xf32>
      %410 = tpu.reciprocal %409 {approx = true} : vector<2x1xf32> -> vector<2x1xf32>
      %411 = vector.broadcast %394 : vector<1x32xf32> to vector<2x32xf32>
      %412 = arith.mulf %411, %401 : vector<2x32xf32>
      %413 = vector.broadcast %410 : vector<2x1xf32> to vector<2x32xf32>
      %414 = arith.mulf %412, %413 : vector<2x32xf32>
      %415 = vector.broadcast %395 : vector<1x32xf32> to vector<2x32xf32>
      %416 = arith.addf %414, %415 : vector<2x32xf32>
      %417 = arith.addf %393, %416 : vector<2x32xf32>
      %cst_142 = arith.constant 5.000000e-01 : f32
      %418 = vector.broadcast %cst_142 : f32 to vector<2x32xf32>
      %419 = arith.mulf %417, %418 : vector<2x32xf32>
      %c0_143 = arith.constant 0 : index
      %c0_144 = arith.constant 0 : index
      %420 = vector.load %arg8[%c0_143, %c0_144] : memref<32x2xf32, #tpu.memory_space<vmem>>, vector<32x2xf32>
      %cst_145 = arith.constant dense<0.000000e+00> : vector<2x2xf32>
      %421 = tpu.matmul %419, %420, %cst_145 {dimension_numbers = #tpu.dot_dimension_numbers<[1], [0], [0], [1], [0, 0, 1, 1], [], []>} : vector<2x32xf32>, vector<32x2xf32>, vector<2x2xf32> -> vector<2x2xf32>
      %c0_146 = arith.constant 0 : index
      %c0_147 = arith.constant 0 : index
      %422 = vector.load %arg9[%c0_146, %c0_147] : memref<1x2xf32, #tpu.memory_space<vmem>>, vector<1x2xf32>
      %423 = vector.broadcast %422 : vector<1x2xf32> to vector<2x2xf32>
      %424 = arith.addf %421, %423 : vector<2x2xf32>
      %c0_148 = arith.constant 0 : index
      %c0_149 = arith.constant 0 : index
      %425 = vector.load %arg10[%c0_148, %c0_149] : memref<2x2xf32, #tpu.memory_space<vmem>>, vector<2x2xf32>
      tpu.vector_store %arg10[%c0_148, %c0_149], %424 {strides = array<i32>} : memref<2x2xf32, #tpu.memory_space<vmem>>, vector<2x2xf32>,
    } else {
    }
    return
  }
  func.func @transform_0(%arg0: i32) -> (i32, i32, i32) {
    %c0_i32 = arith.constant 0 : i32
    %c0_i32_0 = arith.constant 0 : i32
    %c0_i32_1 = arith.constant 0 : i32
    %c0_i32_2 = arith.constant 0 : i32
    return %c0_i32, %c0_i32_0, %c0_i32_1 : i32, i32, i32
  }
  func.func @transform_1(%arg0: i32) -> (i32, i32, i32) {
    %c0_i32 = arith.constant 0 : i32
    %c0_i32_0 = arith.constant 0 : i32
    %c0_i32_1 = arith.constant 0 : i32
    %c0_i32_2 = arith.constant 0 : i32
    return %c0_i32, %c0_i32_0, %c0_i32_1 : i32, i32, i32
  }
  func.func @transform_2(%arg0: i32) -> (i32, i32) {
    %c0_i32 = arith.constant 0 : i32
    %c0_i32_0 = arith.constant 0 : i32
    %c0_i32_1 = arith.constant 0 : i32
    return %c0_i32, %c0_i32_0 : i32, i32
  }
  func.func @transform_3(%arg0: i32) -> (i32, i32, i32, i32) {
    %c0_i32 = arith.constant 0 : i32
    %c0_i32_0 = arith.constant 0 : i32
    %c0_i32_1 = arith.constant 0 : i32
    %c0_i32_2 = arith.constant 0 : i32
    return %c0_i32, %arg0, %c0_i32_0, %c0_i32_1 : i32, i32, i32, i32
  }
  func.func @transform_4(%arg0: i32) -> (i32, i32, i32, i32) {
    %c0_i32 = arith.constant 0 : i32
    %c0_i32_0 = arith.constant 0 : i32
    %c0_i32_1 = arith.constant 0 : i32
    %c0_i32_2 = arith.constant 0 : i32
    return %c0_i32, %arg0, %c0_i32_0, %c0_i32_1 : i32, i32, i32, i32
  }
  func.func @transform_5(%arg0: i32) -> (i32, i32, i32, i32) {
    %c0_i32 = arith.constant 0 : i32
    %c0_i32_0 = arith.constant 0 : i32
    %c0_i32_1 = arith.constant 0 : i32
    %c0_i32_2 = arith.constant 0 : i32
    return %c0_i32, %arg0, %c0_i32_0, %c0_i32_1 : i32, i32, i32, i32
  }
  func.func @transform_6(%arg0: i32) -> (i32, i32) {
    %c0_i32 = arith.constant 0 : i32
    %c0_i32_0 = arith.constant 0 : i32
    %c0_i32_1 = arith.constant 0 : i32
    return %c0_i32, %c0_i32_0 : i32, i32
  }
  func.func @transform_7(%arg0: i32) -> (i32, i32) {
    %c0_i32 = arith.constant 0 : i32
    %c0_i32_0 = arith.constant 0 : i32
    %c0_i32_1 = arith.constant 0 : i32
    return %c0_i32, %c0_i32_0 : i32, i32
  }
  func.func @transform_8(%arg0: i32) -> (i32, i32) {
    %c0_i32 = arith.constant 0 : i32
    %c0_i32_0 = arith.constant 0 : i32
    %c0_i32_1 = arith.constant 0 : i32
    return %c0_i32, %c0_i32_0 : i32, i32
  }
  func.func @transform_9(%arg0: i32) -> (i32, i32) {
    %c0_i32 = arith.constant 0 : i32
    %c0_i32_0 = arith.constant 0 : i32
    %c0_i32_1 = arith.constant 0 : i32
    return %c0_i32, %c0_i32_0 : i32, i32
  }
  func.func @transform_10(%arg0: i32) -> (i32, i32, i32) {
    %c0_i32 = arith.constant 0 : i32
    %c0_i32_0 = arith.constant 0 : i32
    %c0_i32_1 = arith.constant 0 : i32
    %c0_i32_2 = arith.constant 0 : i32
    return %c0_i32, %c0_i32_0, %c0_i32_1 : i32, i32, i32
  }
}

</mosaic_0001>

<bundles_post_ra>
// kernel: mbt_forward.2
= control target key start
LH: loop header
LB: loop body
LE: loop exit
PB: predicated region body
PF: predicated region fallthrough
CT: control target
= control target key end

     0   :  { %s2024_s24 = smov 0   ;;  %s2026_s25 = smov 0   ;;  %s2434_s0 = inlined_call_operand.vmem [shape: f32[2,16,20], index: 0, kind: input, shape index: {}]   ;;  %s2435_s1 = inlined_call_operand.vmem [shape: f32[2,20,32], index: 1, kind: input, shape index: {}]   ;;  %s2436_s2 = inlined_call_operand.vmem [shape: f32[2,2,32], index: 2, kind: input, shape index: {}]   ;;  %s2437_s3 = inlined_call_operand.vmem [shape: f32[18,18], index: 3, kind: input, shape index: {}]   ;;  %s2438_s4 = inlined_call_operand.vmem [shape: f32[2,2,10,32], index: 4, kind: input, shape index: {}]   ;;  %s2439_s5 = inlined_call_operand.vmem [shape: f32[2,2,32,96], index: 5, kind: input, shape index: {}]   ;;  %s2440_s6 = inlined_call_operand.vmem [shape: f32[2,2,96,32], index: 6, kind: input, shape index: {}]   ;;  %s2441_s7 = inlined_call_operand.vmem [shape: f32[2,18,32], index: 7, kind: output, shape index: {}]  }
   0x1   :  { %2444 = sst [smem:[#allocation7_spill]] %s2434_s0  ;;  %s2028_s26 = smov 0  }
   0x2   :  { %2445 = sst [smem:[#allocation8_spill]] %s2435_s1  ;;  %s2030_s27 = smov 0  }
   0x3   :  { %2446 = sst [smem:[#allocation9_spill]] %s2436_s2  ;;  %s2032_s28 = smov 0  }
   0x4 LB: > { %2447 = sst [smem:[#allocation3_spill]] %s1960_s26  ;;  %s26_s29 = sadd.s32 1, %s1960_s26  ;;  %s1968_s28 = sphi %s2032_s28, %s17_s28   ;;  %s1964_s27 = sphi %s2030_s27, %s2457_s27   ;;  %s1960_s26 = sphi %s2028_s26, %s2456_s26   ;;  %s1956_s25 = sphi %s2026_s25, %s2455_s25   ;;  %s1952_s24 = sphi %s2024_s24, %s2454_s24  }
   0x5   : > { %2448 = sst [smem:[#allocation4_spill]] %s1964_s27  ;;  %s29_s30 = sadd.s32 1, %s1964_s27 }
   0x6   : > { %p27_p0 = scmp.ge.s32.totalorder %s26_s29, 2  ;;  %p1685_p1 = scmp.ge.s32.totalorder %s1968_s28, 1 }
   0x7   : > { %p316_p2 = scmp.lt.s32.totalorder %s1968_s28, 5 }
   0x8   : > { %s2459_s29 = smov (%p27_p0, %s26_s29), 0  ;;  %s2461_s30 = smov (!%p27_p0, %s29_s30), %s1964_s27 }
   0x9   : > { %2449 = sst [smem:[#allocation5_spill]] %s2459_s29  ;;  %p317_p3 = pnand %p1685_p1, %p316_p2 }
   0xa   : > { %p31_p4 = scmp.ge.s32.totalorder %s2461_s30, 2  ;;  %p384_p5 = scmp.lt.s32.totalorder (!%p317_p3), %s1956_s25, 1 }
   0xb   : > { %320 = sbr.rel (%p317_p3) target bundleno = 2553 (0x9f9), region = 48  ;;  %p400_p6 = scmp.lt.s32.totalorder (!%p317_p3), %s1952_s24, 1 }
   0xc   : > { %s2463_s30 = smov (%p31_p4, %s2461_s30), 0  ;;  %s2451_s0 = sld [smem:[#allocation7_spill]] (!%p317_p3) }
   0xd   : > { %2450 = sst [smem:[#allocation6_spill]] %s2463_s30  ;;  %p1698_p7 = scmp.ne.s32.totalorder (!%p317_p3), %s1952_s24, 0 }
   0xe   : > { %s2452_s1 = sld [smem:[#allocation8_spill]] (!%p317_p3) }
   0xf   : > { %s2453_s2 = sld [smem:[#allocation9_spill]] (!%p317_p3) }
  0x10   : > { %s2465_s25 = smov (!%p384_p5, %s1956_s25), 1 }
  0x11   : > { %s401_s8 = scalar_select %p400_p6, %s1952_s24, 1 }
  0x12   : > { %s1766_s9 = sshll.u32 %s2465_s25, 4  ;;  %s1773_s10 = smul.u32 24, %s2465_s25 }
  0x13   : > { %s2061_s13 = scalar_lea.vmem %s2451_s0, %s1766_s9  ;;  %s1689_s14 = sshll.u32 %s2465_s25, 1 }
  0x14   : > { %s393_s17 = scalar_lea.vmem %s2452_s1, %s1773_s10  ;;  %s1690_s21 = sshll.u32 %s401_s8, 1 }
  0x15   : > { %s2069_s20 = scalar_lea.vmem %s2453_s2, %s1689_s14  ;;  %s1691_s22 = sshll.u32 %s2465_s25, 2 }
  0x16   : > { %s404_s23 = sadd.s32 %s1691_s22, %s1690_s21  ;;  %s1693_s30 = sshll.u32 %s401_s8, 2 }
  0x17   : > { %s1692_s29 = sshll.u32 %s404_s23, 3  ;;  %s1694_s27 = sshll.u32 %s2465_s25, 3 }
  0x18   : > { %s2074_s9 = scalar_lea.vmem %s2438_s4, %s1692_s29  ;;  %s413_s12 = sadd.s32 %s1694_s27, %s1693_s30 }
  0x19   : > { %s1695_s0 = sshll.u32 %s413_s12, 3  ;;  %s1774_s15 = smul.u32 12, %s401_s8 }
  0x1a   : > { %s2079_s18 = scalar_lea.vmem %s2439_s5, %s1695_s0  ;;  %s2084_s21 = scalar_lea.vmem %s2441_s7, %s1773_s10 }
  0x1b   : > { %s422_s22 = sadd.s32 %s1774_s15, %s1773_s10  ;;  %433 = sbr.rel (%p1698_p7) target bundleno = 168 (0xa8), region = 52 }
  0x1c   : > { %s1696_s25 = sshll.u32 %s422_s22, 3 }
  0x1d   : > { %s2089_s26 = scalar_lea.vmem %s2440_s6, %s1696_s25 }
  0x20   : > { %v438_v0 = vld [vmem:[%s393_s17 + $0x10] sm:$0xf]  ;;  %vm448_vm0 = vcmask 1043456   ;;  %v437_v1 = vld [vmem:[%s393_s17 + $0x8] sm:$0xff]  ;;  %v436_v2 = vld [vmem:[%s393_s17] sm:$0xff]  ;;  %vm441_vm1 = vcmask 162816  }
  0x21   : > { %1699 = vmatpush.msk.msra.mxu0 %vm448_vm0, %v438_v0  ;;  %1767 = vmatpush.msk.msra.mxu1 %vm448_vm0, %v438_v0  ;;  %v434_v3 = vld [vmem:[%s2061_s13] sm:$0xff]  ;;  %v435_v4 = vld [vmem:[%s2061_s13 + $0x8] sm:$0xff]  ;;  %vm476_vm2 = vcmask 253952   ;;  %vm478_vm3 = vcmask 261120  }
  0x22   : > { %v475_v5 = vld [vmem:[%s2069_s20 + $0x1] sm:$0x1]  ;;  %v1829_v7 = vld [vmem:[%s2069_s20] ss:$0 sm:$0xff] }
  0x23   : > { %466 = vmatpush.msra.mxu0 %v437_v1  ;;  %1768 = vmatpush.msra.mxu1 %v437_v1  ;;  %v480_v6 = vld [vmem:[%s2069_s20 + $0x1] sm:$0x1]  ;;  %477 = vst.msk [vmem:[#allocation2] sm:$0x1] %vm476_vm2, %v475_v5 }
  0x24   : > { %481 = vst.msk [vmem:[#allocation2 + $0x9] sm:$0x1] %vm476_vm2, %v480_v6 }
  0x25   : > { %467 = vmatpush.msra.mxu0 %v436_v2  ;;  %1769 = vmatpush.msra.mxu1 %v436_v2 }
  0x26   : > { %1700 = vmatmul.msk.f32.vlgmr.msra.gmra.mxu0 %vm441_vm1, %v434_v3  ;;  %1701 = vmatmul.msk.f32.vlgmr.msra.gmra.mxu1 %vm441_vm1, %v435_v4 }
  0xa3   : > { %v469_v8 = vpop.f32.mrf.mxu0  ;;  %v472_v9 = vpop.f32.mrf.mxu1 }
  0xa4   : > { %v470_v10 = vadd.f32 %v1829_v7, %v469_v8  ;;  %v473_v11 = vadd.f32 %v1829_v7, %v472_v9 }
  0xa6   : > { %479 = vst.msk [vmem:[#allocation2 + $0x1] sm:$0xff] %vm478_vm3, %v470_v10 }
  0xa7   : > { %482 = vst.msk [vmem:[#allocation2 + $0xa] sm:$0xff] %vm478_vm3, %v473_v11 }
  0xa8 PF: > { %vm507_vm4 = vcmask 261120   ;;  %vm514_vm5 = vcmask 254976   ;;  %v1970_v18 = vmov 32.0   ;;  %v1971_v40 = vmov 31.0   ;;  %v494_v46 = vld [vmem:[%s2079_s18 + $0x18] sm:$0xff]  ;;  %v493_v47 = vld [vmem:[%s2079_s18 + $0x10] sm:$0xff] }
  0xa9   : > { %1850 = vrcp.f32 %v1970_v18  ;;  %627 = vmatpush.msra.mxu0 %v494_v46  ;;  %v492_v48 = vld [vmem:[%s2079_s18 + $0x8] sm:$0xff]  ;;  %v491_v50 = vld [vmem:[%s2079_s18] sm:$0xff]  ;;  %s1972_s0 = smov 32   ;;  %s1973_s1 = smov 96   ;;  %vm670_vm14 = vcmask 64512   ;;  %vm718_vm15 = vcmask 146432  }
  0xaa   : > { %1852 = vrcp.f32 %v1971_v40  ;;  %v2129_v57 = vld [vmem:[%s2074_s9] sm:$0xff]  ;;  %s1974_s2 = smov 64   ;;  %vm725_vm0 = vcmask 140288   ;;  %s1975_s17 = smov 88   ;;  %vm773_vm1 = vcmask 1041408  }
  0xab   : > { %628 = vmatpush.msra.mxu0 %v493_v47  ;;  %v645_v59 = vperm.slane %v2129_v57, 5  ;;  %s1976_s20 = smov 120   ;;  %s1977_s11 = smov 80  }
  0xac   : > { %s1978_s12 = smov 72   ;;  %s1979_s15 = smov 112  }
  0xad   : > { %v483_v12 = vld [vmem:[#allocation2] sm:$0xff]  ;;  %629 = vmatpush.msra.mxu0 %v492_v48  ;;  %s1980_s16 = smov 104   ;;  %s1981_s18 = smov 56  }
  0xae   : > { %v485_v13 = vld [vmem:[#allocation2 + $0x10] sm:$0x3]  ;;  %v508_v14 = vsel %vm507_vm4, %v483_v12, 0.0  ;;  %v484_v16 = vld [vmem:[#allocation2 + $0x8] sm:$0xff]  ;;  %s1982_s14 = smov 40   ;;  %s1983_s19 = smov 48  }
  0xaf   : > { %v515_v15 = vsel %vm514_vm5, %v485_v13, 0.0  ;;  %509 = vadd.xlane.f32.xlu0 %v508_v14  ;;  %v511_v17 = vsel %vm507_vm4, %v484_v16, 0.0  ;;  %v1851_v19 = vpop.eup %1850  ;;  %630 = vmatpush.msra.mxu0 %v491_v50  ;;  %v595_v14 = vperm.slane %v2129_v57, 0  ;;  %p1763_p8 = scmp.ne.s32.totalorder %s1952_s24, 1 }
  0xb0   : > { %516 = vadd.xlane.f32.xlu1 %v515_v15  ;;  %v519_v20 = vmul.f32 32.0, %v1851_v19  ;;  %vm523_vm6 = vweird.f32 %v1851_v19  ;;  %v1853_v41 = vpop.eup %1852 }
  0xb1   : > { %v544_v42 = vmul.f32 31.0, %v1853_v41  ;;  %vm548_vm7 = vweird.f32 %v1853_v41 }
  0xb2   : > { %v520_v21 = vsub.f32 1.0, %v519_v20 }
  0xb3   : > { %v545_v43 = vsub.f32 1.0, %v544_v42 }
  0xb4   : > { %v521_v22 = vmul.f32 %v1851_v19, %v520_v21  ;;  %v602_v21 = vperm.slane %v2129_v57, 1 }
  0xb5   : > { %v546_v44 = vmul.f32 %v1853_v41, %v545_v43 }
  0xb6   : > { %v522_v23 = vadd.f32 %v1851_v19, %v521_v22 }
  0xb7   : > { %512 = vadd.xlane.f32.xlu0 %v511_v17  ;;  %v547_v45 = vadd.f32 %v1853_v41, %v546_v44 }
  0xb8   : > { %v2100_v24 = vsel %vm523_vm6, %v1851_v19, %v522_v23 }
  0xb9   : > { %v2123_v49 = vsel %vm548_vm7, %v1853_v41, %v547_v45 }
  0xcb   : > { %647 = vrot.lane.b32.xlu0 %v645_v59, %s1972_s0 }
 0x122   : > { %v510_v25 = vpop.xlane.xlu0 %509 }
 0x123   : > { %v525_v26 = vmul.f32 %v2100_v24, %v510_v25  ;;  %v517_v29 = vpop.xlane.xlu1 %516 }
 0x124   : > { %v527_v33 = vmul.f32 %v2100_v24, %v517_v29 }
 0x125   : > { %v2103_v27 = vsub.f32 %v483_v12, %v525_v26 }
 0x126   : > { %v2112_v35 = vsub.f32 %v485_v13, %v527_v33 }
 0x127   : > { %v531_v28 = vmul.f32 %v2103_v27, %v2103_v27  ;;  %v596_v20 = vmul.f32 %v595_v14, %v2103_v27 }
 0x128   : > { %v533_v38 = vmul.f32 %v2112_v35, %v2112_v35  ;;  %v598_v41 = vmul.f32 %v595_v14, %v2112_v35 }
 0x129   : > { %v534_v30 = vsel %vm507_vm4, %v531_v28, 0.0 }
 0x12a   : > { %535 = vadd.xlane.f32.xlu1 %v534_v30  ;;  %v513_v31 = vpop.xlane.xlu0 %512  ;;  %v540_v39 = vsel %vm514_vm5, %v533_v38, 0.0 }
 0x12b   : > { %v526_v32 = vmul.f32 %v2100_v24, %v513_v31 }
 0x12d   : > { %v2110_v34 = vsub.f32 %v484_v16, %v526_v32 }
 0x12f   : > { %v532_v36 = vmul.f32 %v2110_v34, %v2110_v34 }
 0x131   : > { %v537_v37 = vsel %vm507_vm4, %v532_v36, 0.0  ;;  %v597_v36 = vmul.f32 %v595_v14, %v2110_v34  ;;  %v653_v34 = vperm.slane %v2129_v57, 6 }
 0x132   : > { %538 = vadd.xlane.f32.xlu2 %v537_v37 }
 0x13a   : > { %541 = vadd.xlane.f32.xlu2 %v540_v39 }
 0x13d   : > { %v648_v45 = vpop.permute.xlu0 %647 }
 0x19d   : > { %v536_v51 = vpop.xlane.xlu1 %535 }
 0x19e   : > { %v550_v52 = vmul.f32 %v2123_v49, %v536_v51 }
 0x1a0   : > { %1854 = vrsqrt.f32 %v550_v52  ;;  %vm560_vm8 = vcmp.eq.f32.partialorder %v550_v52, inf  ;;  %v563_v5 = vand.u32 2147483648, %v550_v52  ;;  %vm562_vm9 = vcmp.eq.f32.partialorder %v550_v52, 0.0 }
 0x1a5   : > { %v539_v53 = vpop.xlane.xlu2 %538 }
 0x1a6   : > { %v1855_v54 = vpop.eup %1854  ;;  %v551_v55 = vmul.f32 %v2123_v49, %v539_v53 }
 0x1a7   : > { %v554_v56 = vmul.f32 %v1855_v54, %v550_v52 }
 0x1a8   : > { %1856 = vrsqrt.f32 %v551_v55  ;;  %vm572_vm10 = vcmp.eq.f32.partialorder %v551_v55, inf  ;;  %v575_v17 = vand.u32 2147483648, %v551_v55  ;;  %vm574_vm11 = vcmp.eq.f32.partialorder %v551_v55, 0.0 }
 0x1a9   : > { %v555_v58 = vmul.f32 %v1855_v54, %v554_v56 }
 0x1ab   : > { %v556_v60 = vmul.f32 0.5, %v555_v58 }
 0x1ad   : > { %v542_v61 = vpop.xlane.xlu2 %541  ;;  %v557_v62 = vsub.f32 1.5, %v556_v60  ;;  %v641_v60 = vperm.slane %v2129_v57, 4 }
 0x1ae   : > { %v1857_v63 = vpop.eup %1856  ;;  %v552_v0 = vmul.f32 %v2123_v49, %v542_v61 }
 0x1af   : > { %v566_v1 = vmul.f32 %v1857_v63, %v551_v55  ;;  %v558_v2 = vmul.f32 %v1855_v54, %v557_v62 }
 0x1b0   : > { %1858 = vrsqrt.f32 %v552_v0  ;;  %vm584_vm12 = vcmp.eq.f32.partialorder %v552_v0, inf  ;;  %v587_v32 = vand.u32 2147483648, %v552_v0  ;;  %vm586_vm13 = vcmp.eq.f32.partialorder %v552_v0, 0.0 }
 0x1b1   : > { %v559_v3 = vmul.f32 %v558_v2, %v550_v52  ;;  %v567_v4 = vmul.f32 %v1857_v63, %v566_v1  ;;  %v2176_v1 = vld [vmem:[%s2437_s3] sm:$0xff] }
 0x1b3   : > { %v561_v6 = vsel %vm560_vm8, %v550_v52, %v559_v3  ;;  %v568_v7 = vmul.f32 0.5, %v567_v4 }
 0x1b4   : > { %v564_v8 = vsel %vm562_vm9, %v563_v5, %v561_v6  ;;  %v2183_v6 = vld [vmem:[%s2437_s3 + $0x8] sm:$0xff] }
 0x1b5   : > { %v589_v9 = vadd.f32 1e-06, %v564_v8  ;;  %v569_v10 = vsub.f32 1.5, %v568_v7 }
 0x1b6   : > { %v1859_v11 = vpop.eup %1858 }
 0x1b7   : > { %v578_v12 = vmul.f32 %v1859_v11, %v552_v0  ;;  %1860 = vrcp.f32 %v589_v9  ;;  %v570_v13 = vmul.f32 %v1857_v63, %v569_v10 }
 0x1b9   : > { %v571_v15 = vmul.f32 %v570_v13, %v551_v55  ;;  %v579_v16 = vmul.f32 %v1859_v11, %v578_v12 }
 0x1bb   : > { %v573_v18 = vsel %vm572_vm10, %v551_v55, %v571_v15  ;;  %v580_v19 = vmul.f32 0.5, %v579_v16 }
 0x1bc   : > { %v576_v22 = vsel %vm574_vm11, %v575_v17, %v573_v18 }
 0x1bd   : > { %v1861_v23 = vpop.eup %1860  ;;  %v590_v25 = vadd.f32 1e-06, %v576_v22  ;;  %v581_v26 = vsub.f32 1.5, %v580_v19 }
 0x1be   : > { %v599_v28 = vmul.f32 %v1861_v23, %v596_v20 }
 0x1bf   : > { %1862 = vrcp.f32 %v590_v25  ;;  %v582_v29 = vmul.f32 %v1859_v11, %v581_v26  ;;  %v2190_v11 = vld [vmem:[%s2437_s3 + $0x10] sm:$0x3] }
 0x1c0   : > { %v603_v30 = vadd.f32 %v602_v21, %v599_v28 }
 0x1c1   : > { %v583_v31 = vmul.f32 %v582_v29, %v552_v0 }
 0x1c2   : > { %1702 = vmatmul.msk.f32.vlgmr.msra.gmra.mxu0 %vm507_vm4, %v603_v30 }
 0x1c3   : > { %v585_v33 = vsel %vm584_vm12, %v552_v0, %v583_v31 }
 0x1c4   : > { %v588_v27 = vsel %vm586_vm13, %v587_v32, %v585_v33 }
 0x1c5   : > { %v1863_v37 = vpop.eup %1862  ;;  %v591_v38 = vadd.f32 1e-06, %v588_v27  ;;  %v495_v27 = vld [vmem:[%s2089_s26] sm:$0xff] }
 0x1c6   : > { %v600_v39 = vmul.f32 %v1863_v37, %v597_v36 }
 0x1c7   : > { %1864 = vrcp.f32 %v591_v38 }
 0x1c8   : > { %v604_v40 = vadd.f32 %v602_v21, %v600_v39 }
 0x1ca   : > { %1703 = vmatmul.msk.f32.gmra.mxu0 %vm507_vm4, %v604_v40 }
 0x1cd   : > { %v1865_v42 = vpop.eup %1864 }
 0x1ce   : > { %v601_v43 = vmul.f32 %v1865_v42, %v598_v41 }
 0x1d0   : > { %v605_v44 = vadd.f32 %v602_v21, %v601_v43 }
 0x1d2   : > { %1704 = vmatmul.msk.f32.gmra.mxu0 %vm507_vm4, %v605_v44 }
 0x23f   : > { %v632_v46 = vpop.f32.mrf.mxu0 }
 0x240   : > { %v2141_v47 = vadd.f32 %v648_v45, %v632_v46  ;;  %v2161_v61 = vadd.f32 %v641_v60, %v632_v46 }
 0x242   : > { %664 = vrot.lane.b32.xlu0 %v2141_v47, %s1973_s1 }
 0x247   : > { %v635_v48 = vpop.f32.mrf.mxu0 }
 0x248   : > { %v2145_v50 = vadd.f32 %v648_v45, %v635_v48  ;;  %v2163_v62 = vadd.f32 %v641_v60, %v635_v48 }
 0x24a   : > { %666 = vrot.lane.b32.xlu2 %v2145_v50, %s1973_s1  ;;  %655 = vrot.lane.b32.xlu0 %v653_v34, %s1974_s2 }
 0x24f   : > { %v638_v35 = vpop.f32.mrf.mxu0 }
 0x250   : > { %v2149_v51 = vadd.f32 %v648_v45, %v638_v35  ;;  %v2169_v63 = vadd.f32 %v641_v60, %v638_v35 }
 0x252   : > { %668 = vrot.lane.b32.xlu1 %v2149_v51, %s1973_s1 }
 0x2a4   : > { %v667_v59 = vpop.permute.xlu2 %666 }
 0x2b4   : > { %v665_v52 = vpop.permute.xlu0 %664 }
 0x2bc   : > { %v656_v53 = vpop.permute.xlu0 %655 }
 0x2bd   : > { %v658_v54 = vadd.f32 %v656_v53, %v632_v46  ;;  %v659_v55 = vadd.f32 %v656_v53, %v635_v48  ;;  %v2194_v15 = vadd.f32 %v656_v53, %v638_v35 }
 0x2bf   : > { %v2152_v56 = vpack.i.bf16 %v658_v54, %v659_v55 }
 0x2c4   : > { %v669_v58 = vpop.permute.xlu1 %668 }
 0x2c5   : > { %1705 = vmatpush.xpose.msk.msra.mxu1 %vm670_vm14, %v669_v58  ;;  %1770 = vmatpush.xpose.msk.msra.mxu3 %vm670_vm14, %v669_v58 }
 0x2c9   : > { %1706 = vmatpush.xpose.msk.msra.mxu1 %vm670_vm14, %v667_v59  ;;  %1771 = vmatpush.xpose.msk.msra.mxu3 %vm670_vm14, %v667_v59 }
 0x2cd   : > { %1707 = vmatpush.xpose.msk.msra.mxu1 %vm670_vm14, %v665_v52  ;;  %1772 = vmatpush.xpose.msk.msra.mxu3 %vm670_vm14, %v665_v52 }
 0x2d0   : > { %1708 = vmatmul.msk.f32.vlgmr.msra.gmra.mxu1 %vm670_vm14, %v2161_v61  ;;  %1709 = vmatmul.msk.f32.vlgmr.msra.gmra.mxu3 %vm670_vm14, %v2163_v62 }
 0x2d1   : > { %995 = vmatpush.msrb.mxu1 %v495_v27 }
 0x2d8   : > { %1710 = vmatmul.msk.f32.gmra.mxu3 %vm670_vm14, %v2169_v63 }
 0x34d   : > { %v703_v0 = vpop.f32.mrf.mxu1 }
 0x34e   : > { %v712_v2 = vmul.f32 0.35355338, %v703_v0 }
 0x350   : > { %v715_v3 = vadd.f32 %v712_v2, %v2176_v1 }
 0x352   : > { %v719_v4 = vsel %vm718_vm15, %v715_v3, -inf }
 0x353   : > { %v706_v5 = vpop.f32.mrf.mxu3  ;;  %720 = vmax.xlane.f32.xlu2 %v719_v4 }
 0x354   : > { %v713_v7 = vmul.f32 0.35355338, %v706_v5 }
 0x356   : > { %v716_v8 = vadd.f32 %v713_v7, %v2183_v6 }
 0x358   : > { %v722_v9 = vsel %vm718_vm15, %v716_v8, -inf }
 0x359   : > { %723 = vmax.xlane.f32.xlu1 %v722_v9 }
 0x35b   : > { %v709_v10 = vpop.f32.mrf.mxu3 }
 0x35c   : > { %v714_v12 = vmul.f32 0.35355338, %v709_v10 }
 0x35e   : > { %v717_v13 = vadd.f32 %v714_v12, %v2190_v11 }
 0x360   : > { %v726_v14 = vsel %vm725_vm0, %v717_v13, -inf }
 0x361   : > { %727 = vmax.xlane.f32.xlu0 %v726_v14 }
 0x372   : > { %760 = vrot.lane.b32.xlu1 %v2194_v15, %s1974_s2 }
 0x37a   : > { %812 = vrot.lane.b32.xlu1 %v2149_v51, %s1975_s17 }
 0x382   : > { %802 = vrot.lane.b32.xlu1 %v2161_v61, %s1976_s20 }
 0x38a   : > { %1016 = vrot.lane.b32.xlu1 %v2149_v51, %s1977_s11 }
 0x392   : > { %1014 = vrot.lane.b32.xlu1 %v2145_v50, %s1977_s11 }
 0x39a   : > { %1184 = vrot.lane.b32.xlu1 %v2141_v47, %s1978_s12 }
 0x3a2   : > { %1008 = vrot.lane.b32.xlu1 %v2163_v62, %s1979_s15 }
 0x3aa   : > { %1182 = vrot.lane.b32.xlu1 %v2169_v63, %s1980_s16 }
 0x3c6   : > { %v721_v16 = vpop.xlane.xlu2 %720 }
 0x3c7   : > { %v729_v17 = vsub.f32 %v715_v3, %v721_v16 }
 0x3c9   : > { %v732_v18 = vmul.f32 1.442695, %v729_v17 }
 0x3cb   : > { %1866 = vpow2.f32 %v732_v18 }
 0x3cc   : > { %v724_v19 = vpop.xlane.xlu1 %723 }
 0x3cd   : > { %v730_v20 = vsub.f32 %v716_v8, %v724_v19 }
 0x3cf   : > { %v734_v21 = vmul.f32 1.442695, %v730_v20 }
 0x3d1   : > { %v1867_v22 = vpop.eup %1866  ;;  %1868 = vpow2.f32 %v734_v21 }
 0x3d2   : > { %v738_v23 = vsel %vm718_vm15, %v1867_v22, 0.0 }
 0x3d3   : > { %739 = vadd.xlane.f32.xlu2 %v738_v23 }
 0x3d4   : > { %v728_v25 = vpop.xlane.xlu0 %727 }
 0x3d5   : > { %v731_v26 = vsub.f32 %v717_v13, %v728_v25 }
 0x3d7   : > { %v1869_v28 = vpop.eup %1868  ;;  %v736_v29 = vmul.f32 1.442695, %v731_v26 }
 0x3d8   : > { %v741_v30 = vsel %vm718_vm15, %v1869_v28, 0.0 }
 0x3d9   : > { %1870 = vpow2.f32 %v736_v29  ;;  %742 = vadd.xlane.f32.xlu0 %v741_v30 }
 0x3df   : > { %v1871_v31 = vpop.eup %1870 }
 0x3e0   : > { %v744_v32 = vsel %vm725_vm0, %v1871_v31, 0.0 }
 0x3e1   : > { %745 = vadd.xlane.f32.xlu0 %v744_v32 }
 0x3e4   : > { %v761_v33 = vpop.permute.xlu1 %760 }
 0x3e5   : > { %1711 = vmatpush.msk.msra.mxu2 %vm773_vm1, %v761_v33 }
 0x3eb   : > { %1831 = vrot.lane.b32.xlu2 %v2152_v56, %s1974_s2 }
 0x3ec   : > { %v813_v36 = vpop.permute.xlu1 %812 }
 0x3ed   : > { %1715 = vmatpush.xpose.msk.msrb.mxu3 %vm670_vm14, %v813_v36 }
 0x3f3   : > { %808 = vrot.lane.b32.xlu2 %v2141_v47, %s1975_s17 }
 0x3f4   : > { %v803_v44 = vpop.permute.xlu1 %802 }
 0x3f5   : > { %810 = vrot.lane.b32.xlu0 %v2145_v50, %s1975_s17 }
 0x3fb   : > { %804 = vrot.lane.b32.xlu2 %v2163_v62, %s1976_s20 }
 0x3fc   : > { %v1017_v48 = vpop.permute.xlu1 %1016 }
 0x3fd   : > { %806 = vrot.lane.b32.xlu0 %v2169_v63, %s1976_s20 }
 0x403   : > { %1188 = vrot.lane.b32.xlu2 %v2149_v51, %s1978_s12 }
 0x404   : > { %v1015_v54 = vpop.permute.xlu1 %1014 }
 0x405   : > { %1012 = vrot.lane.b32.xlu0 %v2141_v47, %s1977_s11 }
 0x40b   : > { %1186 = vrot.lane.b32.xlu2 %v2145_v50, %s1978_s12 }
 0x40c   : > { %v1185_v59 = vpop.permute.xlu1 %1184 }
 0x40d   : > { %1178 = vrot.lane.b32.xlu0 %v2161_v61, %s1980_s16 }
 0x413   : > { %1006 = vrot.lane.b32.xlu2 %v2161_v61, %s1979_s15 }
 0x415   : > { %1010 = vrot.lane.b32.xlu0 %v2169_v63, %s1979_s15  ;;  %v1009_v63 = vpop.permute.xlu1 %1008 }
 0x41b   : > { %1180 = vrot.lane.b32.xlu2 %v2163_v62, %s1980_s16 }
 0x41d   : > { %v1183_v16 = vpop.permute.xlu1 %1182 }
 0x446   : > { %v740_v37 = vpop.xlane.xlu2 %739 }
 0x447   : > { %1872 = vrcp.f32 %v740_v37 }
 0x44c   : > { %v743_v38 = vpop.xlane.xlu0 %742 }
 0x44d   : > { %v1873_v40 = vpop.eup %1872  ;;  %1874 = vrcp.f32 %v743_v38 }
 0x44e   : > { %v1832_v39 = vpop.permute.xlu2 %1831  ;;  %v750_v43 = vmul.f32 %v1873_v40, %v1867_v22 }
 0x44f   : > { %v1833_v41 = vunpack.i.l.bf16 %v1832_v39  ;;  %v1834_v42 = vunpack.i.h.bf16 %v1832_v39 }
 0x451   : > { %790 = vmatpush.msra.mxu2 %v1833_v41 }
 0x453   : > { %791 = vmatpush.msra.mxu2 %v1834_v42  ;;  %v1875_v47 = vpop.eup %1874 }
 0x454   : > { %1712 = vmatmul.msk.f32.vlgmr.msra.gmra.mxu2 %vm718_vm15, %v750_v43  ;;  %v746_v45 = vpop.xlane.xlu0 %745  ;;  %v751_v34 = vmul.f32 %v1875_v47, %v1869_v28 }
 0x455   : > { %1876 = vrcp.f32 %v746_v45 }
 0x456   : > { %v809_v46 = vpop.permute.xlu2 %808 }
 0x45b   : > { %v1877_v35 = vpop.eup %1876 }
 0x45c   : > { %1713 = vmatmul.msk.f32.gmra.mxu2 %vm718_vm15, %v751_v34  ;;  %v752_v51 = vmul.f32 %v1877_v35, %v1871_v31 }
 0x45e   : > { %v805_v50 = vpop.permute.xlu2 %804 }
 0x464   : > { %1714 = vmatmul.msk.f32.gmra.mxu2 %vm718_vm15, %v752_v51 }
 0x466   : > { %v1189_v52 = vpop.permute.xlu2 %1188 }
 0x467   : > { %1744 = vmatpush.xpose.msk.msra.mxu1 %vm670_vm14, %v1189_v52  ;;  %v811_v53 = vpop.permute.xlu0 %810 }
 0x468   : > { %1716 = vmatpush.xpose.msk.msrb.mxu3 %vm670_vm14, %v811_v53 }
 0x46c   : > { %1717 = vmatpush.xpose.msk.msrb.mxu3 %vm670_vm14, %v809_v46 }
 0x46e   : > { %v1187_v55 = vpop.permute.xlu2 %1186 }
 0x46f   : > { %1718 = vmatmul.msk.f32.vlgmr.msrb.gmra.mxu3 %vm670_vm14, %v803_v44  ;;  %1745 = vmatpush.xpose.msk.msra.mxu1 %vm670_vm14, %v1187_v55  ;;  %v807_v58 = vpop.permute.xlu0 %806 }
 0x470   : > { %1731 = vmatpush.xpose.msk.msra.mxu3 %vm670_vm14, %v1017_v48 }
 0x473   : > { %1746 = vmatpush.xpose.msk.msra.mxu1 %vm670_vm14, %v1185_v59 }
 0x474   : > { %1732 = vmatpush.xpose.msk.msra.mxu3 %vm670_vm14, %v1015_v54 }
 0x476   : > { %v1007_v61 = vpop.permute.xlu2 %1006 }
 0x477   : > { %1719 = vmatmul.msk.f32.gmra.mxu3 %vm670_vm14, %v805_v50  ;;  %v1013_v60 = vpop.permute.xlu0 %1012 }
 0x478   : > { %1733 = vmatpush.xpose.msk.msra.mxu3 %vm670_vm14, %v1013_v60 }
 0x47e   : > { %v1181_v9 = vpop.permute.xlu2 %1180 }
 0x47f   : > { %1720 = vmatmul.msk.f32.gmra.mxu3 %vm670_vm14, %v807_v58  ;;  %v1179_v62 = vpop.permute.xlu0 %1178 }
 0x487   : > { %1734 = vmatmul.msk.f32.vlgmr.msra.gmra.mxu3 %vm670_vm14, %v1007_v61  ;;  %v1011_v0 = vpop.permute.xlu0 %1010 }
 0x48f   : > { %1735 = vmatmul.msk.f32.gmra.mxu3 %vm670_vm14, %v1009_v63 }
 0x497   : > { %1736 = vmatmul.msk.f32.gmra.mxu3 %vm670_vm14, %v1011_v0 }
 0x4d7   : > { %v793_v2 = vpop.f32.mrf.mxu2 }
 0x4d8   : > { %1728 = vmatmul.msk.f32.vlgmr.msrb.gmra.mxu1 %vm670_vm14, %v793_v2 }
 0x4df   : > { %v796_v3 = vpop.f32.mrf.mxu2 }
 0x4e0   : > { %1729 = vmatmul.msk.f32.gmra.mxu1 %vm670_vm14, %v796_v3 }
 0x4e7   : > { %v799_v4 = vpop.f32.mrf.mxu2 }
 0x4e8   : > { %1730 = vmatmul.msk.f32.gmra.mxu1 %vm670_vm14, %v799_v4 }
 0x4f0   : > { %1747 = vmatmul.msk.f32.vlgmr.msra.gmra.mxu1 %vm670_vm14, %v1179_v62 }
 0x4f2   : > { %v843_v5 = vpop.f32.mrf.mxu3 }
 0x4f3   : > { %v852_v7 = vmul.f32 0.35355338, %v843_v5 }
 0x4f5   : > { %v855_v8 = vadd.f32 %v852_v7, %v2176_v1 }
 0x4f7   : > { %v858_v10 = vsel %vm718_vm15, %v855_v8, -inf }
 0x4f8   : > { %859 = vmax.xlane.f32.xlu2 %v858_v10  ;;  %1748 = vmatmul.msk.f32.gmra.mxu1 %vm670_vm14, %v1181_v9 }
 0x4fa   : > { %v846_v12 = vpop.f32.mrf.mxu3 }
 0x4fb   : > { %v853_v13 = vmul.f32 0.35355338, %v846_v12 }
 0x4fd   : > { %v856_v14 = vadd.f32 %v853_v13, %v2183_v6 }
 0x4ff   : > { %v861_v17 = vsel %vm718_vm15, %v856_v14, -inf }
 0x500   : > { %862 = vmax.xlane.f32.xlu0 %v861_v17  ;;  %1749 = vmatmul.msk.f32.gmra.mxu1 %vm670_vm14, %v1183_v16 }
 0x502   : > { %v849_v18 = vpop.f32.mrf.mxu3 }
 0x503   : > { %v854_v19 = vmul.f32 0.35355338, %v849_v18 }
 0x505   : > { %v857_v20 = vadd.f32 %v854_v19, %v2190_v11 }
 0x507   : > { %v864_v21 = vsel %vm725_vm0, %v857_v20, -inf }
 0x508   : > { %865 = vmax.xlane.f32.xlu1 %v864_v21 }
 0x50a   : > { %v1047_v22 = vpop.f32.mrf.mxu3 }
 0x50b   : > { %v1056_v23 = vmul.f32 0.35355338, %v1047_v22 }
 0x50d   : > { %v1059_v25 = vadd.f32 %v1056_v23, %v2176_v1 }
 0x50f   : > { %v1062_v26 = vsel %vm718_vm15, %v1059_v25, -inf }
 0x510   : > { %1063 = vmax.xlane.f32.xlu0 %v1062_v26 }
 0x512   : > { %v1050_v28 = vpop.f32.mrf.mxu3 }
 0x513   : > { %v1057_v29 = vmul.f32 0.35355338, %v1050_v28 }
 0x515   : > { %v2274_v30 = vadd.f32 %v1057_v29, %v2183_v6 }
 0x517   : > { %v1065_v31 = vsel %vm718_vm15, %v2274_v30, -inf }
 0x518   : > { %1066 = vmax.xlane.f32.xlu2 %v1065_v31 }
 0x51a   : > { %v1053_v32 = vpop.f32.mrf.mxu3 }
 0x51b   : > { %v1058_v33 = vmul.f32 0.35355338, %v1053_v32 }
 0x51d   : > { %v2279_v36 = vadd.f32 %v1058_v33, %v2190_v11 }
 0x51f   : > { %v1068_v27 = vsel %vm725_vm0, %v2279_v36, -inf }
 0x520   : > { %1069 = vmax.xlane.f32.xlu1 %v1068_v27 }
 0x524   : > { %895 = vrot.lane.b32.xlu0 %v2194_v15, %s1981_s18 }
 0x539   : > { %1836 = vrot.lane.b32.xlu1 %v2152_v56, %s1981_s18 }
 0x555   : > { %v2285_v37 = vpop.f32.mrf.mxu1 }
 0x55d   : > { %v2287_v38 = vpop.f32.mrf.mxu1 }
 0x565   : > { %v2289_v39 = vpop.f32.mrf.mxu1 }
 0x56b   : > { %v860_v40 = vpop.xlane.xlu2 %859 }
 0x56c   : > { %v867_v41 = vsub.f32 %v855_v8, %v860_v40 }
 0x56d   : > { %v1219_v42 = vpop.f32.mrf.mxu1 }
 0x56e   : > { %v870_v43 = vmul.f32 1.442695, %v867_v41  ;;  %v1228_v5 = vmul.f32 0.35355338, %v1219_v42 }
 0x570   : > { %1878 = vpow2.f32 %v870_v43 }
 0x573   : > { %v863_v44 = vpop.xlane.xlu0 %862 }
 0x574   : > { %v868_v45 = vsub.f32 %v856_v14, %v863_v44 }
 0x575   : > { %v1222_v46 = vpop.f32.mrf.mxu1 }
 0x576   : > { %v2291_v47 = vpop.eup %1878  ;;  %v872_v34 = vmul.f32 1.442695, %v868_v45  ;;  %v1229_v48 = vmul.f32 0.35355338, %v1222_v46 }
 0x577   : > { %v876_v50 = vsel %vm718_vm15, %v2291_v47, 0.0 }
 0x578   : > { %1880 = vpow2.f32 %v872_v34  ;;  %877 = vadd.xlane.f32.xlu2 %v876_v50  ;;  %v1232_v35 = vadd.f32 %v1229_v48, %v2183_v6 }
 0x57a   : > { %v1237_v51 = vsel %vm718_vm15, %v1232_v35, -inf }
 0x57b   : > { %v866_v52 = vpop.xlane.xlu1 %865  ;;  %1238 = vmax.xlane.f32.xlu1 %v1237_v51 }
 0x57c   : > { %v869_v53 = vsub.f32 %v857_v20, %v866_v52 }
 0x57d   : > { %v1225_v54 = vpop.f32.mrf.mxu1 }
 0x57e   : > { %v2297_v55 = vpop.eup %1880  ;;  %v874_v58 = vmul.f32 1.442695, %v869_v53  ;;  %v1230_v59 = vmul.f32 0.35355338, %v1225_v54 }
 0x57f   : > { %v879_v60 = vsel %vm718_vm15, %v2297_v55, 0.0 }
 0x580   : > { %1882 = vpow2.f32 %v874_v58  ;;  %880 = vadd.xlane.f32.xlu2 %v879_v60  ;;  %v1233_v61 = vadd.f32 %v1230_v59, %v2190_v11  ;;  %v1231_v11 = vadd.f32 %v1228_v5, %v2176_v1 }
 0x582   : > { %v1240_v62 = vsel %vm725_vm0, %v1233_v61, -inf  ;;  %v1234_v9 = vsel %vm718_vm15, %v1231_v11, -inf }
 0x583   : > { %1241 = vmax.xlane.f32.xlu0 %v1240_v62  ;;  %v1064_v6 = vpop.xlane.xlu0 %1063 }
 0x584   : > { %v1071_v63 = vsub.f32 %v1059_v25, %v1064_v6 }
 0x586   : > { %v1883_v0 = vpop.eup %1882  ;;  %v1074_v2 = vmul.f32 1.442695, %v1071_v63 }
 0x587   : > { %v882_v3 = vsel %vm725_vm0, %v1883_v0, 0.0 }
 0x588   : > { %1884 = vpow2.f32 %v1074_v2  ;;  %883 = vadd.xlane.f32.xlu2 %v882_v3 }
 0x58b   : > { %v1067_v1 = vpop.xlane.xlu2 %1066 }
 0x58c   : > { %v1072_v16 = vsub.f32 %v2274_v30, %v1067_v1 }
 0x58e   : > { %v2304_v4 = vpop.eup %1884  ;;  %v1076_v17 = vmul.f32 1.442695, %v1072_v16 }
 0x58f   : > { %v1080_v7 = vsel %vm718_vm15, %v2304_v4, 0.0 }
 0x590   : > { %1081 = vadd.xlane.f32.xlu2 %v1080_v7  ;;  %1886 = vpow2.f32 %v1076_v17 }
 0x593   : > { %v2312_v10 = vpop.xlane.xlu1 %1069 }
 0x594   : > { %1271 = vrot.lane.b32.xlu1 %v2194_v15, %s1982_s14 }
 0x596   : > { %v896_v8 = vpop.permute.xlu0 %895  ;;  %v2318_v18 = vpop.eup %1886 }
 0x597   : > { %1721 = vmatpush.msk.msrb.mxu2 %vm773_vm1, %v896_v8  ;;  %v1083_v19 = vsel %vm718_vm15, %v2318_v18, 0.0 }
 0x598   : > { %1235 = vmax.xlane.f32.xlu2 %v1234_v9 }
 0x5ab   : > { %v1837_v12 = vpop.permute.xlu1 %1836 }
 0x5ac   : > { %v1838_v13 = vunpack.i.l.bf16 %v1837_v12  ;;  %v1839_v14 = vunpack.i.h.bf16 %v1837_v12 }
 0x5ae   : > { %924 = vmatpush.msrb.mxu2 %v1838_v13 }
 0x5b0   : > { %1841 = vrot.lane.b32.xlu2 %v2152_v56, %s1982_s14  ;;  %925 = vmatpush.msrb.mxu2 %v1839_v14 }
 0x5b8   : > { %1099 = vrot.lane.b32.xlu2 %v2194_v15, %s1983_s19 }
 0x5e1   : > { %1084 = vadd.xlane.f32.xlu2 %v1083_v19 }
 0x5eb   : > { %v878_v20 = vpop.xlane.xlu2 %877 }
 0x5ec   : > { %1888 = vrcp.f32 %v878_v20 }
 0x5ee   : > { %v1239_v21 = vpop.xlane.xlu1 %1238 }
 0x5ef   : > { %v1244_v22 = vsub.f32 %v1232_v35, %v1239_v21 }
 0x5f1   : > { %v1248_v23 = vmul.f32 1.442695, %v1244_v22  ;;  %v498_v22 = vld [vmem:[%s2089_s26 + $0x18] sm:$0xff] }
 0x5f2   : > { %v1889_v25 = vpop.eup %1888 }
 0x5f3   : > { %1890 = vpow2.f32 %v1248_v23  ;;  %v881_v26 = vpop.xlane.xlu2 %880  ;;  %v888_v15 = vmul.f32 %v1889_v25, %v2291_v47 }
 0x5f4   : > { %1892 = vrcp.f32 %v881_v26 }
 0x5f5   : > { %1722 = vmatmul.msk.f32.vlgmr.msrb.gmra.mxu2 %vm718_vm15, %v888_v15 }
 0x5f6   : > { %v1242_v28 = vpop.xlane.xlu0 %1241 }
 0x5f7   : > { %v1245_v29 = vsub.f32 %v1233_v61, %v1242_v28  ;;  %v496_v61 = vld [vmem:[%s2089_s26 + $0x8] sm:$0xff] }
 0x5f8   : > { %960 = vmatpush.msrb.mxu0 %v496_v61 }
 0x5f9   : > { %v1891_v30 = vpop.eup %1890  ;;  %v1250_v31 = vmul.f32 1.442695, %v1245_v29 }
 0x5fa   : > { %v1893_v32 = vpop.eup %1892  ;;  %v1255_v33 = vsel %vm718_vm15, %v1891_v30, 0.0 }
 0x5fb   : > { %1894 = vpow2.f32 %v1250_v31  ;;  %1256 = vadd.xlane.f32.xlu1 %v1255_v33  ;;  %v884_v27 = vpop.xlane.xlu2 %883  ;;  %v889_v40 = vmul.f32 %v1893_v32, %v2297_v55  ;;  %v1073_v55 = vsub.f32 %v2279_v36, %v2312_v10 }
 0x5fc   : > { %1896 = vrcp.f32 %v884_v27 }
 0x5fd   : > { %1723 = vmatmul.msk.f32.gmra.mxu2 %vm718_vm15, %v889_v40  ;;  %v1078_v58 = vmul.f32 1.442695, %v1073_v55 }
 0x601   : > { %v1895_v41 = vpop.eup %1894 }
 0x602   : > { %v1897_v42 = vpop.eup %1896  ;;  %v1258_v43 = vsel %vm725_vm0, %v1895_v41, 0.0 }
 0x603   : > { %v1082_v44 = vpop.xlane.xlu2 %1081  ;;  %1259 = vadd.xlane.f32.xlu1 %v1258_v43  ;;  %v890_v45 = vmul.f32 %v1897_v42, %v1883_v0  ;;  %v1353_v42 = vperm.slane %v2129_v57, 7  ;;  %v1926_v43 = vld [vmem:[#allocation2] sm:$0xff] }
 0x605   : > { %1724 = vmatmul.msk.f32.gmra.mxu2 %vm718_vm15, %v890_v45 }
 0x606   : > { %v1272_v46 = vpop.permute.xlu1 %1271 }
 0x607   : > { %1750 = vmatpush.msk.msrb.mxu3 %vm773_vm1, %v1272_v46 }
 0x60b   : > { %v1236_v47 = vpop.xlane.xlu2 %1235 }
 0x60c   : > { %v1243_v34 = vsub.f32 %v1231_v11, %v1236_v47 }
 0x60e   : > { %v1246_v48 = vmul.f32 1.442695, %v1243_v34 }
 0x610   : > { %1898 = vpow2.f32 %v1246_v48 }
 0x611   : > { %1900 = vpow2.f32 %v1078_v58 }
 0x613   : > { %v1842_v50 = vpop.permute.xlu2 %1841 }
 0x614   : > { %v1843_v35 = vunpack.i.l.bf16 %v1842_v50  ;;  %v1844_v52 = vunpack.i.h.bf16 %v1842_v50 }
 0x616   : > { %v1899_v51 = vpop.eup %1898  ;;  %1300 = vmatpush.msrb.mxu3 %v1843_v35  ;;  %v1927_v35 = vld [vmem:[#allocation2 + $0x8] sm:$0xff] }
 0x617   : > { %v1252_v53 = vsel %vm718_vm15, %v1899_v51, 0.0  ;;  %v1901_v59 = vpop.eup %1900 }
 0x618   : > { %1253 = vadd.xlane.f32.xlu0 %v1252_v53  ;;  %1301 = vmatpush.msrb.mxu3 %v1844_v52  ;;  %v1086_v60 = vsel %vm725_vm0, %v1901_v59, 0.0 }
 0x61b   : > { %v1100_v54 = vpop.permute.xlu2 %1099 }
 0x61c   : > { %1737 = vmatpush.msk.msra.mxu2 %vm773_vm1, %v1100_v54 }
 0x62c   : > { %1846 = vrot.lane.b32.xlu0 %v2152_v56, %s1983_s19 }
 0x654   : > { %v1085_v11 = vpop.xlane.xlu2 %1084 }
 0x656   : > { %1087 = vadd.xlane.f32.xlu0 %v1086_v60 }
 0x66e   : > { %v1257_v36 = vpop.xlane.xlu1 %1256 }
 0x676   : > { %v1260_v3 = vpop.xlane.xlu1 %1259 }
 0x678   : > { %v927_v62 = vpop.f32.mrf.mxu2 }
 0x679   : > { %1725 = vmatmul.msk.f32.vlgmr.msrb.gmra.mxu0 %vm670_vm14, %v927_v62 }
 0x680   : > { %v930_v6 = vpop.f32.mrf.mxu2 }
 0x681   : > { %1726 = vmatmul.msk.f32.gmra.mxu0 %vm670_vm14, %v930_v6 }
 0x688   : > { %v933_v63 = vpop.f32.mrf.mxu2 }
 0x689   : > { %1727 = vmatmul.msk.f32.gmra.mxu0 %vm670_vm14, %v933_v63 }
 0x68b   : > { %v1254_v56 = vpop.xlane.xlu0 %1253 }
 0x68c   : > { %1902 = vrcp.f32 %v1254_v56 }
 0x68d   : > { %1904 = vrcp.f32 %v1257_v36 }
 0x68e   : > { %1906 = vrcp.f32 %v1082_v44 }
 0x68f   : > { %1908 = vrcp.f32 %v1260_v3 }
 0x690   : > { %1910 = vrcp.f32 %v1085_v11 }
 0x692   : > { %v1903_v0 = vpop.eup %1902 }
 0x693   : > { %v1264_v2 = vmul.f32 %v1903_v0, %v1899_v51  ;;  %v1905_v5 = vpop.eup %1904 }
 0x694   : > { %v1265_v7 = vmul.f32 %v1905_v5, %v1891_v30  ;;  %v1907_v9 = vpop.eup %1906 }
 0x695   : > { %1751 = vmatmul.msk.f32.vlgmr.msrb.gmra.mxu3 %vm718_vm15, %v1264_v2  ;;  %v1909_v12 = vpop.eup %1908  ;;  %v1092_v14 = vmul.f32 %v1907_v9, %v2304_v4  ;;  %v497_v4 = vld [vmem:[%s2089_s26 + $0x10] sm:$0xff] }
 0x696   : > { %v1266_v1 = vmul.f32 %v1909_v12, %v1895_v41  ;;  %v1911_v16 = vpop.eup %1910  ;;  %1164 = vmatpush.msra.mxu0 %v497_v4 }
 0x697   : > { %v1093_v17 = vmul.f32 %v1911_v16, %v2318_v18  ;;  %v499_v16 = vld [vmem:[%s2089_s26 + $0x20] sm:$0xff] }
 0x69d   : > { %1752 = vmatmul.msk.f32.gmra.mxu3 %vm718_vm15, %v1265_v7 }
 0x69e   : > { %v1847_v8 = vpop.permute.xlu0 %1846 }
 0x69f   : > { %v1848_v10 = vunpack.i.l.bf16 %v1847_v8  ;;  %v1849_v13 = vunpack.i.h.bf16 %v1847_v8 }
 0x6a1   : > { %1128 = vmatpush.msra.mxu2 %v1848_v10 }
 0x6a3   : > { %1129 = vmatpush.msra.mxu2 %v1849_v13  ;;  %v502_v13 = vld [vmem:[%s2089_s26 + $0x38] sm:$0xff] }
 0x6a4   : > { %1738 = vmatmul.msk.f32.vlgmr.msra.gmra.mxu2 %vm718_vm15, %v1092_v14  ;;  %v501_v14 = vld [vmem:[%s2089_s26 + $0x30] sm:$0xff]  ;;  %1462 = vmatpush.msrb.mxu0 %v502_v13  ;;  %v504_v13 = vld [vmem:[%s2089_s26 + $0x48] sm:$0xff] }
 0x6a5   : > { %1753 = vmatmul.msk.f32.gmra.mxu3 %vm718_vm15, %v1266_v1  ;;  %1336 = vmatpush.msrb.mxu2 %v498_v22  ;;  %v500_v1 = vld [vmem:[%s2089_s26 + $0x28] sm:$0xff] }
 0x6a6   : > { %1463 = vmatpush.msrb.mxu0 %v501_v14  ;;  %v503_v14 = vld [vmem:[%s2089_s26 + $0x40] sm:$0xff] }
 0x6a8   : > { %1464 = vmatpush.msrb.mxu0 %v500_v1  ;;  %v490_v1 = vld [vmem:[%s2074_s9 + $0x8] sm:$0x3] }
 0x6aa   : > { %1465 = vmatpush.msrb.mxu0 %v499_v16  ;;  %v1440_v16 = vperm.slane %v490_v1, 0 }
 0x6ac   : > { %1739 = vmatmul.msk.f32.gmra.mxu2 %vm718_vm15, %v1093_v17 }
 0x6c9   : > { %v1088_v19 = vpop.xlane.xlu0 %1087 }
 0x6ca   : > { %1912 = vrcp.f32 %v1088_v19 }
 0x6d0   : > { %v1913_v20 = vpop.eup %1912 }
 0x6d1   : > { %v1094_v21 = vmul.f32 %v1913_v20, %v1901_v59  ;;  %v1928_v59 = vld [vmem:[#allocation2 + $0x10] sm:$0x3] }
 0x6d3   : > { %1740 = vmatmul.msk.f32.gmra.mxu2 %vm718_vm15, %v1094_v21 }
 0x6f6   : > { %v962_v29 = vpop.f32.mrf.mxu0 }
 0x6f7   : > { %v998_v32 = vadd.f32 %v2285_v37, %v962_v29 }
 0x6fe   : > { %v965_v30 = vpop.f32.mrf.mxu0 }
 0x6ff   : > { %v1001_v45 = vadd.f32 %v2287_v38, %v965_v30 }
 0x706   : > { %v968_v31 = vpop.f32.mrf.mxu0 }
 0x707   : > { %v1004_v38 = vadd.f32 %v2289_v39, %v968_v31 }
 0x718   : > { %v1303_v23 = vpop.f32.mrf.mxu3 }
 0x719   : > { %1754 = vmatmul.msk.f32.vlgmr.msrb.gmra.mxu2 %vm670_vm14, %v1303_v23 }
 0x720   : > { %v1306_v25 = vpop.f32.mrf.mxu3 }
 0x721   : > { %1755 = vmatmul.msk.f32.gmra.mxu2 %vm670_vm14, %v1306_v25 }
 0x727   : > { %v1131_v26 = vpop.f32.mrf.mxu2 }
 0x728   : > { %1741 = vmatmul.msk.f32.vlgmr.msra.gmra.mxu0 %vm670_vm14, %v1131_v26  ;;  %v1309_v18 = vpop.f32.mrf.mxu3 }
 0x729   : > { %1756 = vmatmul.msk.f32.gmra.mxu2 %vm670_vm14, %v1309_v18 }
 0x72f   : > { %v1134_v15 = vpop.f32.mrf.mxu2 }
 0x730   : > { %1742 = vmatmul.msk.f32.gmra.mxu0 %vm670_vm14, %v1134_v15 }
 0x756   : > { %v1137_v28 = vpop.f32.mrf.mxu2 }
 0x757   : > { %1743 = vmatmul.msk.f32.gmra.mxu0 %vm670_vm14, %v1137_v28 }
 0x79c   : > { %v1338_v33 = vpop.f32.mrf.mxu2 }
 0x7a4   : > { %v1341_v50 = vpop.f32.mrf.mxu2 }
 0x7a5   : > { %v1166_v27 = vpop.f32.mrf.mxu0 }
 0x7a6   : > { %v1175_v40 = vadd.f32 %v1166_v27, %v998_v32 }
 0x7a8   : > { %v1347_v41 = vadd.f32 %v1338_v33, %v1175_v40 }
 0x7aa   : > { %v1350_v44 = vadd.f32 %v1926_v43, %v1347_v41 }
 0x7ac   : > { %v2360_v46 = vadd.f32 %v1353_v42, %v1350_v44  ;;  %v1344_v55 = vpop.f32.mrf.mxu2 }
 0x7ad   : > { %v1169_v47 = vpop.f32.mrf.mxu0 }
 0x7ae   : > { %v1176_v34 = vadd.f32 %v1169_v47, %v1001_v45  ;;  %v1357_v48 = vsel %vm507_vm4, %v2360_v46, 0.0 }
 0x7af   : > { %1358 = vadd.xlane.f32.xlu1 %v1357_v48 }
 0x7b0   : > { %v1348_v37 = vadd.f32 %v1341_v50, %v1176_v34 }
 0x7b2   : > { %v1351_v51 = vadd.f32 %v1927_v35, %v1348_v37 }
 0x7b4   : > { %v2364_v52 = vadd.f32 %v1353_v42, %v1351_v51 }
 0x7b6   : > { %v1360_v57 = vsel %vm507_vm4, %v2364_v52, 0.0 }
 0x7b7   : > { %1361 = vadd.xlane.f32.xlu1 %v1360_v57 }
 0x7d4   : > { %v1172_v53 = vpop.f32.mrf.mxu0 }
 0x7d5   : > { %v1177_v54 = vadd.f32 %v1172_v53, %v1004_v38 }
 0x7d7   : > { %v1349_v58 = vadd.f32 %v1344_v55, %v1177_v54 }
 0x7d9   : > { %v1352_v60 = vadd.f32 %v1928_v59, %v1349_v58 }
 0x7db   : > { %v2369_v61 = vadd.f32 %v1353_v42, %v1352_v60  ;;  %v1929_v42 = vld [vmem:[%s2074_s9] sm:$0xff]  ;;  %v506_v60 = vld [vmem:[%s2089_s26 + $0x58] sm:$0xff] }
 0x7dc   : > { %v1429_v43 = vperm.slane %v1929_v42, 2  ;;  %v1436_v48 = vperm.slane %v1929_v42, 3  ;;  %1501 = vmatpush.msrb.mxu1 %v506_v60 }
 0x7dd   : > { %v1363_v62 = vsel %vm514_vm5, %v2369_v61, 0.0 }
 0x7de   : > { %1364 = vadd.xlane.f32.xlu1 %v1363_v62 }
 0x822   : > { %v1359_v6 = vpop.xlane.xlu1 %1358 }
 0x823   : > { %v1366_v63 = vmul.f32 %v1359_v6, %v2100_v24 }
 0x825   : > { %v1369_v56 = vsub.f32 %v2360_v46, %v1366_v63 }
 0x827   : > { %v1372_v36 = vmul.f32 %v1369_v56, %v1369_v56  ;;  %v1430_v34 = vmul.f32 %v1429_v43, %v1369_v56 }
 0x829   : > { %v1375_v39 = vsel %vm507_vm4, %v1372_v36, 0.0 }
 0x82a   : > { %1376 = vadd.xlane.f32.xlu2 %v1375_v39  ;;  %v1362_v0 = vpop.xlane.xlu1 %1361 }
 0x82b   : > { %v1367_v2 = vmul.f32 %v1362_v0, %v2100_v24 }
 0x82d   : > { %v1370_v3 = vsub.f32 %v2364_v52, %v1367_v2 }
 0x82f   : > { %v1373_v5 = vmul.f32 %v1370_v3, %v1370_v3  ;;  %v1431_v38 = vmul.f32 %v1429_v43, %v1370_v3 }
 0x831   : > { %v1378_v7 = vsel %vm507_vm4, %v1373_v5, 0.0 }
 0x832   : > { %1379 = vadd.xlane.f32.xlu1 %v1378_v7 }
 0x851   : > { %v1365_v11 = vpop.xlane.xlu1 %1364 }
 0x852   : > { %v1368_v8 = vmul.f32 %v1365_v11, %v2100_v24 }
 0x854   : > { %v2381_v9 = vsub.f32 %v2369_v61, %v1368_v8 }
 0x856   : > { %v1374_v10 = vmul.f32 %v2381_v9, %v2381_v9  ;;  %v1432_v7 = vmul.f32 %v1429_v43, %v2381_v9 }
 0x858   : > { %v1381_v12 = vsel %vm514_vm5, %v1374_v10, 0.0 }
 0x859   : > { %1382 = vadd.xlane.f32.xlu2 %v1381_v12  ;;  %v505_v12 = vld [vmem:[%s2089_s26 + $0x50] sm:$0xff] }
 0x85a   : > { %1502 = vmatpush.msrb.mxu1 %v505_v12 }
 0x85c   : > { %1503 = vmatpush.msrb.mxu1 %v504_v13 }
 0x85e   : > { %1504 = vmatpush.msrb.mxu1 %v503_v14 }
 0x89d   : > { %v1377_v17 = vpop.xlane.xlu2 %1376 }
 0x89e   : > { %v1384_v24 = vmul.f32 %v1377_v17, %v2123_v49 }
 0x8a0   : > { %1914 = vrsqrt.f32 %v1384_v24  ;;  %vm1394_vm2 = vcmp.eq.f32.partialorder %v1384_v24, inf  ;;  %v1397_v30 = vand.u32 2147483648, %v1384_v24  ;;  %vm1396_vm3 = vcmp.eq.f32.partialorder %v1384_v24, 0.0 }
 0x8a5   : > { %v1380_v19 = vpop.xlane.xlu1 %1379 }
 0x8a6   : > { %v1915_v20 = vpop.eup %1914  ;;  %v1385_v21 = vmul.f32 %v1380_v19, %v2123_v49 }
 0x8a7   : > { %v1388_v22 = vmul.f32 %v1915_v20, %v1384_v24 }
 0x8a8   : > { %1916 = vrsqrt.f32 %v1385_v21  ;;  %vm1406_vm6 = vcmp.eq.f32.partialorder %v1385_v21, inf  ;;  %v1409_v45 = vand.u32 2147483648, %v1385_v21  ;;  %vm1408_vm7 = vcmp.eq.f32.partialorder %v1385_v21, 0.0 }
 0x8a9   : > { %v1389_v4 = vmul.f32 %v1915_v20, %v1388_v22 }
 0x8ab   : > { %v1390_v23 = vmul.f32 0.5, %v1389_v4 }
 0x8ad   : > { %v1391_v25 = vsub.f32 1.5, %v1390_v23 }
 0x8ae   : > { %v1917_v26 = vpop.eup %1916 }
 0x8af   : > { %v1392_v18 = vmul.f32 %v1915_v20, %v1391_v25  ;;  %v1400_v15 = vmul.f32 %v1917_v26, %v1385_v21  ;;  %v1479_v25 = vperm.slane %v490_v1, 1 }
 0x8b1   : > { %v1393_v28 = vmul.f32 %v1392_v18, %v1384_v24  ;;  %v1401_v29 = vmul.f32 %v1917_v26, %v1400_v15 }
 0x8b3   : > { %v1395_v31 = vsel %vm1394_vm2, %v1384_v24, %v1393_v28  ;;  %v1402_v32 = vmul.f32 0.5, %v1401_v29 }
 0x8b4   : > { %v1398_v33 = vsel %vm1396_vm3, %v1397_v30, %v1395_v31 }
 0x8b5   : > { %v1423_v27 = vadd.f32 1e-06, %v1398_v33  ;;  %v1403_v40 = vsub.f32 1.5, %v1402_v32 }
 0x8b7   : > { %1918 = vrcp.f32 %v1423_v27  ;;  %v1404_v41 = vmul.f32 %v1917_v26, %v1403_v40 }
 0x8b9   : > { %v1405_v44 = vmul.f32 %v1404_v41, %v1385_v21 }
 0x8bb   : > { %v1407_v47 = vsel %vm1406_vm6, %v1385_v21, %v1405_v44 }
 0x8bc   : > { %v1410_v50 = vsel %vm1408_vm7, %v1409_v45, %v1407_v47 }
 0x8bd   : > { %v1919_v37 = vpop.eup %1918  ;;  %v1424_v35 = vadd.f32 1e-06, %v1410_v50 }
 0x8be   : > { %v1433_v51 = vmul.f32 %v1919_v37, %v1430_v34 }
 0x8bf   : > { %1920 = vrcp.f32 %v1424_v35 }
 0x8c0   : > { %v1437_v57 = vadd.f32 %v1436_v48, %v1433_v51 }
 0x8c2   : > { %1757 = vmatmul.msk.f32.vlgmr.msrb.gmra.mxu0 %vm507_vm4, %v1437_v57 }
 0x8c5   : > { %v1921_v53 = vpop.eup %1920 }
 0x8c6   : > { %v1434_v54 = vmul.f32 %v1921_v53, %v1431_v38 }
 0x8c8   : > { %v1438_v55 = vadd.f32 %v1436_v48, %v1434_v54 }
 0x8ca   : > { %1758 = vmatmul.msk.f32.gmra.mxu0 %vm507_vm4, %v1438_v55 }
 0x8cc   : > { %v1383_v58 = vpop.xlane.xlu2 %1382 }
 0x8cd   : > { %v1386_v59 = vmul.f32 %v1383_v58, %v2123_v49 }
 0x8cf   : > { %1922 = vrsqrt.f32 %v1386_v59  ;;  %vm1418_vm8 = vcmp.eq.f32.partialorder %v1386_v59, inf  ;;  %v1421_v2 = vand.u32 2147483648, %v1386_v59  ;;  %vm1420_vm9 = vcmp.eq.f32.partialorder %v1386_v59, 0.0 }
 0x8d5   : > { %v1923_v62 = vpop.eup %1922 }
 0x8d6   : > { %v1412_v6 = vmul.f32 %v1923_v62, %v1386_v59 }
 0x8d8   : > { %v1413_v63 = vmul.f32 %v1923_v62, %v1412_v6 }
 0x8da   : > { %v1414_v56 = vmul.f32 0.5, %v1413_v63 }
 0x8dc   : > { %v1415_v36 = vsub.f32 1.5, %v1414_v56 }
 0x8de   : > { %v1416_v39 = vmul.f32 %v1923_v62, %v1415_v36 }
 0x8e0   : > { %v1417_v0 = vmul.f32 %v1416_v39, %v1386_v59 }
 0x8e2   : > { %v1419_v3 = vsel %vm1418_vm8, %v1386_v59, %v1417_v0 }
 0x8e3   : > { %v1422_v5 = vsel %vm1420_vm9, %v1421_v2, %v1419_v3 }
 0x8e4   : > { %v1425_v49 = vadd.f32 1e-06, %v1422_v5 }
 0x8e6   : > { %1924 = vrcp.f32 %v1425_v49 }
 0x8ec   : > { %v1925_v11 = vpop.eup %1924 }
 0x8ed   : > { %v1435_v8 = vmul.f32 %v1925_v11, %v1432_v7 }
 0x8ef   : > { %v1439_v10 = vadd.f32 %v1436_v48, %v1435_v8 }
 0x8f1   : > { %1759 = vmatmul.msk.f32.gmra.mxu0 %vm507_vm4, %v1439_v10 }
 0x93f   : > { %v1467_v17 = vpop.f32.mrf.mxu0 }
 0x940   : > { %v1468_v24 = vadd.f32 %v1467_v17, %v1440_v16 }
 0x942   : > { %v1476_v19 = vmax.f32 %v1468_v24, 0.0 }
 0x944   : > { %1760 = vmatmul.msk.f32.vlgmr.msrb.gmra.mxu1 %vm507_vm4, %v1476_v19 }
 0x947   : > { %v1470_v20 = vpop.f32.mrf.mxu0 }
 0x948   : > { %v1471_v9 = vadd.f32 %v1470_v20, %v1440_v16 }
 0x94a   : > { %v1477_v21 = vmax.f32 %v1471_v9, 0.0 }
 0x94c   : > { %1761 = vmatmul.msk.f32.gmra.mxu1 %vm507_vm4, %v1477_v21 }
 0x96e   : > { %v1473_v22 = vpop.f32.mrf.mxu0 }
 0x96f   : > { %v1474_v4 = vadd.f32 %v1473_v22, %v1440_v16 }
 0x971   : > { %v1478_v23 = vmax.f32 %v1474_v4, 0.0 }
 0x973   : > { %1762 = vmatmul.msk.f32.gmra.mxu1 %vm507_vm4, %v1478_v23 }
 0x9c1   : > { %v1506_v26 = vpop.f32.mrf.mxu1 }
 0x9c2   : > { %v1507_v18 = vadd.f32 %v1506_v26, %v1479_v25 }
 0x9c4   : > { %v1515_v15 = vadd.f32 %v1507_v18, %v2360_v46 }
 0x9c6   : > { %1518 = vst.msk [vmem:[#allocation2] sm:$0xff] %vm507_vm4, %v1515_v15 }
 0x9c9   : > { %v1509_v28 = vpop.f32.mrf.mxu1 }
 0x9ca   : > { %v1510_v29 = vadd.f32 %v1509_v28, %v1479_v25 }
 0x9cc   : > { %v1516_v30 = vadd.f32 %v1510_v29, %v2364_v52 }
 0x9ce   : > { %1519 = vst.msk [vmem:[#allocation2 + $0x8] sm:$0xff] %vm507_vm4, %v1516_v30 }
 0x9f0   : > { %v1512_v31 = vpop.f32.mrf.mxu1 }
 0x9f1   : > { %v1513_v32 = vadd.f32 %v1512_v31, %v1479_v25  ;;  %1524 = sbr.rel (%p1763_p8) target bundleno = 2553 (0x9f9), region = 56 }
 0x9f3   : > { %v1517_v33 = vadd.f32 %v1513_v32, %v2369_v61 }
 0x9f5   : > { %1520 = vst.msk [vmem:[#allocation2 + $0x10] sm:$0x3] %vm514_vm5, %v1517_v33 }
 0x9f6   : > { %1525 = vst.msk [vmem:[%s2084_s21] sm:$0xff] %vm507_vm4, %v1515_v15 }
 0x9f7   : > { %1526 = vst.msk [vmem:[%s2084_s21 + $0x8] sm:$0xff] %vm507_vm4, %v1516_v30 }
 0x9f8   : > { %1527 = vst.msk [vmem:[%s2084_s21 + $0x10] sm:$0x3] %vm514_vm5, %v1517_v33 }
 0x9f9 PF: > { %s17_s28 = sadd.s32 1, %s1968_s28   ;;  %s2454_s24 = sld [smem:[#allocation3_spill]] }
 0x9fa   : > { %p14_p9 = scmp.ge.s32.totalorder %s17_s28, 6   ;;  %s2455_s25 = sld [smem:[#allocation4_spill]] }
 0x9fb   : > { %s2456_s26 = sld [smem:[#allocation5_spill]] }
 0x9fc   : > { %s2457_s27 = sld [smem:[#allocation6_spill]]  ;;  %16 = sbr.rel (!%p14_p9) target bundleno = 4 (0x4), region = 101 }

// kernel: mbt_forward.3
= control target key start
LH: loop header
LB: loop body
LE: loop exit
PB: predicated region body
PF: predicated region fallthrough
CT: control target
= control target key end

     0   :  { %16 = vsyncpa [#allocation8], 0  ;;  %s5509_s0 = inlined_call_operand.vmem [shape: f32[2,18,32], index: 0, kind: input, shape index: {}]   ;;  %s5510_s1 = inlined_call_operand.vmem [shape: f32[1,4,32], index: 1, kind: input, shape index: {}]   ;;  %s5511_s2 = inlined_call_operand.vmem [shape: f32[26,26], index: 2, kind: input, shape index: {}]   ;;  %s5512_s3 = inlined_call_operand.vmem [shape: f32[2,2,10,32], index: 3, kind: input, shape index: {}]   ;;  %s5513_s4 = inlined_call_operand.vmem [shape: f32[2,2,32,96], index: 4, kind: input, shape index: {}]   ;;  %s5514_s5 = inlined_call_operand.vmem [shape: f32[2,2,96,32], index: 5, kind: input, shape index: {}]   ;;  %s5515_s6 = inlined_call_operand.vmem [shape: f32[4,32], index: 6, kind: input, shape index: {}]   ;;  %s5516_s7 = inlined_call_operand.vmem [shape: f32[32,2], index: 7, kind: input, shape index: {}]   ;;  %s5517_s8 = inlined_call_operand.vmem [shape: f32[1,2], index: 8, kind: input, shape index: {}]   ;;  %s5518_s9 = inlined_call_operand.hbm [shape: f32[2,2], index: 9, kind: output, shape index: {0}]   ;;  %s5519_s10 = inlined_call_operand.hbm [shape: f32[2,4,32], index: 10, kind: output, shape index: {1}]  }
   0x1   :  { %17 = vsyncpa [#allocation10], 0  ;;  %s4136_s13 = smov 0   ;;  %s4138_s14 = smov 0  }
   0x2   :  { %s4140_s15 = smov 0  }
   0x3 LB: > { %s4152_s16 = sadd.s32 4294967295, %s4062_s15   ;;  %s4155_s17 = sadd.s32 1, %s4062_s15   ;;  %s4062_s15 = sphi %s4140_s15, %s5523_s15   ;;  %s4058_s14 = sphi %s4138_s14, %s5522_s14   ;;  %s4054_s13 = sphi %s4136_s13, %s5521_s13  }
   0x4   : > { %s90_s18 = ssub.s32 %s4062_s15, %s4155_s17  ;;  %s93_s19 = sadd.s32 1, %s4058_s14 }
   0x5   : > { %p91_p0 = scmp.eq.s32.totalorder %s90_s18, 0  ;;  %p100_p1 = scmp.ne.s32.totalorder %s4058_s14, %s4054_s13 }
   0x6   : > { %p101_p2 = scmp.eq.s32.totalorder %s4062_s15, 0  ;;  %p3441_p4 = scmp.ge.s32.totalorder %s4062_s15, 2 }
   0x7   : > { %s4164_s20 = scalar_select %p91_p0, %s4058_s14, %s93_s19  }
   0x8   : > { %p4166_p3 = por %p101_p2, %p100_p1  ;;  %301 = sbr.rel (%p3441_p4) target bundleno = 62 (0x3e), region = 40 }
   0xd   : > { %304 = sbr.rel (!%p4166_p3) target bundleno = 21 (0x15), region = 44  ;;  %s306_s22 = sand.u32 (%p4166_p3), 1, %s4058_s14  }
   0xe   : > { %s3643_s23 = sshll.u32 (%p4166_p3), %s4062_s15, 4  ;;  %s3442_s24 = sshll.u32 (%p4166_p3), %s306_s22, 5 }
   0xf   : > { %s311_s27 = scalar_lea.vmem (%p4166_p3), %s5512_s3, %s3643_s23  ;;  %s308_s28 = scalar_lea.vmem (%p4166_p3), [#allocation4], %s3442_s24 }
  0x10   : > { %v346_v0 = vld [vmem:[%s311_s27] sm:$0xff] (%p4166_p3)  ;;  %v348_v1 = vld [vmem:[%s311_s27 + $0x8] sm:$0xff] (%p4166_p3) }
  0x11   : > { %v350_v2 = vld [vmem:[%s311_s27 + $0x20] sm:$0xff] (%p4166_p3)  ;;  %347 = vst [vmem:[%s308_s28] sm:$0xff] (%p4166_p3), %v346_v0  ;;  %v352_v3 = vld [vmem:[%s311_s27 + $0x28] sm:$0xff] (%p4166_p3) }
  0x12   : > { %349 = vst [vmem:[%s308_s28 + $0x8] sm:$0xff] %v348_v1 }
  0x13   : > { %351 = vst [vmem:[%s308_s28 + $0x10] sm:$0xff] %v350_v2 }
  0x14   : > { %353 = vst [vmem:[%s308_s28 + $0x18] sm:$0xff] %v352_v3 }
  0x15 PF: > { %359 = sbr.rel (!%p4166_p3) target bundleno = 33 (0x21), region = 82  ;;  %s361_s29 = sand.u32 (%p4166_p3), 1, %s4058_s14  }
  0x16   : > { %s3644_s30 = sshll.u32 (%p4166_p3), %s4062_s15, 5  ;;  %s3445_s11 = sshll.u32 (%p4166_p3), %s361_s29, 6 }
  0x17   : > { %s366_s19 = scalar_lea.vmem (%p4166_p3), %s5513_s4, %s3644_s30  ;;  %s363_s22 = scalar_lea.vmem (%p4166_p3), [#allocation5], %s3445_s11 }
  0x18   : > { %v409_v4 = vld [vmem:[%s366_s19] sm:$0xff] (%p4166_p3)  ;;  %v411_v5 = vld [vmem:[%s366_s19 + $0x8] sm:$0xff] (%p4166_p3)  ;;  %v413_v6 = vld [vmem:[%s366_s19 + $0x10] sm:$0xff] (%p4166_p3) }
  0x19   : > { %410 = vst [vmem:[%s363_s22] sm:$0xff] (%p4166_p3), %v409_v4  ;;  %v415_v7 = vld [vmem:[%s366_s19 + $0x18] sm:$0xff] (%p4166_p3)  ;;  %v417_v8 = vld [vmem:[%s366_s19 + $0x40] sm:$0xff] (%p4166_p3)  ;;  %v419_v9 = vld [vmem:[%s366_s19 + $0x48] sm:$0xff] (%p4166_p3) }
  0x1a   : > { %412 = vst [vmem:[%s363_s22 + $0x8] sm:$0xff] %v411_v5  ;;  %v421_v10 = vld [vmem:[%s366_s19 + $0x50] sm:$0xff]  ;;  %v423_v11 = vld [vmem:[%s366_s19 + $0x58] sm:$0xff] }
  0x1b   : > { %414 = vst [vmem:[%s363_s22 + $0x10] sm:$0xff] %v413_v6 }
  0x1c   : > { %416 = vst [vmem:[%s363_s22 + $0x18] sm:$0xff] %v415_v7 }
  0x1d   : > { %418 = vst [vmem:[%s363_s22 + $0x20] sm:$0xff] %v417_v8 }
  0x1e   : > { %420 = vst [vmem:[%s363_s22 + $0x28] sm:$0xff] %v419_v9 }
  0x1f   : > { %422 = vst [vmem:[%s363_s22 + $0x30] sm:$0xff] %v421_v10 }
  0x20   : > { %424 = vst [vmem:[%s363_s22 + $0x38] sm:$0xff] %v423_v11 }
  0x21 PF: > { %430 = sbr.rel (!%p4166_p3) target bundleno = 62 (0x3e), region = 120  ;;  %s432_s23 = sand.u32 (%p4166_p3), 1, %s4058_s14  }
  0x22   : > { %s3658_s24 = smul.u32 (%p4166_p3), 96, %s4062_s15 }
  0x23   : > { %s3657_s25 = smul.u32 (%p4166_p3), 192, %s432_s23 }
  0x24   : > { %s4192_s28 = scalar_lea.vmem (%p4166_p3), %s5514_s5, %s3658_s24 }
  0x25   : > { %v512_v12 = vld [vmem:[%s4192_s28] sm:$0xff] (%p4166_p3)  ;;  %v514_v13 = vld [vmem:[%s4192_s28 + $0x8] sm:$0xff] (%p4166_p3)  ;;  %v516_v14 = vld [vmem:[%s4192_s28 + $0x10] sm:$0xff] (%p4166_p3)  ;;  %s4197_s21 = scalar_lea.vmem (%p4166_p3), [#allocation6], %s3657_s25 }
  0x26   : > { %513 = vst [vmem:[%s4197_s21] sm:$0xff] %v512_v12  ;;  %v518_v15 = vld [vmem:[%s4192_s28 + $0x18] sm:$0xff]  ;;  %v520_v16 = vld [vmem:[%s4192_s28 + $0x20] sm:$0xff]  ;;  %v522_v17 = vld [vmem:[%s4192_s28 + $0x28] sm:$0xff] }
  0x27   : > { %515 = vst [vmem:[%s4197_s21 + $0x8] sm:$0xff] %v514_v13  ;;  %v524_v18 = vld [vmem:[%s4192_s28 + $0x30] sm:$0xff]  ;;  %v526_v19 = vld [vmem:[%s4192_s28 + $0x38] sm:$0xff]  ;;  %v528_v20 = vld [vmem:[%s4192_s28 + $0x40] sm:$0xff] }
  0x28   : > { %517 = vst [vmem:[%s4197_s21 + $0x10] sm:$0xff] %v516_v14  ;;  %v530_v21 = vld [vmem:[%s4192_s28 + $0x48] sm:$0xff]  ;;  %v532_v22 = vld [vmem:[%s4192_s28 + $0x50] sm:$0xff]  ;;  %v534_v23 = vld [vmem:[%s4192_s28 + $0x58] sm:$0xff] }
  0x29   : > { %519 = vst [vmem:[%s4197_s21 + $0x18] sm:$0xff] %v518_v15  ;;  %v536_v24 = vld [vmem:[%s4192_s28 + $0xc0] sm:$0xff]  ;;  %v538_v25 = vld [vmem:[%s4192_s28 + $0xc8] sm:$0xff]  ;;  %v540_v26 = vld [vmem:[%s4192_s28 + $0xd0] sm:$0xff] }
  0x2a   : > { %521 = vst [vmem:[%s4197_s21 + $0x20] sm:$0xff] %v520_v16  ;;  %v542_v27 = vld [vmem:[%s4192_s28 + $0xd8] sm:$0xff]  ;;  %v544_v28 = vld [vmem:[%s4192_s28 + $0xe0] sm:$0xff]  ;;  %v546_v29 = vld [vmem:[%s4192_s28 + $0xe8] sm:$0xff] }
  0x2b   : > { %523 = vst [vmem:[%s4197_s21 + $0x28] sm:$0xff] %v522_v17  ;;  %v548_v30 = vld [vmem:[%s4192_s28 + $0xf0] sm:$0xff]  ;;  %v550_v31 = vld [vmem:[%s4192_s28 + $0xf8] sm:$0xff]  ;;  %v552_v32 = vld [vmem:[%s4192_s28 + $0x100] sm:$0xff] }
  0x2c   : > { %525 = vst [vmem:[%s4197_s21 + $0x30] sm:$0xff] %v524_v18  ;;  %v554_v33 = vld [vmem:[%s4192_s28 + $0x108] sm:$0xff]  ;;  %v556_v34 = vld [vmem:[%s4192_s28 + $0x110] sm:$0xff]  ;;  %v558_v35 = vld [vmem:[%s4192_s28 + $0x118] sm:$0xff] }
  0x2d   : > { %527 = vst [vmem:[%s4197_s21 + $0x38] sm:$0xff] %v526_v19 }
  0x2e   : > { %529 = vst [vmem:[%s4197_s21 + $0x40] sm:$0xff] %v528_v20 }
  0x2f   : > { %531 = vst [vmem:[%s4197_s21 + $0x48] sm:$0xff] %v530_v21 }
  0x30   : > { %533 = vst [vmem:[%s4197_s21 + $0x50] sm:$0xff] %v532_v22 }
  0x31   : > { %535 = vst [vmem:[%s4197_s21 + $0x58] sm:$0xff] %v534_v23 }
  0x32   : > { %537 = vst [vmem:[%s4197_s21 + $0x60] sm:$0xff] %v536_v24 }
  0x33   : > { %539 = vst [vmem:[%s4197_s21 + $0x68] sm:$0xff] %v538_v25 }
  0x34   : > { %541 = vst [vmem:[%s4197_s21 + $0x70] sm:$0xff] %v540_v26 }
  0x35   : > { %543 = vst [vmem:[%s4197_s21 + $0x78] sm:$0xff] %v542_v27 }
  0x36   : > { %545 = vst [vmem:[%s4197_s21 + $0x80] sm:$0xff] %v544_v28 }
  0x37   : > { %547 = vst [vmem:[%s4197_s21 + $0x88] sm:$0xff] %v546_v29 }
  0x38   : > { %549 = vst [vmem:[%s4197_s21 + $0x90] sm:$0xff] %v548_v30 }
  0x39   : > { %551 = vst [vmem:[%s4197_s21 + $0x98] sm:$0xff] %v550_v31 }
  0x3a   : > { %553 = vst [vmem:[%s4197_s21 + $0xa0] sm:$0xff] %v552_v32 }
  0x3b   : > { %555 = vst [vmem:[%s4197_s21 + $0xa8] sm:$0xff] %v554_v33 }
  0x3c   : > { %557 = vst [vmem:[%s4197_s21 + $0xb0] sm:$0xff] %v556_v34 }
  0x3d   : > { %559 = vst [vmem:[%s4197_s21 + $0xb8] sm:$0xff] %v558_v35 }
  0x3e PF: > { %p3449_p5 = scmp.ge.s32.totalorder %s4062_s15, 1  ;;  %p564_p6 = scmp.lt.s32.totalorder %s4062_s15, 3 }
  0x40   : > { %p565_p7 = pnand %p3449_p5, %p564_p6 }
  0x41   : > { %s571_s29 = sand.u32 (!%p565_p7), 1, %s4054_s13   ;;  %p3452_p8 = scmp.ne.s32.totalorder (!%p565_p7), %s4152_s16, 0 }
  0x42   : > { %568 = sbr.rel (%p565_p7) target bundleno = 4259 (0x10a3), region = 158  ;;  %s3450_s30 = sshll.u32 (!%p565_p7), %s571_s29, 5 }
  0x43   : > { %s3451_s11 = sshll.u32 (!%p565_p7), %s571_s29, 6  ;;  %s3659_s12 = smul.u32 (!%p565_p7), 192, %s571_s29 }
  0x44   : > { %s4247_s18 = scalar_lea.vmem (!%p565_p7), [#allocation4], %s3450_s30  ;;  %s4249_s19 = scalar_lea.vmem (!%p565_p7), [#allocation5], %s3451_s11 }
  0x45   : > { %s4251_s22 = scalar_lea.vmem (!%p565_p7), [#allocation6], %s3659_s12 }
  0x47   : > { %628 = sbr.rel (%p3452_p8) target bundleno = 89 (0x59), region = 174 }
  0x4c   : > { %v629_v36 = vld [vmem:[%s5510_s1] sm:$0xf]  ;;  %vm630_vm0 = vcmask 257024   ;;  %vm636_vm1 = vcmask 261120   ;;  %v635_v39 = vld [vmem:[%s5509_s0 + $0x8] sm:$0x1] }
  0x4d   : > { %v632_v37 = vld [vmem:[%s5510_s1] sm:$0xf]  ;;  %631 = vst.msk [vmem:[#allocation2] sm:$0xf] %vm630_vm0, %v629_v36  ;;  %vm638_vm2 = vcmask 253952   ;;  %v3453_v40 = vld [vmem:[%s5509_s0 + $0x18] sm:$0xff] }
  0x4e   : > { %v634_v38 = vld [vmem:[%s5509_s0] sm:$0xff]  ;;  %633 = vst.msk [vmem:[#allocation3] sm:$0xf] %vm630_vm0, %v632_v37  ;;  %v649_v44 = vld [vmem:[%s5509_s0 + $0x9] sm:$0xff]  ;;  %v650_v45 = vld [vmem:[%s5509_s0 + $0x11] sm:$0x1] }
  0x4f   : > { %637 = vst.msk [vmem:[#allocation2 + $0x4] sm:$0xff] %vm636_vm1, %v634_v38  ;;  %v3454_v41 = vld [vmem:[%s5509_s0 + $0x20] sm:$0x1]  ;;  %v3455_v46 = vld [vmem:[%s5509_s0 + $0x21] sm:$0xff]  ;;  %v3456_v47 = vld [vmem:[%s5509_s0 + $0x29] sm:$0x1] }
  0x50   : > { %639 = vst.msk [vmem:[#allocation2 + $0xc] sm:$0x1] %vm638_vm2, %v635_v39  ;;  %v645_v42 = vld [vmem:[%s5510_s1] sm:$0xf] }
  0x51   : > { %643 = vst.msk [vmem:[#allocation3 + $0x4] sm:$0xff] %vm636_vm1, %v3453_v40  ;;  %v647_v43 = vld [vmem:[%s5510_s1] sm:$0xf] }
  0x52   : > { %644 = vst.msk [vmem:[#allocation3 + $0xc] sm:$0x1] %vm638_vm2, %v3454_v41 }
  0x53   : > { %646 = vst.msk [vmem:[#allocation2 + $0xd] sm:$0xf] %vm630_vm0, %v645_v42 }
  0x54   : > { %648 = vst.msk [vmem:[#allocation3 + $0xd] sm:$0xf] %vm630_vm0, %v647_v43 }
  0x55   : > { %651 = vst.msk [vmem:[#allocation2 + $0x11] sm:$0xff] %vm636_vm1, %v649_v44 }
  0x56   : > { %652 = vst.msk [vmem:[#allocation2 + $0x19] sm:$0x1] %vm638_vm2, %v650_v45 }
  0x57   : > { %655 = vst.msk [vmem:[#allocation3 + $0x11] sm:$0xff] %vm636_vm1, %v3455_v46 }
  0x58   : > { %656 = vst.msk [vmem:[#allocation3 + $0x19] sm:$0x1] %vm638_vm2, %v3456_v47 }
  0x59 PF: > { %vm693_vm3 = vcmask 254976   ;;  %vm683_vm4 = vcmask 261120   ;;  %v661_v53 = vld [vmem:[#allocation2] sm:$0xff]  ;;  %v4064_v56 = vmov 32.0   ;;  %v4065_v19 = vmov 31.0   ;;  %v670_v23 = vld [vmem:[%s4249_s19 + $0x18] sm:$0xff] }
  0x5a   : > { %v662_v52 = vld [vmem:[#allocation2 + $0x8] sm:$0xff]  ;;  %v684_v55 = vsel %vm683_vm4, %v661_v53, 0.0  ;;  %3753 = vrcp.f32 %v4064_v56  ;;  %v669_v24 = vld [vmem:[%s4249_s19 + $0x10] sm:$0xff]  ;;  %3646 = vmatpush.msra.mxu3 %v670_v23  ;;  %833 = vmatpush.msra.mxu0 %v670_v23  ;;  %v667_v27 = vld [vmem:[%s4249_s19] sm:$0xff]  ;;  %s4066_s11 = smov 32   ;;  %s4067_s12 = smov 96  }
  0x5b   : > { %v687_v54 = vsel %vm683_vm4, %v662_v52, 0.0  ;;  %3755 = vrcp.f32 %v4065_v19  ;;  %v668_v25 = vld [vmem:[%s4249_s19 + $0x8] sm:$0xff]  ;;  %3645 = vmatpush.msra.mxu1 %v670_v23  ;;  %s4068_s23 = smov 64   ;;  %vm885_vm15 = vcmask 64512   ;;  %vm943_vm0 = vcmask 211968   ;;  %s4069_s29 = smov 104  }
  0x5c   : > { %v663_v49 = vld [vmem:[#allocation2 + $0x10] sm:$0xff]  ;;  %3648 = vmatpush.msra.mxu3 %v669_v24  ;;  %834 = vmatpush.msra.mxu0 %v669_v24  ;;  %vm953_vm1 = vcmask 205824   ;;  %s4070_s30 = smov 72   ;;  %s4071_s24 = smov 120   ;;  %vm1016_vm2 = vcmask 1041408  }
  0x5d   : > { %v664_v48 = vld [vmem:[#allocation2 + $0x18] sm:$0x3]  ;;  %v690_v51 = vsel %vm683_vm4, %v663_v49, 0.0  ;;  %3647 = vmatpush.msra.mxu1 %v669_v24  ;;  %s4072_s15 = smov 80   ;;  %s4073_s25 = smov 88  }
  0x5e   : > { %v694_v50 = vsel %vm693_vm3, %v664_v48, 0.0  ;;  %691 = vadd.xlane.f32.xlu1 %v690_v51  ;;  %3650 = vmatpush.msra.mxu3 %v668_v25  ;;  %s4074_s13 = smov 112   ;;  %s4075_s26 = smov 40  }
  0x5f   : > { %695 = vadd.xlane.f32.xlu0 %v694_v50  ;;  %835 = vmatpush.msra.mxu0 %v668_v25  ;;  %s4076_s27 = smov 56   ;;  %s4077_s28 = smov 48  }
  0x60   : > { %v3754_v57 = vpop.eup %3753  ;;  %3649 = vmatpush.msra.mxu1 %v668_v25  ;;  %3652 = vmatpush.msra.mxu3 %v667_v27  ;;  %p3635_p9 = scmp.ne.s32.totalorder %s4152_s16, 1 }
  0x61   : > { %v698_v58 = vmul.f32 32.0, %v3754_v57  ;;  %vm702_vm5 = vweird.f32 %v3754_v57  ;;  %v3756_v20 = vpop.eup %3755  ;;  %836 = vmatpush.msra.mxu0 %v667_v27 }
  0x62   : > { %v729_v21 = vmul.f32 31.0, %v3756_v20  ;;  %vm733_vm6 = vweird.f32 %v3756_v20  ;;  %3651 = vmatpush.msra.mxu1 %v667_v27 }
  0x63   : > { %v699_v59 = vsub.f32 1.0, %v698_v58 }
  0x64   : > { %v730_v22 = vsub.f32 1.0, %v729_v21 }
  0x65   : > { %v700_v60 = vmul.f32 %v3754_v57, %v699_v59 }
  0x66   : > { %685 = vadd.xlane.f32.xlu1 %v684_v55  ;;  %v731_v26 = vmul.f32 %v3756_v20, %v730_v22 }
  0x67   : > { %688 = vadd.xlane.f32.xlu0 %v687_v54  ;;  %v701_v61 = vadd.f32 %v3754_v57, %v700_v60 }
  0x68   : > { %v732_v28 = vadd.f32 %v3756_v20, %v731_v26 }
  0x69   : > { %v4306_v62 = vsel %vm702_vm5, %v3754_v57, %v701_v61 }
  0x6a   : > { %v4336_v29 = vsel %vm733_vm6, %v3756_v20, %v732_v28 }
  0xd1   : > { %v692_v0 = vpop.xlane.xlu1 %691 }
  0xd2   : > { %v696_v63 = vpop.xlane.xlu0 %695  ;;  %v706_v2 = vmul.f32 %v4306_v62, %v692_v0 }
  0xd3   : > { %v707_v1 = vmul.f32 %v4306_v62, %v696_v63 }
  0xd4   : > { %v4310_v3 = vsub.f32 %v663_v49, %v706_v2 }
  0xd5   : > { %v4312_v4 = vsub.f32 %v664_v48, %v707_v1 }
  0xd6   : > { %v714_v6 = vmul.f32 %v4310_v3, %v4310_v3 }
  0xd7   : > { %v715_v5 = vmul.f32 %v4312_v4, %v4312_v4 }
  0xd8   : > { %v722_v8 = vsel %vm683_vm4, %v714_v6, 0.0 }
  0xd9   : > { %v725_v7 = vsel %vm693_vm3, %v715_v5, 0.0  ;;  %723 = vadd.xlane.f32.xlu0 %v722_v8  ;;  %v686_v10 = vpop.xlane.xlu1 %685 }
  0xda   : > { %726 = vadd.xlane.f32.xlu2 %v725_v7  ;;  %v689_v9 = vpop.xlane.xlu0 %688  ;;  %v704_v12 = vmul.f32 %v4306_v62, %v686_v10 }
  0xdb   : > { %v705_v11 = vmul.f32 %v4306_v62, %v689_v9 }
  0xdc   : > { %v4324_v14 = vsub.f32 %v661_v53, %v704_v12  ;;  %v4347_v53 = vld [vmem:[%s4247_s18] sm:$0xff] }
  0xdd   : > { %v4322_v13 = vsub.f32 %v662_v52, %v705_v11  ;;  %v855_v59 = vperm.slane %v4347_v53, 5  ;;  %v795_v63 = vperm.slane %v4347_v53, 0  ;;  %v804_v11 = vperm.slane %v4347_v53, 1 }
  0xde   : > { %v712_v16 = vmul.f32 %v4324_v14, %v4324_v14 }
  0xdf   : > { %v713_v15 = vmul.f32 %v4322_v13, %v4322_v13  ;;  %v799_v9 = vmul.f32 %v795_v63, %v4312_v4 }
  0xe0   : > { %v716_v18 = vsel %vm683_vm4, %v712_v16, 0.0 }
  0xe1   : > { %v719_v17 = vsel %vm683_vm4, %v713_v15, 0.0  ;;  %717 = vadd.xlane.f32.xlu1 %v716_v18 }
  0xe2   : > { %720 = vadd.xlane.f32.xlu2 %v719_v17 }
  0xfa   : > { %857 = vrot.lane.b32.xlu2 %v855_v59, %s4066_s11 }
 0x14c   : > { %v724_v31 = vpop.xlane.xlu0 %723 }
 0x14d   : > { %v727_v30 = vpop.xlane.xlu2 %726  ;;  %v4340_v33 = vmul.f32 %v4336_v29, %v724_v31  ;;  %v797_v31 = vmul.f32 %v795_v63, %v4322_v13 }
 0x14e   : > { %v738_v32 = vmul.f32 %v4336_v29, %v727_v30 }
 0x14f   : > { %vm770_vm9 = vcmp.eq.f32.partialorder %v4340_v33, inf  ;;  %vm772_vm10 = vcmp.eq.f32.partialorder %v4340_v33, 0.0  ;;  %v773_v18 = vand.u32 2147483648, %v4340_v33 }
 0x150   : > { %3757 = vrsqrt.f32 %v738_v32  ;;  %vm782_vm7 = vcmp.eq.f32.partialorder %v738_v32, inf  ;;  %v785_v57 = vand.u32 2147483648, %v738_v32  ;;  %vm784_vm8 = vcmp.eq.f32.partialorder %v738_v32, 0.0 }
 0x151   : > { %3759 = vrsqrt.f32 %v4340_v33 }
 0x154   : > { %v718_v35 = vpop.xlane.xlu1 %717 }
 0x155   : > { %v721_v34 = vpop.xlane.xlu2 %720  ;;  %v735_v38 = vmul.f32 %v4336_v29, %v718_v35 }
 0x156   : > { %v3758_v36 = vpop.eup %3757  ;;  %v736_v37 = vmul.f32 %v4336_v29, %v721_v34 }
 0x157   : > { %v3760_v39 = vpop.eup %3759  ;;  %v776_v40 = vmul.f32 %v3758_v36, %v738_v32  ;;  %vm746_vm12 = vcmp.eq.f32.partialorder %v735_v38, inf  ;;  %v749_v19 = vand.u32 2147483648, %v735_v38  ;;  %vm748_vm14 = vcmp.eq.f32.partialorder %v735_v38, 0.0 }
 0x158   : > { %v764_v41 = vmul.f32 %v3760_v39, %v4340_v33  ;;  %3761 = vrsqrt.f32 %v736_v37  ;;  %vm758_vm11 = vcmp.eq.f32.partialorder %v736_v37, inf  ;;  %v761_v17 = vand.u32 2147483648, %v736_v37 }
 0x159   : > { %3763 = vrsqrt.f32 %v735_v38  ;;  %v777_v42 = vmul.f32 %v3758_v36, %v776_v40  ;;  %vm760_vm13 = vcmp.eq.f32.partialorder %v736_v37, 0.0  ;;  %v798_v40 = vmul.f32 %v795_v63, %v4310_v3 }
 0x15a   : > { %v765_v43 = vmul.f32 %v3760_v39, %v764_v41 }
 0x15b   : > { %v778_v44 = vmul.f32 0.5, %v777_v42 }
 0x15c   : > { %v766_v45 = vmul.f32 0.5, %v765_v43 }
 0x15d   : > { %v779_v46 = vsub.f32 1.5, %v778_v44  ;;  %v858_v13 = vpop.permute.xlu2 %857 }
 0x15e   : > { %v3762_v47 = vpop.eup %3761  ;;  %v767_v48 = vsub.f32 1.5, %v766_v45 }
 0x15f   : > { %v3764_v49 = vpop.eup %3763  ;;  %v752_v50 = vmul.f32 %v3762_v47, %v736_v37  ;;  %v780_v51 = vmul.f32 %v3758_v36, %v779_v46 }
 0x160   : > { %v740_v52 = vmul.f32 %v3764_v49, %v735_v38  ;;  %v768_v56 = vmul.f32 %v3760_v39, %v767_v48 }
 0x161   : > { %v781_v54 = vmul.f32 %v780_v51, %v738_v32  ;;  %v753_v55 = vmul.f32 %v3762_v47, %v752_v50 }
 0x162   : > { %v741_v58 = vmul.f32 %v3764_v49, %v740_v52  ;;  %v769_v6 = vmul.f32 %v768_v56, %v4340_v33 }
 0x163   : > { %v783_v60 = vsel %vm782_vm7, %v738_v32, %v781_v54  ;;  %v754_v61 = vmul.f32 0.5, %v753_v55 }
 0x164   : > { %v786_v0 = vsel %vm784_vm8, %v785_v57, %v783_v60  ;;  %v742_v1 = vmul.f32 0.5, %v741_v58  ;;  %v771_v15 = vsel %vm770_vm9, %v4340_v33, %v769_v6  ;;  %v796_v33 = vmul.f32 %v795_v63, %v4324_v14 }
 0x165   : > { %v790_v2 = vadd.f32 1e-06, %v786_v0  ;;  %v755_v5 = vsub.f32 1.5, %v754_v61  ;;  %v774_v22 = vsel %vm772_vm10, %v773_v18, %v771_v15  ;;  %v850_v58 = vperm.slane %v4347_v53, 4  ;;  %v4432_v15 = vld [vmem:[%s5511_s2 + $0x10] sm:$0xff] }
 0x166   : > { %v743_v7 = vsub.f32 1.5, %v742_v1  ;;  %v789_v28 = vadd.f32 1e-06, %v774_v22  ;;  %v4418_v1 = vld [vmem:[%s5511_s2] sm:$0xff] }
 0x167   : > { %3765 = vrcp.f32 %v790_v2  ;;  %v756_v8 = vmul.f32 %v3762_v47, %v755_v5  ;;  %v864_v47 = vperm.slane %v4347_v53, 6 }
 0x168   : > { %v744_v10 = vmul.f32 %v3764_v49, %v743_v7 }
 0x169   : > { %v757_v12 = vmul.f32 %v756_v8, %v736_v37  ;;  %v4425_v8 = vld [vmem:[%s5511_s2 + $0x8] sm:$0xff] }
 0x16a   : > { %v745_v16 = vmul.f32 %v744_v10, %v735_v38 }
 0x16b   : > { %v759_v20 = vsel %vm758_vm11, %v736_v37, %v757_v12 }
 0x16c   : > { %v747_v4 = vsel %vm746_vm12, %v735_v38, %v745_v16  ;;  %v762_v21 = vsel %vm760_vm13, %v761_v17, %v759_v20  ;;  %v4439_v20 = vld [vmem:[%s5511_s2 + $0x18] sm:$0x3] }
 0x16d   : > { %v3766_v23 = vpop.eup %3765  ;;  %v750_v24 = vsel %vm748_vm14, %v749_v19, %v747_v4  ;;  %v788_v25 = vadd.f32 1e-06, %v762_v21 }
 0x16e   : > { %v803_v26 = vmul.f32 %v3766_v23, %v799_v9  ;;  %v787_v27 = vadd.f32 1e-06, %v750_v24 }
 0x16f   : > { %3767 = vrcp.f32 %v788_v25 }
 0x170   : > { %v808_v30 = vadd.f32 %v804_v11, %v803_v26  ;;  %3769 = vrcp.f32 %v787_v27 }
 0x171   : > { %3771 = vrcp.f32 %v789_v28 }
 0x172   : > { %3460 = vmatmul.msk.f32.vlgmr.msra.gmra.mxu3 %vm683_vm4, %v808_v30 }
 0x175   : > { %v3768_v32 = vpop.eup %3767 }
 0x176   : > { %v3770_v34 = vpop.eup %3769  ;;  %v801_v35 = vmul.f32 %v3768_v32, %v797_v31 }
 0x177   : > { %v800_v36 = vmul.f32 %v3770_v34, %v796_v33  ;;  %v3772_v38 = vpop.eup %3771 }
 0x178   : > { %v806_v37 = vadd.f32 %v804_v11, %v801_v35  ;;  %v802_v41 = vmul.f32 %v3772_v38, %v798_v40 }
 0x179   : > { %v805_v39 = vadd.f32 %v804_v11, %v800_v36 }
 0x17a   : > { %3458 = vmatmul.msk.f32.vlgmr.msra.gmra.mxu1 %vm683_vm4, %v806_v37  ;;  %v807_v42 = vadd.f32 %v804_v11, %v802_v41 }
 0x17b   : > { %3457 = vmatmul.msk.f32.vlgmr.msra.gmra.mxu0 %vm683_vm4, %v805_v39 }
 0x182   : > { %3459 = vmatmul.msk.f32.gmra.mxu1 %vm683_vm4, %v807_v42 }
 0x1f5   : > { %v4366_v43 = vpop.f32.mrf.mxu3 }
 0x1f6   : > { %v4369_v14 = vadd.f32 %v858_v13, %v4366_v43  ;;  %v4411_v53 = vadd.f32 %v850_v58, %v4366_v43 }
 0x1f7   : > { %v841_v44 = vpop.f32.mrf.mxu1 }
 0x1f8   : > { %v4371_v45 = vadd.f32 %v858_v13, %v841_v44  ;;  %883 = vrot.lane.b32.xlu0 %v4369_v14, %s4067_s12  ;;  %v838_v3 = vpop.f32.mrf.mxu0  ;;  %v4402_v61 = vadd.f32 %v850_v58, %v841_v44 }
 0x1f9   : > { %v4377_v46 = vadd.f32 %v858_v13, %v838_v3  ;;  %v4398_v60 = vadd.f32 %v850_v58, %v838_v3 }
 0x1fa   : > { %879 = vrot.lane.b32.xlu2 %v4371_v45, %s4067_s12 }
 0x1ff   : > { %v844_v48 = vpop.f32.mrf.mxu1 }
 0x200   : > { %v4380_v49 = vadd.f32 %v858_v13, %v844_v48  ;;  %877 = vrot.lane.b32.xlu0 %v4377_v46, %s4067_s12  ;;  %v4406_v63 = vadd.f32 %v850_v58, %v844_v48 }
 0x202   : > { %866 = vrot.lane.b32.xlu2 %v864_v47, %s4068_s23  ;;  %881 = vrot.lane.b32.xlu1 %v4380_v49, %s4067_s12 }
 0x254   : > { %v880_v50 = vpop.permute.xlu2 %879 }
 0x25c   : > { %v4387_v51 = vpop.permute.xlu2 %866 }
 0x25d   : > { %v870_v52 = vadd.f32 %v4387_v51, %v841_v44  ;;  %v871_v54 = vadd.f32 %v4387_v51, %v844_v48  ;;  %v4443_v22 = vadd.f32 %v4387_v51, %v838_v3  ;;  %v4462_v40 = vadd.f32 %v4387_v51, %v4366_v43  ;;  %v671_v3 = vld [vmem:[%s4251_s22] sm:$0xff] }
 0x25f   : > { %v4391_v55 = vpack.i.bf16 %v870_v52, %v871_v54 }
 0x26a   : > { %v884_v56 = vpop.permute.xlu0 %883 }
 0x26b   : > { %3461 = vmatpush.xpose.msk.msrb.mxu1 %vm885_vm15, %v884_v56 }
 0x272   : > { %v878_v59 = vpop.permute.xlu0 %877 }
 0x274   : > { %v882_v57 = vpop.permute.xlu1 %881 }
 0x275   : > { %3462 = vmatpush.xpose.msk.msrb.mxu1 %vm885_vm15, %v882_v57 }
 0x279   : > { %3463 = vmatpush.xpose.msk.msrb.mxu1 %vm885_vm15, %v880_v50 }
 0x27d   : > { %3464 = vmatpush.xpose.msk.msrb.mxu1 %vm885_vm15, %v878_v59 }
 0x280   : > { %3465 = vmatmul.msk.f32.vlgmr.msrb.gmra.mxu1 %vm885_vm15, %v4398_v60 }
 0x281   : > { %1283 = vmatpush.msra.mxu1 %v671_v3 }
 0x288   : > { %3466 = vmatmul.msk.f32.gmra.mxu1 %vm885_vm15, %v4402_v61 }
 0x290   : > { %3467 = vmatmul.msk.f32.gmra.mxu1 %vm885_vm15, %v4406_v63 }
 0x298   : > { %3468 = vmatmul.msk.f32.gmra.mxu1 %vm885_vm15, %v4411_v53 }
 0x2fd   : > { %v923_v0 = vpop.f32.mrf.mxu1 }
 0x2fe   : > { %v935_v2 = vmul.f32 0.35355338, %v923_v0 }
 0x300   : > { %v939_v5 = vadd.f32 %v935_v2, %v4418_v1 }
 0x302   : > { %v944_v6 = vsel %vm943_vm0, %v939_v5, -inf }
 0x303   : > { %945 = vmax.xlane.f32.xlu2 %v944_v6 }
 0x305   : > { %v926_v7 = vpop.f32.mrf.mxu1 }
 0x306   : > { %v936_v9 = vmul.f32 0.35355338, %v926_v7 }
 0x308   : > { %v940_v10 = vadd.f32 %v936_v9, %v4425_v8 }
 0x30a   : > { %v947_v11 = vsel %vm943_vm0, %v940_v10, -inf }
 0x30b   : > { %948 = vmax.xlane.f32.xlu1 %v947_v11 }
 0x30d   : > { %v929_v12 = vpop.f32.mrf.mxu1 }
 0x30e   : > { %v937_v16 = vmul.f32 0.35355338, %v929_v12 }
 0x310   : > { %v941_v17 = vadd.f32 %v937_v16, %v4432_v15 }
 0x312   : > { %v950_v18 = vsel %vm943_vm0, %v941_v17, -inf }
 0x313   : > { %951 = vmax.xlane.f32.xlu0 %v950_v18 }
 0x315   : > { %v932_v19 = vpop.f32.mrf.mxu1 }
 0x316   : > { %v938_v4 = vmul.f32 0.35355338, %v932_v19 }
 0x318   : > { %v942_v21 = vadd.f32 %v938_v4, %v4439_v20 }
 0x31a   : > { %v954_v23 = vsel %vm953_vm1, %v942_v21, -inf }
 0x31b   : > { %955 = vmax.xlane.f32.xlu1 %v954_v23  ;;  %993 = vrot.lane.b32.xlu2 %v4443_v22, %s4068_s23 }
 0x376   : > { %v946_v24 = vpop.xlane.xlu2 %945 }
 0x377   : > { %v957_v25 = vsub.f32 %v939_v5, %v946_v24 }
 0x379   : > { %v961_v26 = vmul.f32 1.442695, %v957_v25 }
 0x37b   : > { %3773 = vpow2.f32 %v961_v26 }
 0x37e   : > { %v949_v27 = vpop.xlane.xlu1 %948 }
 0x37f   : > { %v958_v28 = vsub.f32 %v940_v10, %v949_v27  ;;  %v1932_v27 = vld [vmem:[#allocation3] sm:$0xff] }
 0x381   : > { %v4448_v30 = vpop.eup %3773  ;;  %v963_v31 = vmul.f32 1.442695, %v958_v28  ;;  %v1957_v28 = vsel %vm683_vm4, %v1932_v27, 0.0 }
 0x382   : > { %v969_v32 = vsel %vm943_vm0, %v4448_v30, 0.0 }
 0x383   : > { %3775 = vpow2.f32 %v963_v31  ;;  %970 = vadd.xlane.f32.xlu0 %v969_v32 }
 0x386   : > { %v952_v33 = vpop.xlane.xlu0 %951 }
 0x387   : > { %v959_v34 = vsub.f32 %v941_v17, %v952_v33 }
 0x389   : > { %v4452_v35 = vpop.eup %3775  ;;  %v965_v36 = vmul.f32 1.442695, %v959_v34 }
 0x38a   : > { %v972_v37 = vsel %vm943_vm0, %v4452_v35, 0.0 }
 0x38b   : > { %3777 = vpow2.f32 %v965_v36  ;;  %973 = vadd.xlane.f32.xlu1 %v972_v37  ;;  %v4557_v36 = vld [vmem:[#allocation3 + $0x8] sm:$0xff] }
 0x38c   : > { %v1960_v37 = vsel %vm683_vm4, %v4557_v36, 0.0 }
 0x38e   : > { %v956_v41 = vpop.xlane.xlu1 %955 }
 0x38f   : > { %v960_v42 = vsub.f32 %v942_v21, %v956_v41  ;;  %v4563_v41 = vld [vmem:[#allocation3 + $0x10] sm:$0xff] }
 0x391   : > { %v4456_v38 = vpop.eup %3777  ;;  %v967_v13 = vmul.f32 1.442695, %v960_v42  ;;  %v1963_v42 = vsel %vm683_vm4, %v4563_v41, 0.0 }
 0x392   : > { %v975_v39 = vsel %vm943_vm0, %v4456_v38, 0.0 }
 0x393   : > { %976 = vadd.xlane.f32.xlu2 %v975_v39  ;;  %3779 = vpow2.f32 %v967_v13 }
 0x397   : > { %999 = vrot.lane.b32.xlu0 %v4462_v40, %s4068_s23 }
 0x399   : > { %v4480_v43 = vpop.eup %3779 }
 0x39a   : > { %v978_v44 = vsel %vm953_vm1, %v4480_v43, 0.0 }
 0x3a4   : > { %3714 = vrot.lane.b32.xlu1 %v4391_v55, %s4068_s23 }
 0x3ab   : > { %1509 = vrot.lane.b32.xlu2 %v4398_v60, %s4069_s29 }
 0x3ac   : > { %1523 = vrot.lane.b32.xlu1 %v4369_v14, %s4070_s30 }
 0x3b3   : > { %1048 = vrot.lane.b32.xlu2 %v4398_v60, %s4071_s24 }
 0x3b4   : > { %1521 = vrot.lane.b32.xlu1 %v4380_v49, %s4070_s30 }
 0x3bb   : > { %1515 = vrot.lane.b32.xlu2 %v4411_v53, %s4069_s29 }
 0x3bc   : > { %1519 = vrot.lane.b32.xlu1 %v4371_v45, %s4070_s30 }
 0x3c1   : > { %979 = vadd.xlane.f32.xlu0 %v978_v44 }
 0x3c3   : > { %1309 = vrot.lane.b32.xlu2 %v4380_v49, %s4072_s15 }
 0x3c4   : > { %1517 = vrot.lane.b32.xlu1 %v4377_v46, %s4070_s30 }
 0x3cb   : > { %1305 = vrot.lane.b32.xlu2 %v4377_v46, %s4072_s15 }
 0x3cc   : > { %1060 = vrot.lane.b32.xlu1 %v4380_v49, %s4073_s25 }
 0x3d3   : > { %1301 = vrot.lane.b32.xlu2 %v4406_v63, %s4074_s13 }
 0x3d4   : > { %1511 = vrot.lane.b32.xlu1 %v4402_v61, %s4069_s29 }
 0x3d5   : > { %1062 = vrot.lane.b32.xlu0 %v4369_v14, %s4073_s25 }
 0x3dc   : > { %1058 = vrot.lane.b32.xlu1 %v4371_v45, %s4073_s25 }
 0x3dd   : > { %1056 = vrot.lane.b32.xlu0 %v4377_v46, %s4073_s25 }
 0x3e4   : > { %1513 = vrot.lane.b32.xlu1 %v4406_v63, %s4069_s29 }
 0x3e5   : > { %1050 = vrot.lane.b32.xlu0 %v4402_v61, %s4071_s24 }
 0x3ec   : > { %1052 = vrot.lane.b32.xlu1 %v4406_v63, %s4071_s24 }
 0x3ed   : > { %1311 = vrot.lane.b32.xlu0 %v4369_v14, %s4072_s15 }
 0x3f4   : > { %1054 = vrot.lane.b32.xlu1 %v4411_v53, %s4071_s24 }
 0x3f5   : > { %1307 = vrot.lane.b32.xlu0 %v4371_v45, %s4072_s15  ;;  %v994_v45 = vpop.permute.xlu2 %993 }
 0x3f6   : > { %v971_v46 = vpop.xlane.xlu0 %970 }
 0x3f7   : > { %3781 = vrcp.f32 %v971_v46 }
 0x3fc   : > { %1297 = vrot.lane.b32.xlu1 %v4398_v60, %s4074_s13  ;;  %v4528_v60 = vld [vmem:[#allocation3 + $0x18] sm:$0x3]  ;;  %1961 = vadd.xlane.f32.xlu2 %v1960_v37 }
 0x3fd   : > { %1299 = vrot.lane.b32.xlu0 %v4402_v61, %s4074_s13  ;;  %v3782_v50 = vpop.eup %3781  ;;  %v1966_v63 = vsel %vm693_vm3, %v4528_v60, 0.0 }
 0x3fe   : > { %v974_v47 = vpop.xlane.xlu1 %973  ;;  %v985_v56 = vmul.f32 %v3782_v50, %v4448_v30 }
 0x3ff   : > { %3783 = vrcp.f32 %v974_v47 }
 0x404   : > { %1303 = vrot.lane.b32.xlu1 %v4411_v53, %s4074_s13  ;;  %1964 = vadd.xlane.f32.xlu2 %v1963_v42 }
 0x405   : > { %v3784_v52 = vpop.eup %3783 }
 0x406   : > { %v977_v51 = vpop.xlane.xlu2 %976  ;;  %v986_v57 = vmul.f32 %v3784_v52, %v4452_v35 }
 0x407   : > { %3785 = vrcp.f32 %v977_v51 }
 0x409   : > { %v1000_v14 = vpop.permute.xlu0 %999 }
 0x40a   : > { %3469 = vmatpush.msk.msrb.mxu0 %vm1016_vm2, %v1000_v14  ;;  %3653 = vmatpush.msk.msra.mxu2 %vm1016_vm2, %v1000_v14 }
 0x40d   : > { %v3786_v59 = vpop.eup %3785 }
 0x40e   : > { %v987_v61 = vmul.f32 %v3786_v59, %v4456_v38  ;;  %v1510_v10 = vpop.permute.xlu2 %1509 }
 0x416   : > { %v3715_v48 = vpop.permute.xlu1 %3714  ;;  %v1049_v16 = vpop.permute.xlu2 %1048 }
 0x417   : > { %v3716_v49 = vunpack.i.l.bf16 %v3715_v48  ;;  %v3717_v54 = vunpack.i.h.bf16 %v3715_v48 }
 0x419   : > { %1032 = vmatpush.msrb.mxu0 %v3716_v49  ;;  %3654 = vmatpush.msra.mxu2 %v3716_v49 }
 0x41b   : > { %1033 = vmatpush.msrb.mxu0 %v3717_v54  ;;  %3655 = vmatpush.msra.mxu2 %v3717_v54 }
 0x41d   : > { %1034 = vmatpush.msrb.mxu0 %v994_v45  ;;  %3656 = vmatpush.msra.mxu2 %v994_v45 }
 0x41e   : > { %v1524_v58 = vpop.permute.xlu1 %1523  ;;  %3470 = vmatmul.msk.f32.vlgmr.msrb.gmra.mxu0 %vm943_vm0, %v985_v56  ;;  %3471 = vmatmul.msk.f32.vlgmr.msra.gmra.mxu2 %vm943_vm0, %v986_v57  ;;  %v1516_v19 = vpop.permute.xlu2 %1515 }
 0x41f   : > { %3512 = vmatpush.xpose.msk.msrb.mxu1 %vm885_vm15, %v1524_v58 }
 0x426   : > { %v1522_v53 = vpop.permute.xlu1 %1521  ;;  %3472 = vmatmul.msk.f32.gmra.mxu2 %vm943_vm0, %v987_v61  ;;  %v1310_v24 = vpop.permute.xlu2 %1309 }
 0x427   : > { %3513 = vmatpush.xpose.msk.msrb.mxu1 %vm885_vm15, %v1522_v53  ;;  %1967 = vadd.xlane.f32.xlu0 %v1966_v63 }
 0x42e   : > { %v1520_v0 = vpop.permute.xlu1 %1519  ;;  %1958 = vadd.xlane.f32.xlu1 %v1957_v28  ;;  %v1306_v30 = vpop.permute.xlu2 %1305 }
 0x42f   : > { %3514 = vmatpush.xpose.msk.msrb.mxu1 %vm885_vm15, %v1520_v0 }
 0x434   : > { %v980_v2 = vpop.xlane.xlu0 %979 }
 0x435   : > { %3787 = vrcp.f32 %v980_v2 }
 0x436   : > { %v1518_v5 = vpop.permute.xlu1 %1517  ;;  %v1302_v34 = vpop.permute.xlu2 %1301 }
 0x437   : > { %3515 = vmatpush.xpose.msk.msrb.mxu1 %vm885_vm15, %v1518_v5 }
 0x43b   : > { %v3788_v6 = vpop.eup %3787  ;;  %3719 = vrot.lane.b32.xlu0 %v4391_v55, %s4075_s26 }
 0x43c   : > { %v988_v7 = vmul.f32 %v3788_v6, %v4480_v43 }
 0x43e   : > { %v1061_v9 = vpop.permute.xlu1 %1060  ;;  %3473 = vmatmul.msk.f32.gmra.mxu2 %vm943_vm0, %v988_v7 }
 0x446   : > { %v1512_v11 = vpop.permute.xlu1 %1511 }
 0x447   : > { %v1063_v12 = vpop.permute.xlu0 %1062 }
 0x448   : > { %3474 = vmatpush.xpose.msk.msrb.mxu3 %vm885_vm15, %v1063_v12 }
 0x44c   : > { %3475 = vmatpush.xpose.msk.msrb.mxu3 %vm885_vm15, %v1061_v9 }
 0x44e   : > { %v1059_v17 = vpop.permute.xlu1 %1058 }
 0x44f   : > { %v1057_v18 = vpop.permute.xlu0 %1056 }
 0x450   : > { %3476 = vmatpush.xpose.msk.msrb.mxu3 %vm885_vm15, %v1059_v17 }
 0x454   : > { %3477 = vmatpush.xpose.msk.msrb.mxu3 %vm885_vm15, %v1057_v18 }
 0x456   : > { %v1514_v21 = vpop.permute.xlu1 %1513 }
 0x457   : > { %v1051_v4 = vpop.permute.xlu0 %1050  ;;  %3478 = vmatmul.msk.f32.vlgmr.msrb.gmra.mxu3 %vm885_vm15, %v1049_v16 }
 0x45e   : > { %v1053_v25 = vpop.permute.xlu1 %1052 }
 0x45f   : > { %v1312_v23 = vpop.permute.xlu0 %1311  ;;  %3479 = vmatmul.msk.f32.gmra.mxu3 %vm885_vm15, %v1051_v4 }
 0x460   : > { %3495 = vmatpush.xpose.msk.msra.mxu3 %vm885_vm15, %v1312_v23 }
 0x464   : > { %3496 = vmatpush.xpose.msk.msra.mxu3 %vm885_vm15, %v1310_v24 }
 0x466   : > { %v1055_v31 = vpop.permute.xlu1 %1054 }
 0x467   : > { %v1308_v26 = vpop.permute.xlu0 %1307  ;;  %3480 = vmatmul.msk.f32.gmra.mxu3 %vm885_vm15, %v1053_v25 }
 0x468   : > { %3497 = vmatpush.xpose.msk.msra.mxu3 %vm885_vm15, %v1308_v26 }
 0x46c   : > { %3498 = vmatpush.xpose.msk.msra.mxu3 %vm885_vm15, %v1306_v30 }
 0x46e   : > { %v1298_v32 = vpop.permute.xlu1 %1297 }
 0x46f   : > { %3481 = vmatmul.msk.f32.gmra.mxu3 %vm885_vm15, %v1055_v31  ;;  %v1300_v33 = vpop.permute.xlu0 %1299  ;;  %v1962_v23 = vpop.xlane.xlu2 %1961 }
 0x470   : > { %v1970_v24 = vmul.f32 %v1962_v23, %v4306_v62 }
 0x472   : > { %v4625_v26 = vsub.f32 %v4557_v36, %v1970_v24 }
 0x474   : > { %v1978_v28 = vmul.f32 %v4625_v26, %v4625_v26 }
 0x476   : > { %v1304_v35 = vpop.permute.xlu1 %1303 }
 0x477   : > { %3499 = vmatmul.msk.f32.vlgmr.msra.gmra.mxu3 %vm885_vm15, %v1298_v32  ;;  %v1984_v32 = vsel %vm683_vm4, %v1978_v28, 0.0 }
 0x47f   : > { %3500 = vmatmul.msk.f32.gmra.mxu3 %vm885_vm15, %v1300_v33 }
 0x487   : > { %3501 = vmatmul.msk.f32.gmra.mxu3 %vm885_vm15, %v1302_v34 }
 0x48f   : > { %3502 = vmatmul.msk.f32.gmra.mxu3 %vm885_vm15, %v1304_v35 }
 0x49b   : > { %v1036_v38 = vpop.f32.mrf.mxu0 }
 0x49c   : > { %3491 = vmatmul.msk.f32.vlgmr.msra.gmra.mxu1 %vm885_vm15, %v1036_v38 }
 0x4a1   : > { %v1039_v39 = vpop.f32.mrf.mxu2  ;;  %v1959_v59 = vpop.xlane.xlu1 %1958 }
 0x4a2   : > { %v1969_v63 = vmul.f32 %v1959_v59, %v4306_v62 }
 0x4a4   : > { %3492 = vmatmul.msk.f32.gmra.mxu1 %vm885_vm15, %v1039_v39  ;;  %v4595_v2 = vsub.f32 %v1932_v27, %v1969_v63  ;;  %v1965_v27 = vpop.xlane.xlu2 %1964  ;;  %v1968_v39 = vpop.xlane.xlu0 %1967 }
 0x4a5   : > { %v1971_v30 = vmul.f32 %v1965_v27, %v4306_v62  ;;  %v1972_v42 = vmul.f32 %v1968_v39, %v4306_v62 }
 0x4a6   : > { %v1977_v7 = vmul.f32 %v4595_v2, %v4595_v2 }
 0x4a7   : > { %v4634_v33 = vsub.f32 %v4563_v41, %v1971_v30  ;;  %v4646_v41 = vsub.f32 %v4528_v60, %v1972_v42 }
 0x4a9   : > { %v1042_v13 = vpop.f32.mrf.mxu2  ;;  %v1979_v34 = vmul.f32 %v4634_v33, %v4634_v33 }
 0x4ab   : > { %v1987_v37 = vsel %vm683_vm4, %v1979_v34, 0.0 }
 0x4ac   : > { %3493 = vmatmul.msk.f32.gmra.mxu1 %vm885_vm15, %v1042_v13 }
 0x4c1   : > { %v1045_v43 = vpop.f32.mrf.mxu2 }
 0x4c2   : > { %3494 = vmatmul.msk.f32.gmra.mxu1 %vm885_vm15, %v1045_v43 }
 0x4ca   : > { %3516 = vmatmul.msk.f32.vlgmr.msrb.gmra.mxu1 %vm885_vm15, %v1510_v10 }
 0x4d2   : > { %3517 = vmatmul.msk.f32.gmra.mxu1 %vm885_vm15, %v1512_v11  ;;  %v1981_v11 = vsel %vm683_vm4, %v1977_v7, 0.0 }
 0x4da   : > { %v1097_v44 = vpop.f32.mrf.mxu3  ;;  %3518 = vmatmul.msk.f32.gmra.mxu1 %vm885_vm15, %v1514_v21 }
 0x4db   : > { %v1109_v3 = vmul.f32 0.35355338, %v1097_v44 }
 0x4dd   : > { %v4574_v46 = vadd.f32 %v1109_v3, %v4418_v1  ;;  %v1980_v3 = vmul.f32 %v4646_v41, %v4646_v41 }
 0x4df   : > { %v1117_v14 = vsel %vm943_vm0, %v4574_v46, -inf }
 0x4e0   : > { %1118 = vmax.xlane.f32.xlu1 %v1117_v14 }
 0x4e2   : > { %v1100_v47 = vpop.f32.mrf.mxu3  ;;  %3519 = vmatmul.msk.f32.gmra.mxu1 %vm885_vm15, %v1516_v19 }
 0x4e3   : > { %v1110_v45 = vmul.f32 0.35355338, %v1100_v47 }
 0x4e5   : > { %v4580_v48 = vadd.f32 %v1110_v45, %v4425_v8  ;;  %v1990_v45 = vsel %vm693_vm3, %v1980_v3, 0.0 }
 0x4e7   : > { %v1120_v49 = vsel %vm943_vm0, %v4580_v48, -inf }
 0x4e8   : > { %1121 = vmax.xlane.f32.xlu1 %v1120_v49 }
 0x4ea   : > { %v1103_v50 = vpop.f32.mrf.mxu3 }
 0x4eb   : > { %v1111_v51 = vmul.f32 0.35355338, %v1103_v50 }
 0x4ed   : > { %v4585_v52 = vadd.f32 %v1111_v51, %v4432_v15 }
 0x4ef   : > { %v1123_v54 = vsel %vm943_vm0, %v4585_v52, -inf }
 0x4f0   : > { %1124 = vmax.xlane.f32.xlu2 %v1123_v54 }
 0x4f2   : > { %v1106_v56 = vpop.f32.mrf.mxu3 }
 0x4f3   : > { %v1112_v57 = vmul.f32 0.35355338, %v1106_v56 }
 0x4f5   : > { %v4590_v58 = vadd.f32 %v1112_v57, %v4439_v20 }
 0x4f7   : > { %v1126_v61 = vsel %vm953_vm1, %v4590_v58, -inf }
 0x4f8   : > { %1127 = vmax.xlane.f32.xlu1 %v1126_v61 }
 0x4fa   : > { %v1346_v53 = vpop.f32.mrf.mxu3 }
 0x4fb   : > { %v1358_v0 = vmul.f32 0.35355338, %v1346_v53 }
 0x4fd   : > { %v4598_v5 = vadd.f32 %v1358_v0, %v4418_v1 }
 0x4ff   : > { %v1366_v6 = vsel %vm943_vm0, %v4598_v5, -inf }
 0x500   : > { %1367 = vmax.xlane.f32.xlu2 %v1366_v6 }
 0x502   : > { %v1349_v9 = vpop.f32.mrf.mxu3 }
 0x503   : > { %v1359_v10 = vmul.f32 0.35355338, %v1349_v9 }
 0x505   : > { %v4606_v12 = vadd.f32 %v1359_v10, %v4425_v8 }
 0x507   : > { %v1369_v16 = vsel %vm943_vm0, %v4606_v12, -inf }
 0x508   : > { %1982 = vadd.xlane.f32.xlu2 %v1981_v11  ;;  %1370 = vmax.xlane.f32.xlu0 %v1369_v16 }
 0x50a   : > { %v1352_v17 = vpop.f32.mrf.mxu3 }
 0x50b   : > { %v1360_v18 = vmul.f32 0.35355338, %v1352_v17 }
 0x50d   : > { %v4611_v19 = vadd.f32 %v1360_v18, %v4432_v15 }
 0x50f   : > { %v1372_v4 = vsel %vm943_vm0, %v4611_v19, -inf }
 0x510   : > { %1373 = vmax.xlane.f32.xlu0 %v1372_v4 }
 0x511   : > { %1628 = vrot.lane.b32.xlu1 %v4462_v40, %s4075_s26 }
 0x512   : > { %v1355_v35 = vpop.f32.mrf.mxu3 }
 0x513   : > { %v1361_v38 = vmul.f32 0.35355338, %v1355_v35 }
 0x515   : > { %v4643_v13 = vadd.f32 %v1361_v38, %v4439_v20 }
 0x517   : > { %v1375_v44 = vsel %vm953_vm1, %v4643_v13, -inf }
 0x519   : > { %v4619_v21 = vpop.f32.mrf.mxu1 }
 0x520   : > { %1622 = vrot.lane.b32.xlu2 %v4443_v22, %s4075_s26 }
 0x521   : > { %v4622_v25 = vpop.f32.mrf.mxu1 }
 0x529   : > { %v4630_v31 = vpop.f32.mrf.mxu1 }
 0x53b   : > { %1985 = vadd.xlane.f32.xlu1 %v1984_v32  ;;  %v3720_v32 = vpop.permute.xlu0 %3719 }
 0x53c   : > { %v3722_v39 = vunpack.i.h.bf16 %v3720_v32 }
 0x53f   : > { %v4638_v36 = vpop.f32.mrf.mxu1 }
 0x543   : > { %1988 = vadd.xlane.f32.xlu1 %v1987_v37  ;;  %v3721_v37 = vunpack.i.l.bf16 %v3720_v32 }
 0x547   : > { %v1558_v43 = vpop.f32.mrf.mxu1 }
 0x548   : > { %v1570_v63 = vmul.f32 0.35355338, %v1558_v43 }
 0x54a   : > { %v4665_v0 = vadd.f32 %v1570_v63, %v4418_v1 }
 0x54b   : > { %1376 = vmax.xlane.f32.xlu1 %v1375_v44 }
 0x54c   : > { %v1578_v10 = vsel %vm943_vm0, %v4665_v0, -inf }
 0x54f   : > { %v1561_v14 = vpop.f32.mrf.mxu1 }
 0x550   : > { %v1571_v47 = vmul.f32 0.35355338, %v1561_v14 }
 0x552   : > { %v4654_v49 = vadd.f32 %v1571_v47, %v4425_v8 }
 0x553   : > { %v1119_v50 = vpop.xlane.xlu1 %1118  ;;  %1991 = vadd.xlane.f32.xlu1 %v1990_v45 }
 0x554   : > { %v1129_v51 = vsub.f32 %v4574_v46, %v1119_v50  ;;  %v1581_v60 = vsel %vm943_vm0, %v4654_v49, -inf }
 0x555   : > { %1582 = vmax.xlane.f32.xlu2 %v1581_v60 }
 0x556   : > { %v1133_v54 = vmul.f32 1.442695, %v1129_v51  ;;  %v4701_v51 = vld [vmem:[%s4247_s18 + $0x10] sm:$0xff] }
 0x557   : > { %v1564_v53 = vpop.f32.mrf.mxu1 }
 0x558   : > { %3789 = vpow2.f32 %v1133_v54  ;;  %v4704_v54 = vperm.slane %v4701_v51, 0 }
 0x55b   : > { %v1122_v56 = vpop.xlane.xlu1 %1121 }
 0x55c   : > { %v1130_v57 = vsub.f32 %v4580_v48, %v1122_v56  ;;  %v1572_v48 = vmul.f32 0.35355338, %v1564_v53  ;;  %v2054_v56 = vmul.f32 %v4704_v54, %v4595_v2 }
 0x55e   : > { %v4660_v59 = vpop.eup %3789  ;;  %v1135_v61 = vmul.f32 1.442695, %v1130_v57  ;;  %v4675_v16 = vadd.f32 %v1572_v48, %v4432_v15 }
 0x55f   : > { %v1141_v8 = vsel %vm943_vm0, %v4660_v59, 0.0  ;;  %v1567_v1 = vpop.f32.mrf.mxu1 }
 0x560   : > { %3791 = vpow2.f32 %v1135_v61  ;;  %1142 = vadd.xlane.f32.xlu0 %v1141_v8  ;;  %v1573_v17 = vmul.f32 0.35355338, %v1567_v1  ;;  %v1584_v18 = vsel %vm943_vm0, %v4675_v16, -inf }
 0x562   : > { %v4688_v15 = vadd.f32 %v1573_v17, %v4439_v20 }
 0x563   : > { %v1125_v46 = vpop.xlane.xlu2 %1124 }
 0x564   : > { %v1131_v6 = vsub.f32 %v4585_v52, %v1125_v46  ;;  %v1587_v24 = vsel %vm953_vm1, %v4688_v15, -inf }
 0x566   : > { %v4668_v7 = vpop.eup %3791  ;;  %v1137_v9 = vmul.f32 1.442695, %v1131_v6 }
 0x567   : > { %v1144_v11 = vsel %vm943_vm0, %v4668_v7, 0.0 }
 0x568   : > { %3793 = vpow2.f32 %v1137_v9  ;;  %1579 = vmax.xlane.f32.xlu0 %v1578_v10  ;;  %1145 = vadd.xlane.f32.xlu1 %v1144_v11 }
 0x56b   : > { %v4692_v27 = vpop.xlane.xlu1 %1127 }
 0x56d   : > { %3724 = vrot.lane.b32.xlu2 %v4391_v55, %s4076_s27 }
 0x56e   : > { %v4679_v52 = vpop.eup %3793 }
 0x56f   : > { %v1147_v4 = vsel %vm943_vm0, %v4679_v52, 0.0 }
 0x570   : > { %1585 = vmax.xlane.f32.xlu0 %v1584_v18  ;;  %1148 = vadd.xlane.f32.xlu1 %v1147_v4 }
 0x573   : > { %v4685_v23 = vpop.xlane.xlu2 %1367 }
 0x578   : > { %1588 = vmax.xlane.f32.xlu0 %v1587_v24 }
 0x57b   : > { %v1983_v28 = vpop.xlane.xlu2 %1982  ;;  %v4712_v2 = vpop.xlane.xlu0 %1370 }
 0x57c   : > { %v1993_v30 = vmul.f32 %v1983_v28, %v4336_v29 }
 0x57e   : > { %3795 = vrsqrt.f32 %v1993_v30  ;;  %vm2004_vm5 = vcmp.eq.f32.partialorder %v1993_v30, inf  ;;  %v2007_v14 = vand.u32 2147483648, %v1993_v30  ;;  %vm2006_vm6 = vcmp.eq.f32.partialorder %v1993_v30, 0.0 }
 0x583   : > { %v1629_v34 = vpop.permute.xlu1 %1628  ;;  %v1623_v43 = vpop.permute.xlu2 %1622 }
 0x584   : > { %v3796_v35 = vpop.eup %3795  ;;  %3520 = vmatpush.msk.msrb.mxu3 %vm1016_vm2, %v1629_v34 }
 0x585   : > { %v1998_v38 = vmul.f32 %v3796_v35, %v1993_v30 }
 0x586   : > { %1660 = vmatpush.msrb.mxu3 %v3721_v37 }
 0x587   : > { %v1999_v20 = vmul.f32 %v3796_v35, %v1998_v38 }
 0x588   : > { %1661 = vmatpush.msrb.mxu3 %v3722_v39 }
 0x589   : > { %v2000_v42 = vmul.f32 0.5, %v1999_v20  ;;  %1416 = vrot.lane.b32.xlu1 %v4462_v40, %s4077_s28 }
 0x58a   : > { %1662 = vmatpush.msrb.mxu3 %v1623_v43  ;;  %v1374_v43 = vpop.xlane.xlu0 %1373 }
 0x58b   : > { %v2001_v44 = vsub.f32 1.5, %v2000_v42 }
 0x58c   : > { %1167 = vrot.lane.b32.xlu0 %v4462_v40, %s4076_s27 }
 0x58d   : > { %v2002_v3 = vmul.f32 %v3796_v35, %v2001_v44 }
 0x58f   : > { %v2003_v47 = vmul.f32 %v2002_v3, %v1993_v30 }
 0x591   : > { %v2005_v45 = vsel %vm2004_vm5, %v1993_v30, %v2003_v47 }
 0x592   : > { %v2008_v50 = vsel %vm2006_vm6, %v2007_v14, %v2005_v45  ;;  %v2055_v14 = vmul.f32 %v4704_v54, %v4625_v26 }
 0x593   : > { %v2045_v60 = vadd.f32 1e-06, %v2008_v50 }
 0x595   : > { %3797 = vrcp.f32 %v2045_v60 }
 0x59b   : > { %v3798_v57 = vpop.eup %3797 }
 0x59c   : > { %v4708_v61 = vmul.f32 %v3798_v57, %v2054_v56 }
 0x5ae   : > { %v1986_v40 = vpop.xlane.xlu1 %1985 }
 0x5af   : > { %v1994_v63 = vmul.f32 %v1986_v40, %v4336_v29  ;;  %v2056_v40 = vmul.f32 %v4704_v54, %v4634_v33 }
 0x5b1   : > { %3799 = vrsqrt.f32 %v1994_v63  ;;  %vm2016_vm7 = vcmp.eq.f32.partialorder %v1994_v63, inf  ;;  %v2019_v18 = vand.u32 2147483648, %v1994_v63  ;;  %vm2018_vm8 = vcmp.eq.f32.partialorder %v1994_v63, 0.0 }
 0x5b6   : > { %v1989_v8 = vpop.xlane.xlu1 %1988 }
 0x5b7   : > { %v3800_v53 = vpop.eup %3799  ;;  %v1995_v46 = vmul.f32 %v1989_v8, %v4336_v29 }
 0x5b8   : > { %v2010_v6 = vmul.f32 %v3800_v53, %v1994_v63 }
 0x5b9   : > { %3801 = vrsqrt.f32 %v1995_v46  ;;  %vm2028_vm9 = vcmp.eq.f32.partialorder %v1995_v46, inf  ;;  %v2031_v20 = vand.u32 2147483648, %v1995_v46  ;;  %vm2030_vm10 = vcmp.eq.f32.partialorder %v1995_v46, 0.0 }
 0x5ba   : > { %v2011_v9 = vmul.f32 %v3800_v53, %v2010_v6 }
 0x5bc   : > { %v2012_v48 = vmul.f32 0.5, %v2011_v9 }
 0x5be   : > { %v2013_v10 = vsub.f32 1.5, %v2012_v48 }
 0x5bf   : > { %v3802_v11 = vpop.eup %3801 }
 0x5c0   : > { %v2022_v1 = vmul.f32 %v3802_v11, %v1995_v46  ;;  %v2014_v17 = vmul.f32 %v3800_v53, %v2013_v10  ;;  %v1378_v10 = vsub.f32 %v4598_v5, %v4685_v23 }
 0x5c2   : > { %v2015_v4 = vmul.f32 %v2014_v17, %v1994_v63  ;;  %v2023_v24 = vmul.f32 %v3802_v11, %v2022_v1  ;;  %v1382_v1 = vmul.f32 1.442695, %v1378_v10 }
 0x5c4   : > { %v2017_v28 = vsel %vm2016_vm7, %v1994_v63, %v2015_v4  ;;  %v2024_v30 = vmul.f32 0.5, %v2023_v24 }
 0x5c5   : > { %v2020_v32 = vsel %vm2018_vm8, %v2019_v18, %v2017_v28 }
 0x5c6   : > { %v2046_v34 = vadd.f32 1e-06, %v2020_v32  ;;  %v2025_v35 = vsub.f32 1.5, %v2024_v30 }
 0x5c8   : > { %v1583_v37 = vpop.xlane.xlu2 %1582  ;;  %3803 = vrcp.f32 %v2046_v34  ;;  %v2026_v38 = vmul.f32 %v3802_v11, %v2025_v35  ;;  %v1132_v35 = vsub.f32 %v4590_v58, %v4692_v27  ;;  %v1379_v58 = vsub.f32 %v4606_v12, %v4712_v2 }
 0x5c9   : > { %v1591_v39 = vsub.f32 %v4654_v49, %v1583_v37 }
 0x5ca   : > { %v2027_v42 = vmul.f32 %v2026_v38, %v1995_v46  ;;  %v1139_v37 = vmul.f32 1.442695, %v1132_v35  ;;  %v1380_v38 = vsub.f32 %v4611_v19, %v1374_v43  ;;  %v1384_v19 = vmul.f32 1.442695, %v1379_v58 }
 0x5cb   : > { %v1596_v44 = vmul.f32 1.442695, %v1591_v39 }
 0x5cc   : > { %v2029_v3 = vsel %vm2028_vm9, %v1995_v46, %v2027_v42  ;;  %v1386_v39 = vmul.f32 1.442695, %v1380_v38 }
 0x5cd   : > { %3805 = vpow2.f32 %v1596_v44  ;;  %v2032_v47 = vsel %vm2030_vm10, %v2031_v20, %v2029_v3  ;;  %v1377_v20 = vpop.xlane.xlu1 %1376 }
 0x5ce   : > { %v3804_v45 = vpop.eup %3803  ;;  %v2047_v50 = vadd.f32 1e-06, %v2032_v47  ;;  %v1381_v44 = vsub.f32 %v4643_v13, %v1377_v20  ;;  %v3542_v47 = vld [vmem:[%s4249_s19 + $0x38] sm:$0xff] }
 0x5cf   : > { %v4717_v60 = vmul.f32 %v3804_v45, %v2055_v14  ;;  %2091 = vmatpush.msra.mxu3 %v3542_v47 }
 0x5d0   : > { %3807 = vrcp.f32 %v2047_v50  ;;  %v3541_v50 = vld [vmem:[%s4249_s19 + $0x30] sm:$0xff] }
 0x5d1   : > { %2092 = vmatpush.msra.mxu3 %v3541_v50 }
 0x5d3   : > { %v4719_v56 = vpop.eup %3805  ;;  %v4721_v49 = vpop.xlane.xlu0 %1142 }
 0x5d4   : > { %v1605_v57 = vsel %vm943_vm0, %v4719_v56, 0.0 }
 0x5d5   : > { %1606 = vadd.xlane.f32.xlu2 %v1605_v57  ;;  %v1992_v2 = vpop.xlane.xlu1 %1991 }
 0x5d6   : > { %v3808_v63 = vpop.eup %3807 }
 0x5d7   : > { %v4727_v26 = vmul.f32 %v3808_v63, %v2056_v40  ;;  %v4782_v40 = vmul.f32 %v1992_v2, %v4336_v29 }
 0x5d9   : > { %vm2040_vm11 = vcmp.eq.f32.partialorder %v4782_v40, inf  ;;  %v2043_v58 = vand.u32 2147483648, %v4782_v40  ;;  %vm2042_vm12 = vcmp.eq.f32.partialorder %v4782_v40, 0.0 }
 0x5db   : > { %v1580_v8 = vpop.xlane.xlu0 %1579 }
 0x5dc   : > { %v1590_v53 = vsub.f32 %v4665_v0, %v1580_v8 }
 0x5dd   : > { %v1146_v45 = vpop.xlane.xlu1 %1145 }
 0x5de   : > { %v1594_v46 = vmul.f32 1.442695, %v1590_v53  ;;  %v3540_v53 = vld [vmem:[%s4249_s19 + $0x28] sm:$0xff] }
 0x5df   : > { %2093 = vmatpush.msra.mxu3 %v3540_v53 }
 0x5e0   : > { %3809 = vpow2.f32 %v1594_v46 }
 0x5e3   : > { %v1586_v6 = vpop.xlane.xlu0 %1585 }
 0x5e4   : > { %v1592_v9 = vsub.f32 %v4675_v16, %v1586_v6 }
 0x5e5   : > { %v1149_v63 = vpop.xlane.xlu1 %1148 }
 0x5e6   : > { %v4731_v48 = vpop.eup %3809  ;;  %v1598_v11 = vmul.f32 1.442695, %v1592_v9  ;;  %v3539_v9 = vld [vmem:[%s4249_s19 + $0x20] sm:$0xff] }
 0x5e7   : > { %v1602_v33 = vsel %vm943_vm0, %v4731_v48, 0.0  ;;  %2094 = vmatpush.msra.mxu3 %v3539_v9 }
 0x5e8   : > { %3811 = vpow2.f32 %v1598_v11  ;;  %1603 = vadd.xlane.f32.xlu0 %v1602_v33 }
 0x5e9   : > { %3813 = vpow2.f32 %v1382_v1 }
 0x5eb   : > { %v1589_v17 = vpop.xlane.xlu0 %1588 }
 0x5ec   : > { %v1593_v0 = vsub.f32 %v4688_v15, %v1589_v17  ;;  %v3725_v15 = vpop.permute.xlu2 %3724 }
 0x5ed   : > { %v3726_v32 = vunpack.i.l.bf16 %v3725_v15  ;;  %v3727_v34 = vunpack.i.h.bf16 %v3725_v15 }
 0x5ee   : > { %v4738_v18 = vpop.eup %3811  ;;  %v1600_v4 = vmul.f32 1.442695, %v1593_v0 }
 0x5ef   : > { %v1608_v16 = vsel %vm943_vm0, %v4738_v18, 0.0  ;;  %v4742_v5 = vpop.eup %3813 }
 0x5f0   : > { %3815 = vpow2.f32 %v1600_v4  ;;  %1609 = vadd.xlane.f32.xlu2 %v1608_v16  ;;  %v1390_v28 = vsel %vm943_vm0, %v4742_v5, 0.0 }
 0x5f1   : > { %3817 = vpow2.f32 %v1139_v37 }
 0x5f2   : > { %3819 = vpow2.f32 %v1386_v39 }
 0x5f6   : > { %v4744_v23 = vpop.eup %3815 }
 0x5f7   : > { %v1611_v24 = vsel %vm953_vm1, %v4744_v23, 0.0  ;;  %v4760_v42 = vpop.eup %3817 }
 0x5f8   : > { %1612 = vadd.xlane.f32.xlu1 %v1611_v24  ;;  %1391 = vadd.xlane.f32.xlu2 %v1390_v28  ;;  %v4767_v27 = vpop.eup %3819 }
 0x5f9   : > { %v1396_v43 = vsel %vm943_vm0, %v4767_v27, 0.0 }
 0x5fb   : > { %v1417_v10 = vpop.permute.xlu1 %1416 }
 0x5fc   : > { %1161 = vrot.lane.b32.xlu0 %v4443_v22, %s4076_s27 }
 0x5fe   : > { %v1168_v30 = vpop.permute.xlu0 %1167 }
 0x5ff   : > { %3482 = vmatpush.msk.msra.mxu0 %vm1016_vm2, %v1168_v30 }
 0x601   : > { %1199 = vmatpush.msra.mxu0 %v3726_v32  ;;  %v2113_v32 = vperm.slane %v4701_v51, 5 }
 0x603   : > { %1200 = vmatpush.msra.mxu0 %v3727_v34 }
 0x610   : > { %1410 = vrot.lane.b32.xlu2 %v4443_v22, %s4077_s28  ;;  %v1150_v22 = vsel %vm953_vm1, %v4760_v42, 0.0 }
 0x611   : > { %3729 = vrot.lane.b32.xlu1 %v4391_v55, %s4077_s28  ;;  %v1388_v55 = vmul.f32 1.442695, %v1381_v44  ;;  %v2062_v44 = vperm.slane %v4701_v51, 1 }
 0x613   : > { %3821 = vpow2.f32 %v1388_v55  ;;  %v2063_v55 = vadd.f32 %v2062_v44, %v4708_v61  ;;  %v2064_v2 = vadd.f32 %v2062_v44, %v4717_v60  ;;  %v2065_v61 = vadd.f32 %v2062_v44, %v4727_v26 }
 0x614   : > { %3823 = vpow2.f32 %v1384_v19 }
 0x619   : > { %v4771_v13 = vpop.eup %3821 }
 0x61a   : > { %v1399_v3 = vsel %vm953_vm1, %v4771_v13, 0.0  ;;  %v4775_v14 = vpop.eup %3823 }
 0x61b   : > { %v1393_v12 = vsel %vm943_vm0, %v4775_v14, 0.0 }
 0x626   : > { %1151 = vadd.xlane.f32.xlu0 %v1150_v22 }
 0x62e   : > { %1397 = vadd.xlane.f32.xlu0 %v1396_v43 }
 0x636   : > { %1400 = vadd.xlane.f32.xlu0 %v1399_v3 }
 0x63b   : > { %1394 = vadd.xlane.f32.xlu1 %v1393_v12 }
 0x648   : > { %v1607_v8 = vpop.xlane.xlu2 %1606 }
 0x64a   : > { %2115 = vrot.lane.b32.xlu0 %v2113_v32, %s4066_s11 }
 0x65b   : > { %v1604_v57 = vpop.xlane.xlu0 %1603 }
 0x65c   : > { %3825 = vrcp.f32 %v1604_v57 }
 0x65d   : > { %3827 = vrcp.f32 %v1607_v8 }
 0x65e   : > { %3829 = vrsqrt.f32 %v4782_v40 }
 0x65f   : > { %3831 = vrcp.f32 %v4721_v49 }
 0x662   : > { %v3826_v46 = vpop.eup %3825 }
 0x663   : > { %v1618_v6 = vmul.f32 %v3826_v46, %v4731_v48  ;;  %v1610_v11 = vpop.xlane.xlu2 %1609  ;;  %v3828_v33 = vpop.eup %3827 }
 0x664   : > { %v3830_v1 = vpop.eup %3829  ;;  %3833 = vrcp.f32 %v1610_v11  ;;  %v1619_v0 = vmul.f32 %v3828_v33, %v4719_v56  ;;  %v674_v11 = vld [vmem:[%s4251_s22 + $0x18] sm:$0xff]  ;;  %v672_v33 = vld [vmem:[%s4251_s22 + $0x8] sm:$0xff] }
 0x665   : > { %3521 = vmatmul.msk.f32.vlgmr.msrb.gmra.mxu3 %vm943_vm0, %v1618_v6  ;;  %v3832_v17 = vpop.eup %3831  ;;  %v2034_v4 = vmul.f32 %v3830_v1, %v4782_v40  ;;  %3835 = vrcp.f32 %v1146_v45  ;;  %v2057_v45 = vmul.f32 %v4704_v54, %v4646_v41  ;;  %1242 = vmatpush.msrb.mxu2 %v672_v33 }
 0x666   : > { %v1157_v48 = vmul.f32 %v3832_v17, %v4660_v59 }
 0x667   : > { %v2035_v28 = vmul.f32 %v3830_v1, %v2034_v4 }
 0x669   : > { %v2036_v30 = vmul.f32 0.5, %v2035_v28 }
 0x66a   : > { %v3834_v24 = vpop.eup %3833 }
 0x66b   : > { %v1613_v49 = vpop.xlane.xlu1 %1612  ;;  %v3836_v15 = vpop.eup %3835  ;;  %v1620_v56 = vmul.f32 %v3834_v24, %v4738_v18  ;;  %v2037_v35 = vsub.f32 1.5, %v2036_v30 }
 0x66c   : > { %3837 = vrcp.f32 %v1613_v49  ;;  %v1158_v59 = vmul.f32 %v3836_v15, %v4668_v7  ;;  %v1392_v20 = vpop.xlane.xlu2 %1391  ;;  %v673_v49 = vld [vmem:[%s4251_s22 + $0x10] sm:$0xff] }
 0x66d   : > { %3522 = vmatmul.msk.f32.gmra.mxu3 %vm943_vm0, %v1619_v0  ;;  %3839 = vrcp.f32 %v1149_v63  ;;  %v2038_v39 = vmul.f32 %v3830_v1, %v2037_v35  ;;  %1491 = vmatpush.msra.mxu2 %v673_v49 }
 0x66e   : > { %v1162_v16 = vpop.permute.xlu0 %1161 }
 0x66f   : > { %1201 = vmatpush.msra.mxu0 %v1162_v16  ;;  %v2039_v7 = vmul.f32 %v2038_v39, %v4782_v40 }
 0x670   : > { %3483 = vmatmul.msk.f32.vlgmr.msra.gmra.mxu0 %vm943_vm0, %v1157_v48 }
 0x671   : > { %3503 = vmatpush.msk.msrb.mxu0 %vm1016_vm2, %v1417_v10  ;;  %v2041_v19 = vsel %vm2040_vm11, %v4782_v40, %v2039_v7 }
 0x672   : > { %v3838_v34 = vpop.eup %3837  ;;  %v2044_v43 = vsel %vm2042_vm12, %v2043_v58, %v2041_v19 }
 0x673   : > { %v3840_v37 = vpop.eup %3839  ;;  %v1621_v38 = vmul.f32 %v3838_v34, %v4744_v23  ;;  %v2048_v12 = vadd.f32 1e-06, %v2044_v43 }
 0x674   : > { %v1159_v18 = vmul.f32 %v3840_v37, %v4679_v52  ;;  %v1411_v3 = vpop.permute.xlu2 %1410 }
 0x675   : > { %3523 = vmatmul.msk.f32.gmra.mxu3 %vm943_vm0, %v1620_v56  ;;  %3841 = vrcp.f32 %v2048_v12 }
 0x678   : > { %3484 = vmatmul.msk.f32.gmra.mxu0 %vm943_vm0, %v1158_v59 }
 0x67b   : > { %v3842_v47 = vpop.eup %3841 }
 0x67c   : > { %v2061_v50 = vmul.f32 %v3842_v47, %v2057_v45 }
 0x67d   : > { %3524 = vmatmul.msk.f32.gmra.mxu3 %vm943_vm0, %v1621_v38 }
 0x67e   : > { %v2066_v40 = vadd.f32 %v2062_v44, %v2061_v50 }
 0x680   : > { %3485 = vmatmul.msk.f32.gmra.mxu0 %vm943_vm0, %v1159_v18 }
 0x683   : > { %v3730_v22 = vpop.permute.xlu1 %3729 }
 0x684   : > { %v3731_v23 = vunpack.i.l.bf16 %v3730_v22  ;;  %v3732_v52 = vunpack.i.h.bf16 %v3730_v22  ;;  %v2108_v22 = vperm.slane %v4701_v51, 4 }
 0x685   : > { %3555 = vmatmul.msk.f32.vlgmr.msra.gmra.mxu3 %vm683_vm4, %v2063_v55 }
 0x686   : > { %1448 = vmatpush.msrb.mxu0 %v3731_v23 }
 0x688   : > { %1449 = vmatpush.msrb.mxu0 %v3732_v52 }
 0x68a   : > { %1450 = vmatpush.msrb.mxu0 %v1411_v3 }
 0x68c   : > { %1703 = vmatpush.msra.mxu0 %v674_v11 }
 0x68d   : > { %3556 = vmatmul.msk.f32.gmra.mxu3 %vm683_vm4, %v2064_v2 }
 0x695   : > { %3557 = vmatmul.msk.f32.gmra.mxu3 %vm683_vm4, %v2065_v61 }
 0x699   : > { %v1152_v57 = vpop.xlane.xlu0 %1151 }
 0x69a   : > { %3843 = vrcp.f32 %v1152_v57  ;;  %v4901_v57 = vld [vmem:[%s4247_s18] sm:$0xff] }
 0x69b   : > { %3845 = vrcp.f32 %v1392_v20 }
 0x69d   : > { %3558 = vmatmul.msk.f32.gmra.mxu3 %vm683_vm4, %v2066_v40  ;;  %v1725_v40 = vperm.slane %v4901_v57, 7 }
 0x6a0   : > { %v3844_v63 = vpop.eup %3843 }
 0x6a1   : > { %v1160_v60 = vmul.f32 %v3844_v63, %v4760_v42  ;;  %v3846_v8 = vpop.eup %3845  ;;  %v1398_v54 = vpop.xlane.xlu0 %1397  ;;  %v3950_v63 = vld [vmem:[#allocation2] sm:$0xff] }
 0x6a2   : > { %v1406_v26 = vmul.f32 %v3846_v8, %v4742_v5 }
 0x6a3   : > { %3486 = vmatmul.msk.f32.gmra.mxu0 %vm943_vm0, %v1160_v60 }
 0x6a9   : > { %v1401_v6 = vpop.xlane.xlu0 %1400 }
 0x6ab   : > { %3504 = vmatmul.msk.f32.vlgmr.msrb.gmra.mxu0 %vm943_vm0, %v1406_v26 }
 0x6ae   : > { %v1395_v41 = vpop.xlane.xlu1 %1394 }
 0x6af   : > { %3847 = vrcp.f32 %v1395_v41 }
 0x6b0   : > { %3849 = vrcp.f32 %v1398_v54 }
 0x6b1   : > { %3851 = vrcp.f32 %v1401_v6  ;;  %v3951_v6 = vld [vmem:[#allocation2 + $0x8] sm:$0xff] }
 0x6b5   : > { %v3848_v53 = vpop.eup %3847 }
 0x6b6   : > { %v1407_v46 = vmul.f32 %v3848_v53, %v4775_v14  ;;  %v3850_v42 = vpop.eup %3849 }
 0x6b7   : > { %v1408_v9 = vmul.f32 %v3850_v42, %v4767_v27  ;;  %v3852_v5 = vpop.eup %3851 }
 0x6b8   : > { %3505 = vmatmul.msk.f32.gmra.mxu0 %vm943_vm0, %v1407_v46  ;;  %v1409_v10 = vmul.f32 %v3852_v5, %v4771_v13 }
 0x6bc   : > { %v2116_v48 = vpop.permute.xlu0 %2115 }
 0x6c0   : > { %3506 = vmatmul.msk.f32.gmra.mxu0 %vm943_vm0, %v1408_v9 }
 0x6c8   : > { %3507 = vmatmul.msk.f32.gmra.mxu0 %vm943_vm0, %v1409_v10 }
 0x6e8   : > { %v1664_v1 = vpop.f32.mrf.mxu3 }
 0x6e9   : > { %3525 = vmatmul.msk.f32.vlgmr.msra.gmra.mxu0 %vm885_vm15, %v1664_v1 }
 0x6ed   : > { %v1203_v14 = vpop.f32.mrf.mxu0 }
 0x6ee   : > { %3487 = vmatmul.msk.f32.vlgmr.msrb.gmra.mxu2 %vm885_vm15, %v1203_v14 }
 0x6f0   : > { %v1667_v17 = vpop.f32.mrf.mxu3 }
 0x6f1   : > { %3526 = vmatmul.msk.f32.gmra.mxu0 %vm885_vm15, %v1667_v17  ;;  %v3952_v17 = vld [vmem:[#allocation2 + $0x10] sm:$0xff] }
 0x6f5   : > { %v1206_v27 = vpop.f32.mrf.mxu0 }
 0x6f6   : > { %3488 = vmatmul.msk.f32.gmra.mxu2 %vm885_vm15, %v1206_v27 }
 0x6f8   : > { %v1670_v13 = vpop.f32.mrf.mxu3 }
 0x6f9   : > { %3527 = vmatmul.msk.f32.gmra.mxu0 %vm885_vm15, %v1670_v13 }
 0x6fd   : > { %v1209_v0 = vpop.f32.mrf.mxu0 }
 0x6fe   : > { %3489 = vmatmul.msk.f32.gmra.mxu2 %vm885_vm15, %v1209_v0 }
 0x700   : > { %v1673_v4 = vpop.f32.mrf.mxu3 }
 0x701   : > { %3528 = vmatmul.msk.f32.gmra.mxu0 %vm885_vm15, %v1673_v4 }
 0x708   : > { %v4840_v16 = vpop.f32.mrf.mxu3 }
 0x709   : > { %v4844_v24 = vadd.f32 %v2116_v48, %v4840_v16  ;;  %v4880_v58 = vadd.f32 %v2108_v22, %v4840_v16 }
 0x70b   : > { %2135 = vrot.lane.b32.xlu1 %v4844_v24, %s4067_s12 }
 0x710   : > { %v4848_v28 = vpop.f32.mrf.mxu3 }
 0x711   : > { %v4851_v15 = vadd.f32 %v2116_v48, %v4848_v28  ;;  %v4885_v19 = vadd.f32 %v2108_v22, %v4848_v28 }
 0x713   : > { %2137 = vrot.lane.b32.xlu0 %v4851_v15, %s4067_s12 }
 0x718   : > { %v4855_v56 = vpop.f32.mrf.mxu3 }
 0x719   : > { %v4866_v35 = vadd.f32 %v2116_v48, %v4855_v56  ;;  %v4890_v43 = vadd.f32 %v2108_v22, %v4855_v56 }
 0x720   : > { %v1212_v30 = vpop.f32.mrf.mxu0  ;;  %v4857_v32 = vpop.f32.mrf.mxu3 }
 0x721   : > { %v4860_v59 = vadd.f32 %v2116_v48, %v4857_v32  ;;  %3490 = vmatmul.msk.f32.gmra.mxu2 %vm885_vm15, %v1212_v30  ;;  %v4895_v12 = vadd.f32 %v2108_v22, %v4857_v32  ;;  %v3953_v30 = vld [vmem:[#allocation2 + $0x18] sm:$0x3] }
 0x723   : > { %2141 = vrot.lane.b32.xlu2 %v4860_v59, %s4067_s12 }
 0x728   : > { %v1452_v34 = vpop.f32.mrf.mxu0 }
 0x729   : > { %3508 = vmatmul.msk.f32.vlgmr.msra.gmra.mxu2 %vm885_vm15, %v1452_v34 }
 0x72b   : > { %2139 = vrot.lane.b32.xlu2 %v4866_v35, %s4067_s12 }
 0x735   : > { %v1455_v37 = vpop.f32.mrf.mxu0 }
 0x736   : > { %3509 = vmatmul.msk.f32.gmra.mxu2 %vm885_vm15, %v1455_v37 }
 0x73d   : > { %v1458_v38 = vpop.f32.mrf.mxu0 }
 0x73e   : > { %3510 = vmatmul.msk.f32.gmra.mxu2 %vm885_vm15, %v1458_v38 }
 0x745   : > { %v1461_v39 = vpop.f32.mrf.mxu0 }
 0x746   : > { %3511 = vmatmul.msk.f32.gmra.mxu2 %vm885_vm15, %v1461_v39 }
 0x766   : > { %v1705_v47 = vpop.f32.mrf.mxu0 }
 0x76e   : > { %v1708_v41 = vpop.f32.mrf.mxu0 }
 0x771   : > { %v1244_v44 = vpop.f32.mrf.mxu2 }
 0x772   : > { %v1286_v2 = vadd.f32 %v4619_v21, %v1244_v44 }
 0x776   : > { %v1711_v10 = vpop.f32.mrf.mxu0 }
 0x779   : > { %v1247_v23 = vpop.f32.mrf.mxu2 }
 0x77a   : > { %v1289_v54 = vadd.f32 %v4622_v25, %v1247_v23 }
 0x77d   : > { %v2142_v18 = vpop.permute.xlu2 %2141  ;;  %v2136_v55 = vpop.permute.xlu1 %2135 }
 0x77e   : > { %3559 = vmatpush.xpose.msk.msrb.mxu0 %vm885_vm15, %v2142_v18  ;;  %v1714_v48 = vpop.f32.mrf.mxu0  ;;  %v4926_v18 = vld [vmem:[%s5511_s2] sm:$0xff] }
 0x781   : > { %v1250_v52 = vpop.f32.mrf.mxu2 }
 0x782   : > { %v1292_v9 = vadd.f32 %v4630_v31, %v1250_v52 }
 0x785   : > { %v2140_v20 = vpop.permute.xlu2 %2139  ;;  %v2138_v7 = vpop.permute.xlu0 %2137 }
 0x786   : > { %3560 = vmatpush.xpose.msk.msrb.mxu0 %vm885_vm15, %v2140_v20 }
 0x78a   : > { %3561 = vmatpush.xpose.msk.msrb.mxu0 %vm885_vm15, %v2138_v7 }
 0x78e   : > { %3562 = vmatpush.xpose.msk.msrb.mxu0 %vm885_vm15, %v2136_v55  ;;  %v4936_v55 = vld [vmem:[%s5511_s2 + $0x8] sm:$0xff] }
 0x791   : > { %3563 = vmatmul.msk.f32.vlgmr.msrb.gmra.mxu0 %vm885_vm15, %v4880_v58 }
 0x799   : > { %3564 = vmatmul.msk.f32.gmra.mxu0 %vm885_vm15, %v4885_v19 }
 0x7a1   : > { %3565 = vmatmul.msk.f32.gmra.mxu0 %vm885_vm15, %v4890_v43 }
 0x7a4   : > { %v1253_v3 = vpop.f32.mrf.mxu2 }
 0x7a5   : > { %v1295_v25 = vadd.f32 %v4638_v36, %v1253_v3 }
 0x7a9   : > { %3566 = vmatmul.msk.f32.gmra.mxu0 %vm885_vm15, %v4895_v12 }
 0x7ac   : > { %v1493_v61 = vpop.f32.mrf.mxu2 }
 0x7ad   : > { %v1505_v45 = vadd.f32 %v1493_v61, %v1286_v2  ;;  %v4943_v61 = vld [vmem:[%s5511_s2 + $0x10] sm:$0xff] }
 0x7af   : > { %v1717_v50 = vadd.f32 %v1705_v47, %v1505_v45 }
 0x7b1   : > { %v1721_v60 = vadd.f32 %v3950_v63, %v1717_v50 }
 0x7b3   : > { %v4904_v8 = vadd.f32 %v1725_v40, %v1721_v60  ;;  %v4953_v60 = vld [vmem:[%s5511_s2 + $0x18] sm:$0x3] }
 0x7b5   : > { %v1730_v26 = vsel %vm683_vm4, %v4904_v8, 0.0 }
 0x7b6   : > { %1731 = vadd.xlane.f32.xlu2 %v1730_v26 }
 0x7b9   : > { %v1496_v21 = vpop.f32.mrf.mxu2 }
 0x7ba   : > { %v1506_v53 = vadd.f32 %v1496_v21, %v1289_v54 }
 0x7bc   : > { %v1718_v46 = vadd.f32 %v1708_v41, %v1506_v53 }
 0x7be   : > { %v1722_v42 = vadd.f32 %v3951_v6, %v1718_v46  ;;  %v2122_v6 = vperm.slane %v4701_v51, 6 }
 0x7c0   : > { %v4910_v5 = vadd.f32 %v1725_v40, %v1722_v42 }
 0x7c1   : > { %v1499_v11 = vpop.f32.mrf.mxu2 }
 0x7c2   : > { %v1507_v33 = vadd.f32 %v1499_v11, %v1292_v9  ;;  %v1733_v1 = vsel %vm683_vm4, %v4910_v5, 0.0 }
 0x7c3   : > { %1734 = vadd.xlane.f32.xlu0 %v1733_v1 }
 0x7c4   : > { %v1719_v14 = vadd.f32 %v1711_v10, %v1507_v33 }
 0x7c6   : > { %v1723_v27 = vadd.f32 %v3952_v17, %v1719_v14 }
 0x7c8   : > { %v4915_v13 = vadd.f32 %v1725_v40, %v1723_v27 }
 0x7c9   : > { %v1502_v0 = vpop.f32.mrf.mxu2 }
 0x7ca   : > { %v1508_v4 = vadd.f32 %v1502_v0, %v1295_v25  ;;  %v1736_v31 = vsel %vm683_vm4, %v4915_v13, 0.0 }
 0x7cb   : > { %1737 = vadd.xlane.f32.xlu1 %v1736_v31 }
 0x7cc   : > { %v1720_v49 = vadd.f32 %v1714_v48, %v1508_v4 }
 0x7ce   : > { %v1724_v34 = vadd.f32 %v3953_v30, %v1720_v49 }
 0x7d0   : > { %v4919_v37 = vadd.f32 %v1725_v40, %v1724_v34 }
 0x7d2   : > { %v1739_v38 = vsel %vm693_vm3, %v4919_v37, 0.0 }
 0x7d3   : > { %1740 = vadd.xlane.f32.xlu2 %v1739_v38 }
 0x80e   : > { %v2180_v39 = vpop.f32.mrf.mxu0 }
 0x80f   : > { %v2192_v36 = vmul.f32 0.35355338, %v2180_v39 }
 0x811   : > { %v4929_v20 = vadd.f32 %v4926_v18, %v2192_v36 }
 0x813   : > { %v2200_v44 = vsel %vm943_vm0, %v4929_v20, -inf }
 0x814   : > { %2201 = vmax.xlane.f32.xlu2 %v2200_v44 }
 0x816   : > { %v2183_v7 = vpop.f32.mrf.mxu0 }
 0x817   : > { %v2193_v22 = vmul.f32 0.35355338, %v2183_v7 }
 0x819   : > { %v2197_v23 = vadd.f32 %v4936_v55, %v2193_v22 }
 0x81b   : > { %v2203_v52 = vsel %vm943_vm0, %v2197_v23, -inf }
 0x81c   : > { %2204 = vmax.xlane.f32.xlu2 %v2203_v52 }
 0x81e   : > { %v2186_v3 = vpop.f32.mrf.mxu0 }
 0x81f   : > { %v2194_v2 = vmul.f32 0.35355338, %v2186_v3  ;;  %v677_v3 = vld [vmem:[%s4251_s22 + $0x30] sm:$0xff] }
 0x821   : > { %v4946_v47 = vadd.f32 %v4943_v61, %v2194_v2  ;;  %v676_v2 = vld [vmem:[%s4251_s22 + $0x28] sm:$0xff] }
 0x823   : > { %v2206_v45 = vsel %vm943_vm0, %v4946_v47, -inf }
 0x824   : > { %2207 = vmax.xlane.f32.xlu1 %v2206_v45  ;;  %v675_v45 = vld [vmem:[%s4251_s22 + $0x20] sm:$0xff] }
 0x826   : > { %v2189_v50 = vpop.f32.mrf.mxu0 }
 0x827   : > { %v2195_v40 = vmul.f32 0.35355338, %v2189_v50 }
 0x829   : > { %v1732_v63 = vpop.xlane.xlu2 %1731  ;;  %v4956_v26 = vadd.f32 %v4953_v60, %v2195_v40 }
 0x82a   : > { %v1742_v41 = vmul.f32 %v1732_v63, %v4306_v62 }
 0x82b   : > { %v2209_v54 = vsel %vm953_vm1, %v4956_v26, -inf }
 0x82c   : > { %v4962_v21 = vsub.f32 %v4904_v8, %v1742_v41  ;;  %2210 = vmax.xlane.f32.xlu1 %v2209_v54 }
 0x82e   : > { %v1750_v53 = vmul.f32 %v4962_v21, %v4962_v21 }
 0x830   : > { %v1754_v46 = vsel %vm683_vm4, %v1750_v53, 0.0 }
 0x831   : > { %1755 = vadd.xlane.f32.xlu0 %v1754_v46 }
 0x834   : > { %2124 = vrot.lane.b32.xlu2 %v2122_v6, %s4068_s23 }
 0x836   : > { %v1735_v42 = vpop.xlane.xlu0 %1734 }
 0x837   : > { %v1743_v9 = vmul.f32 %v1735_v42, %v4306_v62 }
 0x839   : > { %v4971_v10 = vsub.f32 %v4910_v5, %v1743_v9 }
 0x83b   : > { %v1751_v11 = vmul.f32 %v4971_v10, %v4971_v10 }
 0x83d   : > { %v1757_v33 = vsel %vm683_vm4, %v1751_v11, 0.0 }
 0x83e   : > { %1758 = vadd.xlane.f32.xlu0 %v1757_v33  ;;  %v1738_v1 = vpop.xlane.xlu1 %1737 }
 0x83f   : > { %v1744_v14 = vmul.f32 %v1738_v1, %v4306_v62 }
 0x841   : > { %v4978_v51 = vsub.f32 %v4915_v13, %v1744_v14 }
 0x843   : > { %v1752_v17 = vmul.f32 %v4978_v51, %v4978_v51 }
 0x845   : > { %v1760_v27 = vsel %vm683_vm4, %v1752_v17, 0.0 }
 0x846   : > { %1761 = vadd.xlane.f32.xlu0 %v1760_v27  ;;  %v1741_v25 = vpop.xlane.xlu2 %1740 }
 0x847   : > { %v1745_v0 = vmul.f32 %v1741_v25, %v4306_v62 }
 0x849   : > { %v4985_v4 = vsub.f32 %v4919_v37, %v1745_v0 }
 0x84b   : > { %v1753_v31 = vmul.f32 %v4985_v4, %v4985_v4 }
 0x84d   : > { %v1763_v48 = vsel %vm693_vm3, %v1753_v31, 0.0 }
 0x84e   : > { %1764 = vadd.xlane.f32.xlu0 %v1763_v48 }
 0x887   : > { %v2202_v49 = vpop.xlane.xlu2 %2201 }
 0x888   : > { %v2212_v53 = vsub.f32 %v4929_v20, %v2202_v49 }
 0x88a   : > { %v2216_v11 = vmul.f32 1.442695, %v2212_v53 }
 0x88f   : > { %v2205_v30 = vpop.xlane.xlu2 %2204 }
 0x890   : > { %v2213_v34 = vsub.f32 %v2197_v23, %v2205_v30  ;;  %v5024_v30 = vperm.slane %v4901_v57, 2 }
 0x892   : > { %v2218_v38 = vmul.f32 1.442695, %v2213_v34 }
 0x894   : > { %3853 = vpow2.f32 %v2218_v38 }
 0x897   : > { %v4990_v39 = vpop.permute.xlu2 %2124  ;;  %v2208_v63 = vpop.xlane.xlu1 %2207 }
 0x898   : > { %v2128_v36 = vadd.f32 %v4990_v39, %v4848_v28  ;;  %v2129_v44 = vadd.f32 %v4990_v39, %v4855_v56  ;;  %v4998_v7 = vadd.f32 %v4990_v39, %v4857_v32  ;;  %v678_v28 = vld [vmem:[%s4251_s22 + $0x38] sm:$0xff]  ;;  %v2214_v42 = vsub.f32 %v4946_v47, %v2208_v63 }
 0x899   : > { %1865 = vmatpush.msrb.mxu2 %v678_v28 }
 0x89a   : > { %v5000_v22 = vpop.eup %3853  ;;  %v5002_v23 = vpack.i.bf16 %v2128_v36, %v2129_v44  ;;  %2254 = vrot.lane.b32.xlu1 %v4998_v7, %s4068_s23  ;;  %v2220_v1 = vmul.f32 1.442695, %v2214_v42 }
 0x89b   : > { %v2227_v52 = vsel %vm943_vm0, %v5000_v22, 0.0  ;;  %1866 = vmatpush.msrb.mxu2 %v677_v3 }
 0x89c   : > { %2228 = vadd.xlane.f32.xlu2 %v2227_v52  ;;  %3734 = vrot.lane.b32.xlu0 %v5002_v23, %s4068_s23 }
 0x89d   : > { %1867 = vmatpush.msrb.mxu2 %v676_v2  ;;  %v5034_v2 = vperm.slane %v4901_v57, 3 }
 0x89f   : > { %1868 = vmatpush.msrb.mxu2 %v675_v45 }
 0x8a4   : > { %v1756_v56 = vpop.xlane.xlu0 %1755 }
 0x8a5   : > { %v1766_v32 = vmul.f32 %v1756_v56, %v4336_v29 }
 0x8a7   : > { %3855 = vrsqrt.f32 %v1766_v32  ;;  %vm1777_vm13 = vcmp.eq.f32.partialorder %v1766_v32, inf  ;;  %v1780_v17 = vand.u32 2147483648, %v1766_v32  ;;  %vm1779_vm14 = vcmp.eq.f32.partialorder %v1766_v32, 0.0 }
 0x8ad   : > { %v3856_v50 = vpop.eup %3855 }
 0x8ae   : > { %v1771_v40 = vmul.f32 %v3856_v50, %v1766_v32 }
 0x8b0   : > { %v1772_v41 = vmul.f32 %v3856_v50, %v1771_v40 }
 0x8b1   : > { %v1759_v54 = vpop.xlane.xlu0 %1758 }
 0x8b2   : > { %v1773_v46 = vmul.f32 0.5, %v1772_v41  ;;  %v1767_v6 = vmul.f32 %v1759_v54, %v4336_v29 }
 0x8b4   : > { %v1774_v9 = vsub.f32 1.5, %v1773_v46  ;;  %3857 = vrsqrt.f32 %v1767_v6  ;;  %2316 = vrot.lane.b32.xlu2 %v4860_v59, %s4073_s25  ;;  %vm1789_vm5 = vcmp.eq.f32.partialorder %v1767_v6, inf  ;;  %v1792_v57 = vand.u32 2147483648, %v1767_v6 }
 0x8b5   : > { %3859 = vpow2.f32 %v2216_v11  ;;  %vm1791_vm6 = vcmp.eq.f32.partialorder %v1767_v6, 0.0 }
 0x8b6   : > { %v1775_v33 = vmul.f32 %v3856_v50, %v1774_v9  ;;  %3861 = vpow2.f32 %v2220_v1 }
 0x8b8   : > { %v1776_v14 = vmul.f32 %v1775_v33, %v1766_v32 }
 0x8b9   : > { %v1762_v27 = vpop.xlane.xlu0 %1761 }
 0x8ba   : > { %v3858_v25 = vpop.eup %3857  ;;  %v1768_v20 = vmul.f32 %v1762_v27, %v4336_v29  ;;  %v1778_v0 = vsel %vm1777_vm13, %v1766_v32, %v1776_v14  ;;  %v1827_v32 = vmul.f32 %v5024_v30, %v4962_v21 }
 0x8bb   : > { %v1783_v47 = vmul.f32 %v3858_v25, %v1767_v6  ;;  %v1781_v31 = vsel %vm1779_vm14, %v1780_v17, %v1778_v0  ;;  %v5026_v38 = vpop.eup %3859 }
 0x8bc   : > { %3863 = vrsqrt.f32 %v1768_v20  ;;  %2312 = vrot.lane.b32.xlu2 %v4851_v15, %s4073_s25  ;;  %v1818_v48 = vadd.f32 1e-06, %v1781_v31  ;;  %v5028_v36 = vpop.eup %3861  ;;  %v2224_v63 = vsel %vm943_vm0, %v5026_v38, 0.0  ;;  %vm1801_vm7 = vcmp.eq.f32.partialorder %v1768_v20, inf }
 0x8bd   : > { %v1784_v49 = vmul.f32 %v3858_v25, %v1783_v47  ;;  %v2230_v40 = vsel %vm943_vm0, %v5028_v36, 0.0  ;;  %v1804_v0 = vand.u32 2147483648, %v1768_v20  ;;  %vm1803_vm8 = vcmp.eq.f32.partialorder %v1768_v20, 0.0 }
 0x8be   : > { %3865 = vrcp.f32 %v1818_v48  ;;  %v1828_v31 = vmul.f32 %v5024_v30, %v4971_v10  ;;  %v1829_v10 = vmul.f32 %v5024_v30, %v4978_v51 }
 0x8bf   : > { %v1785_v34 = vmul.f32 0.5, %v1784_v49 }
 0x8c1   : > { %v1765_v44 = vpop.xlane.xlu0 %1764  ;;  %v1786_v52 = vsub.f32 1.5, %v1785_v34 }
 0x8c2   : > { %v3864_v28 = vpop.eup %3863  ;;  %v1769_v56 = vmul.f32 %v1765_v44, %v4336_v29 }
 0x8c3   : > { %v1795_v3 = vmul.f32 %v3864_v28, %v1768_v20  ;;  %v1787_v45 = vmul.f32 %v3858_v25, %v1786_v52 }
 0x8c4   : > { %v3866_v50 = vpop.eup %3865  ;;  %3867 = vrsqrt.f32 %v1769_v56  ;;  %2302 = vrot.lane.b32.xlu2 %v4880_v58, %s4071_s24  ;;  %2231 = vadd.xlane.f32.xlu1 %v2230_v40  ;;  %vm1813_vm9 = vcmp.eq.f32.partialorder %v1769_v56, inf  ;;  %vm1815_vm10 = vcmp.eq.f32.partialorder %v1769_v56, 0.0 }
 0x8c5   : > { %v1831_v41 = vmul.f32 %v3866_v50, %v1827_v32  ;;  %v1788_v54 = vmul.f32 %v1787_v45, %v1767_v6  ;;  %v1796_v21 = vmul.f32 %v3864_v28, %v1795_v3  ;;  %v5056_v50 = vadd.f32 %v4990_v39, %v4840_v16 }
 0x8c6   : > { %2225 = vadd.xlane.f32.xlu0 %v2224_v63  ;;  %v1830_v16 = vmul.f32 %v5024_v30, %v4985_v4  ;;  %v2211_v4 = vpop.xlane.xlu1 %2210  ;;  %v682_v30 = vld [vmem:[%s4251_s22 + $0x58] sm:$0xff] }
 0x8c7   : > { %v1836_v53 = vadd.f32 %v5034_v2, %v1831_v41  ;;  %v1790_v46 = vsel %vm1789_vm5, %v1767_v6, %v1788_v54  ;;  %v1797_v42 = vmul.f32 0.5, %v1796_v21  ;;  %1911 = vmatpush.msra.mxu1 %v682_v30  ;;  %vm3196_vm5 = vcmask 257024  }
 0x8c8   : > { %v1793_v9 = vsel %vm1791_vm6, %v1792_v57, %v1790_v46  ;;  %v681_v57 = vld [vmem:[%s4251_s22 + $0x50] sm:$0xff]  ;;  %v679_v46 = vld [vmem:[%s4251_s22 + $0x40] sm:$0xff]  ;;  %vm3203_vm6 = vcmask 261125  }
 0x8c9   : > { %3529 = vmatmul.msk.f32.vlgmr.msrb.gmra.mxu2 %vm683_vm4, %v1836_v53  ;;  %v1819_v11 = vadd.f32 1e-06, %v1793_v9  ;;  %v1798_v33 = vsub.f32 1.5, %v1797_v42  ;;  %v2215_v53 = vsub.f32 %v4956_v26, %v2211_v4  ;;  %1912 = vmatpush.msra.mxu1 %v681_v57 }
 0x8ca   : > { %v3868_v1 = vpop.eup %3867 }
 0x8cb   : > { %v1807_v14 = vmul.f32 %v3868_v1, %v1769_v56  ;;  %3869 = vrcp.f32 %v1819_v11  ;;  %v1799_v17 = vmul.f32 %v3864_v28, %v1798_v33 }
 0x8cc   : > { %2304 = vrot.lane.b32.xlu2 %v4885_v19, %s4071_s24 }
 0x8cd   : > { %v1800_v27 = vmul.f32 %v1799_v17, %v1768_v20  ;;  %v1808_v25 = vmul.f32 %v3868_v1, %v1807_v14 }
 0x8cf   : > { %v1802_v47 = vsel %vm1801_vm7, %v1768_v20, %v1800_v27  ;;  %v1809_v6 = vmul.f32 0.5, %v1808_v25  ;;  %v1816_v20 = vand.u32 2147483648, %v1769_v56  ;;  %vm3205_vm7 = vcmask 253952  }
 0x8d0   : > { %v1805_v48 = vsel %vm1803_vm8, %v1804_v0, %v1802_v47 }
 0x8d1   : > { %v3870_v49 = vpop.eup %3869  ;;  %v1820_v34 = vadd.f32 1e-06, %v1805_v48  ;;  %v1810_v44 = vsub.f32 1.5, %v1809_v6 }
 0x8d2   : > { %v1832_v52 = vmul.f32 %v3870_v49, %v1828_v31 }
 0x8d3   : > { %3871 = vrcp.f32 %v1820_v34  ;;  %v1811_v28 = vmul.f32 %v3868_v1, %v1810_v44  ;;  %v3543_v44 = vld [vmem:[%s4251_s22 + $0x60] sm:$0xff] }
 0x8d4   : > { %2565 = vrot.lane.b32.xlu2 %v4860_v59, %s4072_s15  ;;  %v1837_v32 = vadd.f32 %v5034_v2, %v1832_v52 }
 0x8d5   : > { %v1812_v3 = vmul.f32 %v1811_v28, %v1769_v56 }
 0x8d6   : > { %3530 = vmatmul.msk.f32.gmra.mxu2 %vm683_vm4, %v1837_v32 }
 0x8d7   : > { %v1814_v45 = vsel %vm1813_vm9, %v1769_v56, %v1812_v3 }
 0x8d8   : > { %v1817_v40 = vsel %vm1815_vm10, %v1816_v20, %v1814_v45 }
 0x8d9   : > { %v3872_v63 = vpop.eup %3871  ;;  %v1821_v41 = vadd.f32 1e-06, %v1817_v40 }
 0x8da   : > { %2248 = vrot.lane.b32.xlu0 %v5056_v50, %s4068_s23  ;;  %v1833_v54 = vmul.f32 %v3872_v63, %v1829_v10 }
 0x8db   : > { %3873 = vrcp.f32 %v1821_v41 }
 0x8dc   : > { %2773 = vrot.lane.b32.xlu2 %v4851_v15, %s4070_s30  ;;  %v1838_v56 = vadd.f32 %v5034_v2, %v1833_v54 }
 0x8dd   : > { %2314 = vrot.lane.b32.xlu1 %v4866_v35, %s4073_s25 }
 0x8de   : > { %3531 = vmatmul.msk.f32.gmra.mxu2 %vm683_vm4, %v1838_v56 }
 0x8e1   : > { %v3874_v51 = vpop.eup %3873 }
 0x8e2   : > { %v1834_v39 = vmul.f32 %v3874_v51, %v1830_v16 }
 0x8e4   : > { %2771 = vrot.lane.b32.xlu2 %v4844_v24, %s4070_s30  ;;  %v1839_v21 = vadd.f32 %v5034_v2, %v1834_v39  ;;  %v680_v2 = vld [vmem:[%s4251_s22 + $0x48] sm:$0xff] }
 0x8e5   : > { %2777 = vrot.lane.b32.xlu1 %v4860_v59, %s4070_s30  ;;  %1913 = vmatpush.msra.mxu1 %v680_v2  ;;  %v2222_v59 = vmul.f32 1.442695, %v2215_v53 }
 0x8e6   : > { %3532 = vmatmul.msk.f32.gmra.mxu2 %vm683_vm4, %v1839_v21 }
 0x8e7   : > { %1914 = vmatpush.msra.mxu1 %v679_v46  ;;  %3875 = vpow2.f32 %v2222_v59 }
 0x8ec   : > { %2551 = vrot.lane.b32.xlu2 %v4880_v58, %s4074_s13 }
 0x8ed   : > { %2775 = vrot.lane.b32.xlu1 %v4866_v35, %s4070_s30  ;;  %v5091_v26 = vpop.eup %3875 }
 0x8ee   : > { %v2233_v42 = vsel %vm953_vm1, %v5091_v26, 0.0 }
 0x8f4   : > { %2767 = vrot.lane.b32.xlu2 %v4890_v43, %s4069_s29 }
 0x8f5   : > { %2308 = vrot.lane.b32.xlu1 %v4895_v12, %s4071_s24 }
 0x8fc   : > { %2557 = vrot.lane.b32.xlu2 %v4895_v12, %s4074_s13 }
 0x8fd   : > { %2763 = vrot.lane.b32.xlu1 %v4880_v58, %s4069_s29 }
 0x904   : > { %2421 = vrot.lane.b32.xlu2 %v4998_v7, %s4076_s27  ;;  %2234 = vadd.xlane.f32.xlu0 %v2233_v42 }
 0x905   : > { %2765 = vrot.lane.b32.xlu1 %v4885_v19, %s4069_s29 }
 0x90c   : > { %2415 = vrot.lane.b32.xlu2 %v5056_v50, %s4076_s27  ;;  %v2255_v9 = vpop.permute.xlu1 %2254 }
 0x90d   : > { %2555 = vrot.lane.b32.xlu1 %v4890_v43, %s4074_s13  ;;  %3567 = vmatpush.msk.msra.mxu2 %vm1016_vm2, %v2255_v9 }
 0x90e   : > { %v3735_v58 = vpop.permute.xlu0 %3734 }
 0x90f   : > { %v3736_v11 = vunpack.i.l.bf16 %v3735_v58  ;;  %v2229_v33 = vpop.xlane.xlu2 %2228  ;;  %v3737_v1 = vunpack.i.h.bf16 %v3735_v58 }
 0x911   : > { %2286 = vmatpush.msra.mxu2 %v3736_v11 }
 0x913   : > { %2287 = vmatpush.msra.mxu2 %v3737_v1 }
 0x915   : > { %2670 = vrot.lane.b32.xlu1 %v4998_v7, %s4077_s28 }
 0x917   : > { %v2317_v14 = vpop.permute.xlu2 %2316 }
 0x918   : > { %2310 = vrot.lane.b32.xlu0 %v4844_v24, %s4073_s25  ;;  %3572 = vmatpush.xpose.msk.msrb.mxu1 %vm885_vm15, %v2317_v14 }
 0x91f   : > { %v2313_v17 = vpop.permute.xlu2 %2312 }
 0x920   : > { %2306 = vrot.lane.b32.xlu0 %v4890_v43, %s4071_s24  ;;  %v5126_v43 = vld [vmem:[%s4247_s18 + $0x8] sm:$0x3] }
 0x921   : > { %v1840_v48 = vperm.slane %v5126_v43, 0 }
 0x927   : > { %v5111_v27 = vpop.permute.xlu2 %2302 }
 0x928   : > { %2563 = vrot.lane.b32.xlu0 %v4866_v35, %s4072_s15 }
 0x92f   : > { %v5115_v25 = vpop.permute.xlu2 %2304 }
 0x930   : > { %2561 = vrot.lane.b32.xlu0 %v4851_v15, %s4072_s15 }
 0x937   : > { %v5119_v0 = vpop.permute.xlu2 %2565  ;;  %v2232_v31 = vpop.xlane.xlu1 %2231 }
 0x938   : > { %2559 = vrot.lane.b32.xlu0 %v4844_v24, %s4072_s15 }
 0x939   : > { %v2226_v6 = vpop.xlane.xlu0 %2225 }
 0x93a   : > { %3877 = vrcp.f32 %v2226_v6 }
 0x93b   : > { %3879 = vrcp.f32 %v2229_v33 }
 0x93c   : > { %3881 = vrcp.f32 %v2232_v31  ;;  %v1886_v31 = vperm.slane %v5126_v43, 1 }
 0x93f   : > { %v2774_v47 = vpop.permute.xlu2 %2773 }
 0x940   : > { %2553 = vrot.lane.b32.xlu0 %v4885_v19, %s4074_s13  ;;  %v3878_v15 = vpop.eup %3877 }
 0x941   : > { %v2240_v49 = vmul.f32 %v3878_v15, %v5026_v38 }
 0x947   : > { %v2772_v35 = vpop.permute.xlu2 %2771 }
 0x948   : > { %2769 = vrot.lane.b32.xlu0 %v4895_v12, %s4069_s29  ;;  %v3880_v12 = vpop.eup %3879 }
 0x949   : > { %v2241_v38 = vmul.f32 %v3880_v12, %v5000_v22  ;;  %v3882_v45 = vpop.eup %3881 }
 0x94a   : > { %v2242_v41 = vmul.f32 %v3882_v45, %v5028_v36 }
 0x94c   : > { %v1870_v24 = vpop.f32.mrf.mxu2  ;;  %v2249_v34 = vpop.permute.xlu0 %2248 }
 0x94d   : > { %v1871_v52 = vadd.f32 %v1870_v24, %v1840_v48  ;;  %2288 = vmatpush.msra.mxu2 %v2249_v34 }
 0x94e   : > { %3568 = vmatmul.msk.f32.vlgmr.msra.gmra.mxu2 %vm943_vm0, %v2240_v49 }
 0x94f   : > { %v1882_v19 = vmax.f32 %v1871_v52, 0.0  ;;  %v2552_v28 = vpop.permute.xlu2 %2551  ;;  %2537 = vmatpush.msrb.mxu2 %v3543_v44  ;;  %v2315_v32 = vpop.permute.xlu1 %2314 }
 0x950   : > { %3739 = vrot.lane.b32.xlu0 %v5002_v23, %s4076_s27  ;;  %3573 = vmatpush.xpose.msk.msrb.mxu1 %vm885_vm15, %v2315_v32 }
 0x951   : > { %3533 = vmatmul.msk.f32.vlgmr.msra.gmra.mxu1 %vm683_vm4, %v1882_v19 }
 0x954   : > { %3574 = vmatpush.xpose.msk.msrb.mxu1 %vm885_vm15, %v2313_v17 }
 0x956   : > { %3569 = vmatmul.msk.f32.gmra.mxu2 %vm943_vm0, %v2241_v38 }
 0x957   : > { %v5141_v3 = vpop.permute.xlu2 %2767  ;;  %v2778_v20 = vpop.permute.xlu1 %2777 }
 0x958   : > { %3744 = vrot.lane.b32.xlu0 %v5002_v23, %s4077_s28  ;;  %3610 = vmatpush.xpose.msk.msra.mxu2 %vm885_vm15, %v2778_v20 }
 0x959   : > { %v1873_v10 = vpop.f32.mrf.mxu2 }
 0x95a   : > { %v1874_v40 = vadd.f32 %v1873_v10, %v1840_v48 }
 0x95c   : > { %v1883_v63 = vmax.f32 %v1874_v40, 0.0 }
 0x95e   : > { %3534 = vmatmul.msk.f32.gmra.mxu1 %vm683_vm4, %v1883_v63  ;;  %3570 = vmatmul.msk.f32.gmra.mxu2 %vm943_vm0, %v2242_v41 }
 0x95f   : > { %v2558_v22 = vpop.permute.xlu2 %2557  ;;  %v2776_v54 = vpop.permute.xlu1 %2775 }
 0x960   : > { %3611 = vmatpush.xpose.msk.msra.mxu2 %vm885_vm15, %v2776_v54 }
 0x961   : > { %v1876_v56 = vpop.f32.mrf.mxu2 }
 0x962   : > { %v1877_v16 = vadd.f32 %v1876_v56, %v1840_v48 }
 0x964   : > { %v1884_v51 = vmax.f32 %v1877_v16, 0.0  ;;  %3612 = vmatpush.xpose.msk.msra.mxu2 %vm885_vm15, %v2774_v47 }
 0x966   : > { %3535 = vmatmul.msk.f32.gmra.mxu1 %vm683_vm4, %v1884_v51 }
 0x967   : > { %v2422_v39 = vpop.permute.xlu2 %2421 }
 0x968   : > { %3580 = vmatpush.msk.msrb.mxu3 %vm1016_vm2, %v2422_v39  ;;  %3613 = vmatpush.xpose.msk.msra.mxu2 %vm885_vm15, %v2772_v35 }
 0x969   : > { %v1879_v36 = vpop.f32.mrf.mxu2 }
 0x96a   : > { %v1880_v21 = vadd.f32 %v1879_v36, %v1840_v48 }
 0x96c   : > { %v1885_v4 = vmax.f32 %v1880_v21, 0.0 }
 0x96e   : > { %3536 = vmatmul.msk.f32.gmra.mxu1 %vm683_vm4, %v1885_v4 }
 0x977   : > { %v2235_v30 = vpop.xlane.xlu0 %2234 }
 0x978   : > { %3883 = vrcp.f32 %v2235_v30 }
 0x97e   : > { %v3884_v57 = vpop.eup %3883 }
 0x97f   : > { %v2243_v53 = vmul.f32 %v3884_v57, %v5091_v26  ;;  %v2309_v26 = vpop.permute.xlu1 %2308 }
 0x981   : > { %3571 = vmatmul.msk.f32.gmra.mxu2 %vm943_vm0, %v2243_v53 }
 0x987   : > { %v2764_v9 = vpop.permute.xlu1 %2763 }
 0x98a   : > { %v2311_v2 = vpop.permute.xlu0 %2310 }
 0x98b   : > { %3575 = vmatpush.xpose.msk.msrb.mxu1 %vm885_vm15, %v2311_v2 }
 0x98e   : > { %3576 = vmatmul.msk.f32.vlgmr.msrb.gmra.mxu1 %vm885_vm15, %v5111_v27 }
 0x98f   : > { %3593 = vmatpush.xpose.msk.msra.mxu1 %vm885_vm15, %v5119_v0  ;;  %v2766_v33 = vpop.permute.xlu1 %2765  ;;  %v2416_v0 = vpop.permute.xlu2 %2415 }
 0x992   : > { %v2307_v59 = vpop.permute.xlu0 %2306 }
 0x996   : > { %3577 = vmatmul.msk.f32.gmra.mxu1 %vm885_vm15, %v5115_v25 }
 0x997   : > { %v2556_v14 = vpop.permute.xlu1 %2555 }
 0x99a   : > { %v2564_v46 = vpop.permute.xlu0 %2563 }
 0x99b   : > { %3594 = vmatpush.xpose.msk.msra.mxu1 %vm885_vm15, %v2564_v46 }
 0x99e   : > { %3578 = vmatmul.msk.f32.gmra.mxu1 %vm885_vm15, %v2307_v59 }
 0x99f   : > { %v2671_v47 = vpop.permute.xlu1 %2670 }
 0x9a2   : > { %v2562_v42 = vpop.permute.xlu0 %2561 }
 0x9a3   : > { %3595 = vmatpush.xpose.msk.msra.mxu1 %vm885_vm15, %v2562_v42 }
 0x9a6   : > { %3579 = vmatmul.msk.f32.gmra.mxu1 %vm885_vm15, %v2309_v26 }
 0x9aa   : > { %v2560_v58 = vpop.permute.xlu0 %2559 }
 0x9ab   : > { %3596 = vmatpush.xpose.msk.msra.mxu1 %vm885_vm15, %v2560_v58 }
 0x9ae   : > { %3597 = vmatmul.msk.f32.vlgmr.msra.gmra.mxu1 %vm885_vm15, %v2552_v28 }
 0x9b2   : > { %v2554_v11 = vpop.permute.xlu0 %2553 }
 0x9b6   : > { %3598 = vmatmul.msk.f32.gmra.mxu1 %vm885_vm15, %v2554_v11 }
 0x9ba   : > { %v5171_v1 = vpop.permute.xlu0 %2769 }
 0x9be   : > { %3599 = vmatmul.msk.f32.gmra.mxu1 %vm885_vm15, %v2556_v14 }
 0x9c2   : > { %v3740_v17 = vpop.permute.xlu0 %3739 }
 0x9c3   : > { %v3741_v27 = vunpack.i.l.bf16 %v3740_v17  ;;  %v3742_v25 = vunpack.i.h.bf16 %v3740_v17 }
 0x9c5   : > { %2453 = vmatpush.msrb.mxu3 %v3741_v27 }
 0x9c6   : > { %3600 = vmatmul.msk.f32.gmra.mxu1 %vm885_vm15, %v2558_v22 }
 0x9c7   : > { %2454 = vmatpush.msrb.mxu3 %v3742_v25 }
 0x9c9   : > { %2455 = vmatpush.msrb.mxu3 %v2416_v0 }
 0x9ca   : > { %v3745_v6 = vpop.permute.xlu0 %3744 }
 0x9cb   : > { %3601 = vmatpush.msk.msra.mxu3 %vm1016_vm2, %v2671_v47  ;;  %v3746_v35 = vunpack.i.l.bf16 %v3745_v6  ;;  %v3747_v15 = vunpack.i.h.bf16 %v3745_v6 }
 0x9cd   : > { %2702 = vmatpush.msra.mxu3 %v3746_v35 }
 0x9ce   : > { %v1916_v48 = vpop.f32.mrf.mxu1 }
 0x9cf   : > { %2703 = vmatpush.msra.mxu3 %v3747_v15  ;;  %v1917_v49 = vadd.f32 %v1916_v48, %v1886_v31 }
 0x9d1   : > { %v2290_v24 = vpop.f32.mrf.mxu2  ;;  %v5178_v34 = vadd.f32 %v1917_v49, %v4904_v8 }
 0x9d2   : > { %3589 = vmatmul.msk.f32.vlgmr.msrb.gmra.mxu2 %vm885_vm15, %v2290_v24 }
 0x9d3   : > { %3186 = vst.msk [vmem:[#allocation2] sm:$0xff] %vm683_vm4, %v5178_v34 }
 0x9d9   : > { %v2293_v44 = vpop.f32.mrf.mxu2 }
 0x9da   : > { %3590 = vmatmul.msk.f32.gmra.mxu2 %vm885_vm15, %v2293_v44 }
 0x9db   : > { %v1919_v52 = vpop.f32.mrf.mxu1 }
 0x9dc   : > { %v1920_v19 = vadd.f32 %v1919_v52, %v1886_v31 }
 0x9de   : > { %v5185_v43 = vadd.f32 %v1920_v19, %v4910_v5 }
 0x9e0   : > { %3187 = vst.msk [vmem:[#allocation2 + $0x8] sm:$0xff] %vm683_vm4, %v5185_v43 }
 0x9e1   : > { %v2296_v28 = vpop.f32.mrf.mxu2 }
 0x9e2   : > { %3591 = vmatmul.msk.f32.gmra.mxu2 %vm885_vm15, %v2296_v28 }
 0x9e3   : > { %v1922_v8 = vpop.f32.mrf.mxu1 }
 0x9e4   : > { %v1923_v32 = vadd.f32 %v1922_v8, %v1886_v31 }
 0x9e6   : > { %v5191_v12 = vadd.f32 %v1923_v32, %v4915_v13 }
 0x9e8   : > { %3188 = vst.msk [vmem:[#allocation2 + $0x10] sm:$0xff] %vm683_vm4, %v5191_v12 }
 0x9eb   : > { %v1925_v38 = vpop.f32.mrf.mxu1 }
 0x9ec   : > { %v1926_v20 = vadd.f32 %v1925_v38, %v1886_v31 }
 0x9ee   : > { %v1931_v45 = vadd.f32 %v1926_v20, %v4919_v37 }
 0x9f0   : > { %3189 = vst.msk [vmem:[#allocation2 + $0x18] sm:$0x3] %vm693_vm3, %v1931_v45 }
 0xa04   : > { %v2299_v5 = vpop.f32.mrf.mxu2 }
 0xa05   : > { %3592 = vmatmul.msk.f32.gmra.mxu2 %vm885_vm15, %v2299_v5 }
 0xa0b   : > { %v2351_v10 = vpop.f32.mrf.mxu1 }
 0xa0c   : > { %v2363_v40 = vmul.f32 0.35355338, %v2351_v10 }
 0xa0d   : > { %3614 = vmatmul.msk.f32.vlgmr.msra.gmra.mxu2 %vm885_vm15, %v2764_v9 }
 0xa0e   : > { %v2367_v63 = vadd.f32 %v4926_v18, %v2363_v40 }
 0xa10   : > { %v2371_v13 = vsel %vm943_vm0, %v2367_v63, -inf }
 0xa11   : > { %2372 = vmax.xlane.f32.xlu1 %v2371_v13 }
 0xa13   : > { %v2354_v41 = vpop.f32.mrf.mxu1 }
 0xa14   : > { %v2364_v22 = vmul.f32 0.35355338, %v2354_v41 }
 0xa15   : > { %3615 = vmatmul.msk.f32.gmra.mxu2 %vm885_vm15, %v2766_v33 }
 0xa16   : > { %v2368_v37 = vadd.f32 %v4936_v55, %v2364_v22 }
 0xa18   : > { %v2374_v54 = vsel %vm943_vm0, %v2368_v37, -inf }
 0xa19   : > { %2375 = vmax.xlane.f32.xlu0 %v2374_v54 }
 0xa1b   : > { %v2357_v56 = vpop.f32.mrf.mxu1 }
 0xa1c   : > { %v2365_v16 = vmul.f32 0.35355338, %v2357_v56 }
 0xa1d   : > { %3616 = vmatmul.msk.f32.gmra.mxu2 %vm885_vm15, %v5141_v3 }
 0xa1e   : > { %v2369_v51 = vadd.f32 %v4943_v61, %v2365_v16 }
 0xa20   : > { %v2377_v39 = vsel %vm943_vm0, %v2369_v51, -inf }
 0xa21   : > { %2378 = vmax.xlane.f32.xlu2 %v2377_v39 }
 0xa23   : > { %v2360_v36 = vpop.f32.mrf.mxu1 }
 0xa24   : > { %v2366_v21 = vmul.f32 0.35355338, %v2360_v36 }
 0xa25   : > { %3617 = vmatmul.msk.f32.gmra.mxu2 %vm885_vm15, %v5171_v1 }
 0xa26   : > { %v2370_v4 = vadd.f32 %v4953_v60, %v2366_v21 }
 0xa28   : > { %v2380_v30 = vsel %vm953_vm1, %v2370_v4, -inf }
 0xa29   : > { %2381 = vmax.xlane.f32.xlu1 %v2380_v30 }
 0xa2b   : > { %v2600_v57 = vpop.f32.mrf.mxu1 }
 0xa2c   : > { %v2612_v53 = vmul.f32 0.35355338, %v2600_v57 }
 0xa2e   : > { %v2616_v2 = vadd.f32 %v4926_v18, %v2612_v53 }
 0xa30   : > { %v2620_v3 = vsel %vm943_vm0, %v2616_v2, -inf }
 0xa31   : > { %2621 = vmax.xlane.f32.xlu0 %v2620_v3 }
 0xa33   : > { %v2603_v59 = vpop.f32.mrf.mxu1 }
 0xa34   : > { %v2613_v46 = vmul.f32 0.35355338, %v2603_v59 }
 0xa36   : > { %v5215_v26 = vadd.f32 %v4936_v55, %v2613_v46 }
 0xa38   : > { %v2623_v42 = vsel %vm943_vm0, %v5215_v26, -inf }
 0xa39   : > { %2624 = vmax.xlane.f32.xlu1 %v2623_v42 }
 0xa3b   : > { %v2606_v9 = vpop.f32.mrf.mxu1 }
 0xa3c   : > { %v2614_v58 = vmul.f32 0.35355338, %v2606_v9 }
 0xa3e   : > { %v5220_v11 = vadd.f32 %v4943_v61, %v2614_v58 }
 0xa40   : > { %v2626_v33 = vsel %vm943_vm0, %v5220_v11, -inf }
 0xa41   : > { %2627 = vmax.xlane.f32.xlu2 %v2626_v33 }
 0xa43   : > { %v2609_v1 = vpop.f32.mrf.mxu1 }
 0xa44   : > { %v2615_v14 = vmul.f32 0.35355338, %v2609_v1 }
 0xa46   : > { %v5225_v17 = vadd.f32 %v4953_v60, %v2615_v14 }
 0xa48   : > { %v2629_v27 = vsel %vm953_vm1, %v5225_v17, -inf }
 0xa49   : > { %2630 = vmax.xlane.f32.xlu1 %v2629_v27 }
 0xa55   : > { %v5229_v25 = vpop.f32.mrf.mxu2 }
 0xa5d   : > { %v5231_v0 = vpop.f32.mrf.mxu2 }
 0xa65   : > { %v5233_v47 = vpop.f32.mrf.mxu2 }
 0xa84   : > { %v2373_v6 = vpop.xlane.xlu1 %2372 }
 0xa85   : > { %v2383_v35 = vsub.f32 %v2367_v63, %v2373_v6 }
 0xa87   : > { %v2387_v31 = vmul.f32 1.442695, %v2383_v35 }
 0xa88   : > { %v5235_v15 = vpop.f32.mrf.mxu2 }
 0xa89   : > { %3885 = vpow2.f32 %v2387_v31 }
 0xa8c   : > { %v2376_v48 = vpop.xlane.xlu0 %2375 }
 0xa8d   : > { %v2384_v49 = vsub.f32 %v2368_v37, %v2376_v48 }
 0xa8f   : > { %v5237_v24 = vpop.eup %3885  ;;  %v2389_v44 = vmul.f32 1.442695, %v2384_v49 }
 0xa90   : > { %v2812_v52 = vpop.f32.mrf.mxu2  ;;  %v2395_v19 = vsel %vm943_vm0, %v5237_v24, 0.0 }
 0xa91   : > { %3887 = vpow2.f32 %v2389_v44  ;;  %2396 = vadd.xlane.f32.xlu0 %v2395_v19  ;;  %v2824_v57 = vmul.f32 0.35355338, %v2812_v52 }
 0xa93   : > { %v2828_v59 = vadd.f32 %v4926_v18, %v2824_v57 }
 0xa94   : > { %v2379_v28 = vpop.xlane.xlu2 %2378 }
 0xa95   : > { %v2385_v8 = vsub.f32 %v2369_v51, %v2379_v28 }
 0xa97   : > { %v5241_v32 = vpop.eup %3887  ;;  %v2391_v38 = vmul.f32 1.442695, %v2385_v8 }
 0xa98   : > { %v2398_v20 = vsel %vm943_vm0, %v5241_v32, 0.0  ;;  %v2815_v45 = vpop.f32.mrf.mxu2 }
 0xa99   : > { %3889 = vpow2.f32 %v2391_v38  ;;  %2399 = vadd.xlane.f32.xlu1 %v2398_v20  ;;  %v2825_v13 = vmul.f32 0.35355338, %v2815_v45 }
 0xa9b   : > { %v5250_v37 = vadd.f32 %v4936_v55, %v2825_v13 }
 0xa9c   : > { %v2382_v5 = vpop.xlane.xlu1 %2381 }
 0xa9d   : > { %v2386_v10 = vsub.f32 %v2370_v4, %v2382_v5  ;;  %v2835_v21 = vsel %vm943_vm0, %v5250_v37, -inf }
 0xa9f   : > { %v5245_v40 = vpop.eup %3889  ;;  %v2393_v63 = vmul.f32 1.442695, %v2386_v10 }
 0xaa0   : > { %v2401_v41 = vsel %vm943_vm0, %v5245_v40, 0.0  ;;  %v2818_v22 = vpop.f32.mrf.mxu2 }
 0xaa1   : > { %3891 = vpow2.f32 %v2393_v63  ;;  %2402 = vadd.xlane.f32.xlu0 %v2401_v41  ;;  %v2826_v39 = vmul.f32 0.35355338, %v2818_v22 }
 0xaa3   : > { %v5259_v4 = vadd.f32 %v4943_v61, %v2826_v39  ;;  %v2832_v61 = vsel %vm943_vm0, %v2828_v59, -inf }
 0xaa4   : > { %v2622_v54 = vpop.xlane.xlu0 %2621 }
 0xaa5   : > { %v2632_v56 = vsub.f32 %v2616_v2, %v2622_v54  ;;  %v2838_v3 = vsel %vm943_vm0, %v5259_v4, -inf }
 0xaa7   : > { %v5252_v16 = vpop.eup %3891  ;;  %v2636_v51 = vmul.f32 1.442695, %v2632_v56 }
 0xaa8   : > { %v2404_v36 = vsel %vm953_vm1, %v5252_v16, 0.0  ;;  %v2821_v55 = vpop.f32.mrf.mxu2 }
 0xaa9   : > { %3893 = vpow2.f32 %v2636_v51  ;;  %2405 = vadd.xlane.f32.xlu1 %v2404_v36  ;;  %2836 = vmax.xlane.f32.xlu0 %v2835_v21  ;;  %v2827_v53 = vmul.f32 0.35355338, %v2821_v55 }
 0xaab   : > { %v5269_v46 = vadd.f32 %v4953_v60, %v2827_v53 }
 0xaac   : > { %v2625_v58 = vpop.xlane.xlu1 %2624 }
 0xaad   : > { %v2841_v42 = vsel %vm953_vm1, %v5269_v46, -inf  ;;  %v2633_v33 = vsub.f32 %v5215_v26, %v2625_v58 }
 0xaaf   : > { %v5261_v30 = vpop.eup %3893  ;;  %v2638_v14 = vmul.f32 1.442695, %v2633_v33 }
 0xab0   : > { %v2644_v2 = vsel %vm943_vm0, %v5261_v30, 0.0 }
 0xab1   : > { %2645 = vadd.xlane.f32.xlu2 %v2644_v2  ;;  %2839 = vmax.xlane.f32.xlu1 %v2838_v3 }
 0xab4   : > { %v2628_v18 = vpop.xlane.xlu2 %2627 }
 0xab5   : > { %v2634_v60 = vsub.f32 %v5220_v11, %v2628_v18 }
 0xab7   : > { %v2640_v9 = vmul.f32 1.442695, %v2634_v60 }
 0xab9   : > { %2833 = vmax.xlane.f32.xlu2 %v2832_v61  ;;  %2842 = vmax.xlane.f32.xlu1 %v2841_v42  ;;  %3895 = vpow2.f32 %v2640_v9  ;;  %v3544_v9 = vld [vmem:[%s4251_s22 + $0x68] sm:$0xff] }
 0xaba   : > { %3897 = vpow2.f32 %v2638_v14  ;;  %2496 = vmatpush.msra.mxu0 %v3544_v9 }
 0xabc   : > { %v2631_v11 = vpop.xlane.xlu1 %2630 }
 0xabd   : > { %2664 = vrot.lane.b32.xlu0 %v5056_v50, %s4077_s28 }
 0xabf   : > { %v5284_v1 = vpop.eup %3895 }
 0xac5   : > { %2876 = vrot.lane.b32.xlu0 %v5056_v50, %s4075_s26  ;;  %v2650_v50 = vsel %vm943_vm0, %v5284_v1, 0.0 }
 0xad1   : > { %3749 = vrot.lane.b32.xlu2 %v5002_v23, %s4075_s26  ;;  %v5288_v23 = vpop.eup %3897 }
 0xad2   : > { %2882 = vrot.lane.b32.xlu1 %v4998_v7, %s4075_s26  ;;  %v2647_v7 = vsel %vm943_vm0, %v5288_v23, 0.0 }
 0xaef   : > { %2651 = vadd.xlane.f32.xlu0 %v2650_v50 }
 0xafc   : > { %2648 = vadd.xlane.f32.xlu1 %v2647_v7 }
 0xb04   : > { %v2397_v27 = vpop.xlane.xlu0 %2396 }
 0xb05   : > { %3899 = vrcp.f32 %v2397_v27  ;;  %v3545_v27 = vld [vmem:[%s4251_s22 + $0x70] sm:$0xff] }
 0xb06   : > { %2745 = vmatpush.msrb.mxu0 %v3545_v27  ;;  %v3961_v27 = vld [vmem:[#allocation3 + $0x10] sm:$0xff] }
 0xb0b   : > { %v3900_v6 = vpop.eup %3899 }
 0xb0c   : > { %v2411_v26 = vmul.f32 %v3900_v6, %v5237_v24  ;;  %v2400_v35 = vpop.xlane.xlu1 %2399 }
 0xb0d   : > { %3901 = vrcp.f32 %v2400_v35 }
 0xb0e   : > { %3581 = vmatmul.msk.f32.vlgmr.msrb.gmra.mxu3 %vm943_vm0, %v2411_v26 }
 0xb13   : > { %v3902_v31 = vpop.eup %3901 }
 0xb14   : > { %v2403_v48 = vpop.xlane.xlu0 %2402  ;;  %v2412_v49 = vmul.f32 %v3902_v31, %v5241_v32 }
 0xb15   : > { %3903 = vrcp.f32 %v2403_v48 }
 0xb16   : > { %3582 = vmatmul.msk.f32.gmra.mxu3 %vm943_vm0, %v2412_v49 }
 0xb1b   : > { %v3904_v44 = vpop.eup %3903 }
 0xb1c   : > { %v2406_v52 = vpop.xlane.xlu1 %2405  ;;  %v2837_v19 = vpop.xlane.xlu0 %2836  ;;  %v2413_v28 = vmul.f32 %v3904_v44, %v5245_v40 }
 0xb1d   : > { %3905 = vrcp.f32 %v2406_v52  ;;  %v2845_v8 = vsub.f32 %v5250_v37, %v2837_v19  ;;  %v2635_v37 = vsub.f32 %v5225_v17, %v2631_v11 }
 0xb1e   : > { %3583 = vmatmul.msk.f32.gmra.mxu3 %vm943_vm0, %v2413_v28 }
 0xb1f   : > { %v2850_v24 = vmul.f32 1.442695, %v2845_v8  ;;  %v2642_v56 = vmul.f32 1.442695, %v2635_v37 }
 0xb21   : > { %3907 = vpow2.f32 %v2850_v24 }
 0xb23   : > { %v3906_v38 = vpop.eup %3905 }
 0xb24   : > { %v2646_v20 = vpop.xlane.xlu2 %2645  ;;  %v2414_v45 = vmul.f32 %v3906_v38, %v5252_v16  ;;  %v2840_v54 = vpop.xlane.xlu1 %2839 }
 0xb25   : > { %3909 = vrcp.f32 %v2646_v20  ;;  %v2846_v51 = vsub.f32 %v5259_v4, %v2840_v54 }
 0xb26   : > { %3584 = vmatmul.msk.f32.gmra.mxu3 %vm943_vm0, %v2414_v45 }
 0xb27   : > { %v5301_v32 = vpop.eup %3907  ;;  %v2852_v36 = vmul.f32 1.442695, %v2846_v51 }
 0xb28   : > { %v2859_v5 = vsel %vm943_vm0, %v5301_v32, 0.0 }
 0xb29   : > { %2860 = vadd.xlane.f32.xlu2 %v2859_v5 }
 0xb2b   : > { %v3910_v10 = vpop.eup %3909 }
 0xb2c   : > { %v2834_v40 = vpop.xlane.xlu2 %2833  ;;  %v2660_v13 = vmul.f32 %v3910_v10, %v5261_v30  ;;  %v2843_v21 = vpop.xlane.xlu1 %2842 }
 0xb2d   : > { %v2844_v63 = vsub.f32 %v2828_v59, %v2834_v40  ;;  %v2847_v30 = vsub.f32 %v5269_v46, %v2843_v21 }
 0xb2f   : > { %v2848_v41 = vmul.f32 1.442695, %v2844_v63  ;;  %v2665_v22 = vpop.permute.xlu0 %2664  ;;  %v2854_v53 = vmul.f32 1.442695, %v2847_v30  ;;  %v3546_v63 = vld [vmem:[%s4251_s22 + $0x78] sm:$0xff] }
 0xb30   : > { %2704 = vmatpush.msra.mxu3 %v2665_v22 }
 0xb31   : > { %3602 = vmatmul.msk.f32.vlgmr.msra.gmra.mxu3 %vm943_vm0, %v2660_v13  ;;  %3911 = vpow2.f32 %v2848_v41 }
 0xb32   : > { %3913 = vpow2.f32 %v2642_v56  ;;  %2957 = vmatpush.msrb.mxu3 %v3546_v63 }
 0xb33   : > { %3915 = vpow2.f32 %v2852_v36 }
 0xb34   : > { %v3750_v57 = vpop.permute.xlu2 %3749  ;;  %3917 = vpow2.f32 %v2854_v53 }
 0xb35   : > { %v3751_v3 = vunpack.i.l.bf16 %v3750_v57  ;;  %v3752_v59 = vunpack.i.h.bf16 %v3750_v57  ;;  %v5342_v57 = vld [vmem:[%s4247_s18 + $0x10] sm:$0xff] }
 0xb36   : > { %v2979_v53 = vperm.slane %v5342_v57, 7 }
 0xb37   : > { %v3912_v16 = vpop.eup %3911  ;;  %v2877_v42 = vpop.permute.xlu0 %2876 }
 0xb38   : > { %v2856_v39 = vsel %vm943_vm0, %v3912_v16, 0.0  ;;  %v3914_v55 = vpop.eup %3913 }
 0xb39   : > { %2857 = vadd.xlane.f32.xlu1 %v2856_v39  ;;  %v2653_v17 = vsel %vm953_vm1, %v3914_v55, 0.0  ;;  %v3916_v4 = vpop.eup %3915 }
 0xb3a   : > { %v2862_v61 = vsel %vm943_vm0, %v3916_v4, 0.0  ;;  %v3918_v46 = vpop.eup %3917 }
 0xb3b   : > { %v2865_v18 = vsel %vm953_vm1, %v3918_v46, 0.0 }
 0xb41   : > { %2654 = vadd.xlane.f32.xlu1 %v2653_v17 }
 0xb44   : > { %v2883_v2 = vpop.permute.xlu1 %2882 }
 0xb45   : > { %3618 = vmatpush.msk.msrb.mxu1 %vm1016_vm2, %v2883_v2 }
 0xb47   : > { %2914 = vmatpush.msrb.mxu1 %v3751_v3  ;;  %v3959_v3 = vld [vmem:[#allocation3] sm:$0xff] }
 0xb49   : > { %2915 = vmatpush.msrb.mxu1 %v3752_v59  ;;  %2863 = vadd.xlane.f32.xlu1 %v2862_v61 }
 0xb4b   : > { %2916 = vmatpush.msrb.mxu1 %v2877_v42 }
 0xb51   : > { %2866 = vadd.xlane.f32.xlu1 %v2865_v18 }
 0xb62   : > { %v2652_v58 = vpop.xlane.xlu0 %2651 }
 0xb6f   : > { %v2649_v60 = vpop.xlane.xlu1 %2648 }
 0xb70   : > { %3919 = vrcp.f32 %v2649_v60  ;;  %v3960_v60 = vld [vmem:[#allocation3 + $0x8] sm:$0xff] }
 0xb71   : > { %3921 = vrcp.f32 %v2652_v58 }
 0xb76   : > { %v3920_v33 = vpop.eup %3919 }
 0xb77   : > { %v2661_v14 = vmul.f32 %v3920_v33, %v5288_v23  ;;  %v3922_v50 = vpop.eup %3921 }
 0xb78   : > { %v2662_v7 = vmul.f32 %v3922_v50, %v5284_v1 }
 0xb79   : > { %3603 = vmatmul.msk.f32.gmra.mxu3 %vm943_vm0, %v2661_v14 }
 0xb81   : > { %3604 = vmatmul.msk.f32.gmra.mxu3 %vm943_vm0, %v2662_v7 }
 0xb91   : > { %v2457_v11 = vpop.f32.mrf.mxu3 }
 0xb92   : > { %3585 = vmatmul.msk.f32.vlgmr.msra.gmra.mxu0 %vm885_vm15, %v2457_v11 }
 0xb99   : > { %v2460_v6 = vpop.f32.mrf.mxu3 }
 0xb9a   : > { %3586 = vmatmul.msk.f32.gmra.mxu0 %vm885_vm15, %v2460_v6 }
 0xb9c   : > { %v2861_v31 = vpop.xlane.xlu2 %2860 }
 0xba1   : > { %v2463_v26 = vpop.f32.mrf.mxu3 }
 0xba2   : > { %3587 = vmatmul.msk.f32.gmra.mxu0 %vm885_vm15, %v2463_v26 }
 0xba9   : > { %v2466_v35 = vpop.f32.mrf.mxu3 }
 0xbaa   : > { %3588 = vmatmul.msk.f32.gmra.mxu0 %vm885_vm15, %v2466_v35 }
 0xbac   : > { %v2858_v23 = vpop.xlane.xlu1 %2857 }
 0xbad   : > { %3923 = vrcp.f32 %v2858_v23 }
 0xbae   : > { %3925 = vrcp.f32 %v2861_v31 }
 0xbb3   : > { %v3924_v1 = vpop.eup %3923 }
 0xbb4   : > { %v2706_v48 = vpop.f32.mrf.mxu3  ;;  %v2872_v49 = vmul.f32 %v3924_v1, %v3912_v16  ;;  %v2655_v44 = vpop.xlane.xlu1 %2654 }
 0xbb5   : > { %3606 = vmatmul.msk.f32.vlgmr.msrb.gmra.mxu0 %vm885_vm15, %v2706_v48  ;;  %3927 = vrcp.f32 %v2655_v44  ;;  %v3926_v52 = vpop.eup %3925 }
 0xbb6   : > { %3619 = vmatmul.msk.f32.vlgmr.msrb.gmra.mxu1 %vm943_vm0, %v2872_v49  ;;  %v2873_v24 = vmul.f32 %v3926_v52, %v5301_v32  ;;  %v3962_v49 = vld [vmem:[#allocation3 + $0x18] sm:$0x3] }
 0xbbb   : > { %v3928_v19 = vpop.eup %3927 }
 0xbbc   : > { %v2864_v28 = vpop.xlane.xlu1 %2863  ;;  %v2663_v8 = vmul.f32 %v3928_v19, %v3914_v55 }
 0xbbd   : > { %3929 = vrcp.f32 %v2864_v28 }
 0xbbe   : > { %3605 = vmatmul.msk.f32.gmra.mxu3 %vm943_vm0, %v2663_v8  ;;  %3620 = vmatmul.msk.f32.gmra.mxu1 %vm943_vm0, %v2873_v24 }
 0xbc3   : > { %v3930_v38 = vpop.eup %3929 }
 0xbc4   : > { %v2867_v20 = vpop.xlane.xlu1 %2866  ;;  %v2874_v45 = vmul.f32 %v3930_v38, %v3916_v4 }
 0xbc5   : > { %3931 = vrcp.f32 %v2867_v20 }
 0xbc6   : > { %3621 = vmatmul.msk.f32.gmra.mxu1 %vm943_vm0, %v2874_v45 }
 0xbcb   : > { %v3932_v5 = vpop.eup %3931 }
 0xbcc   : > { %v2875_v10 = vmul.f32 %v3932_v5, %v3918_v46 }
 0xbce   : > { %3622 = vmatmul.msk.f32.gmra.mxu1 %vm943_vm0, %v2875_v10 }
 0xbfc   : > { %v2709_v40 = vpop.f32.mrf.mxu3 }
 0xbfd   : > { %3607 = vmatmul.msk.f32.gmra.mxu0 %vm885_vm15, %v2709_v40 }
 0xc04   : > { %v2712_v32 = vpop.f32.mrf.mxu3 }
 0xc05   : > { %3608 = vmatmul.msk.f32.gmra.mxu0 %vm885_vm15, %v2712_v32 }
 0xc0f   : > { %v2498_v56 = vpop.f32.mrf.mxu0 }
 0xc10   : > { %v2540_v21 = vadd.f32 %v5229_v25, %v2498_v56 }
 0xc17   : > { %v2501_v16 = vpop.f32.mrf.mxu0 }
 0xc18   : > { %v2543_v59 = vadd.f32 %v5231_v0, %v2501_v16 }
 0xc1f   : > { %v2504_v51 = vpop.f32.mrf.mxu0 }
 0xc20   : > { %v2546_v33 = vadd.f32 %v5233_v47, %v2504_v51 }
 0xc27   : > { %v2507_v39 = vpop.f32.mrf.mxu0 }
 0xc28   : > { %v2549_v35 = vadd.f32 %v5235_v15, %v2507_v39  ;;  %v3550_v39 = vld [vmem:[%s4251_s22 + $0x98] sm:$0xff] }
 0xc29   : > { %3119 = vmatpush.msra.mxu0 %v3550_v39 }
 0xc32   : > { %v2747_v36 = vpop.f32.mrf.mxu0 }
 0xc33   : > { %v2918_v13 = vpop.f32.mrf.mxu1  ;;  %v2759_v55 = vadd.f32 %v2747_v36, %v2540_v21  ;;  %v3549_v21 = vld [vmem:[%s4251_s22 + $0x90] sm:$0xff] }
 0xc34   : > { %3623 = vmatmul.msk.f32.vlgmr.msrb.gmra.mxu3 %vm885_vm15, %v2918_v13  ;;  %3120 = vmatpush.msra.mxu0 %v3549_v21 }
 0xc3b   : > { %v2921_v41 = vpop.f32.mrf.mxu1 }
 0xc3c   : > { %3624 = vmatmul.msk.f32.gmra.mxu3 %vm885_vm15, %v2921_v41 }
 0xc41   : > { %v2715_v22 = vpop.f32.mrf.mxu3 }
 0xc42   : > { %3609 = vmatmul.msk.f32.gmra.mxu0 %vm885_vm15, %v2715_v22 }
 0xc43   : > { %v2924_v37 = vpop.f32.mrf.mxu1 }
 0xc44   : > { %3625 = vmatmul.msk.f32.gmra.mxu3 %vm885_vm15, %v2924_v37 }
 0xc4b   : > { %v2927_v54 = vpop.f32.mrf.mxu1 }
 0xc4c   : > { %3626 = vmatmul.msk.f32.gmra.mxu3 %vm885_vm15, %v2927_v54 }
 0xc7a   : > { %v2750_v2 = vpop.f32.mrf.mxu0 }
 0xc7b   : > { %v2760_v42 = vadd.f32 %v2750_v2, %v2543_v59 }
 0xc82   : > { %v2753_v58 = vpop.f32.mrf.mxu0 }
 0xc83   : > { %v2761_v50 = vadd.f32 %v2753_v58, %v2546_v33 }
 0xcb7   : > { %v2959_v30 = vpop.f32.mrf.mxu3 }
 0xcb8   : > { %v2971_v17 = vadd.f32 %v2959_v30, %v2759_v55  ;;  %v3548_v30 = vld [vmem:[%s4251_s22 + $0x88] sm:$0xff] }
 0xcb9   : > { %3121 = vmatpush.msra.mxu0 %v3548_v30 }
 0xcba   : > { %v2975_v4 = vadd.f32 %v3959_v3, %v2971_v17  ;;  %v3547_v17 = vld [vmem:[%s4251_s22 + $0x80] sm:$0xff] }
 0xcbb   : > { %3122 = vmatpush.msra.mxu0 %v3547_v17 }
 0xcbc   : > { %v5346_v61 = vadd.f32 %v2979_v53, %v2975_v4 }
 0xcbe   : > { %v2984_v46 = vsel %vm683_vm4, %v5346_v61, 0.0 }
 0xcbf   : > { %2985 = vadd.xlane.f32.xlu2 %v2984_v46  ;;  %v2962_v25 = vpop.f32.mrf.mxu3  ;;  %v2756_v26 = vpop.f32.mrf.mxu0 }
 0xcc0   : > { %v2972_v18 = vadd.f32 %v2962_v25, %v2760_v42  ;;  %v2762_v31 = vadd.f32 %v2756_v26, %v2549_v35 }
 0xcc2   : > { %v2976_v9 = vadd.f32 %v3960_v60, %v2972_v18 }
 0xcc4   : > { %v5351_v14 = vadd.f32 %v2979_v53, %v2976_v9 }
 0xcc6   : > { %v2987_v0 = vsel %vm683_vm4, %v5351_v14, 0.0 }
 0xcc7   : > { %2988 = vadd.xlane.f32.xlu1 %v2987_v0  ;;  %v2965_v7 = vpop.f32.mrf.mxu3 }
 0xcc8   : > { %v2973_v11 = vadd.f32 %v2965_v7, %v2761_v50 }
 0xcca   : > { %v2977_v6 = vadd.f32 %v3961_v27, %v2973_v11 }
 0xccc   : > { %v5356_v23 = vadd.f32 %v2979_v53, %v2977_v6 }
 0xcce   : > { %v2990_v47 = vsel %vm683_vm4, %v5356_v23, 0.0 }
 0xccf   : > { %2991 = vadd.xlane.f32.xlu2 %v2990_v47  ;;  %v2968_v1 = vpop.f32.mrf.mxu3 }
 0xcd0   : > { %v2974_v48 = vadd.f32 %v2968_v1, %v2762_v31 }
 0xcd2   : > { %v2978_v44 = vadd.f32 %v3962_v49, %v2974_v48  ;;  %v3080_v49 = vperm.slane %v5342_v57, 2 }
 0xcd4   : > { %v5360_v52 = vadd.f32 %v2979_v53, %v2978_v44 }
 0xcd6   : > { %v2993_v19 = vsel %vm693_vm3, %v5360_v52, 0.0 }
 0xcd7   : > { %2994 = vadd.xlane.f32.xlu0 %v2993_v19 }
 0xd32   : > { %v2986_v28 = vpop.xlane.xlu2 %2985 }
 0xd33   : > { %v2996_v15 = vmul.f32 %v2986_v28, %v4306_v62 }
 0xd35   : > { %v5366_v8 = vsub.f32 %v5346_v61, %v2996_v15  ;;  %v3554_v15 = vld [vmem:[%s4251_s22 + $0xb8] sm:$0xff] }
 0xd36   : > { %3165 = vmatpush.msrb.mxu2 %v3554_v15 }
 0xd37   : > { %v3004_v24 = vmul.f32 %v5366_v8, %v5366_v8 }
 0xd39   : > { %v3008_v38 = vsel %vm683_vm4, %v3004_v24, 0.0  ;;  %v3553_v24 = vld [vmem:[%s4251_s22 + $0xb0] sm:$0xff] }
 0xd3a   : > { %3009 = vadd.xlane.f32.xlu1 %v3008_v38  ;;  %v2989_v20 = vpop.xlane.xlu1 %2988  ;;  %3166 = vmatpush.msrb.mxu2 %v3553_v24 }
 0xd3b   : > { %v2997_v45 = vmul.f32 %v2989_v20, %v4306_v62 }
 0xd3d   : > { %v5373_v5 = vsub.f32 %v5351_v14, %v2997_v45  ;;  %v3081_v45 = vmul.f32 %v3080_v49, %v5366_v8 }
 0xd3f   : > { %v3005_v10 = vmul.f32 %v5373_v5, %v5373_v5 }
 0xd41   : > { %v3011_v40 = vsel %vm683_vm4, %v3005_v10, 0.0  ;;  %v3089_v10 = vperm.slane %v5342_v57, 3  ;;  %v3082_v57 = vmul.f32 %v3080_v49, %v5373_v5 }
 0xd42   : > { %3012 = vadd.xlane.f32.xlu2 %v3011_v40  ;;  %v2992_v63 = vpop.xlane.xlu2 %2991 }
 0xd43   : > { %v2998_v32 = vmul.f32 %v2992_v63, %v4306_v62 }
 0xd45   : > { %v5380_v13 = vsub.f32 %v5356_v23, %v2998_v32 }
 0xd47   : > { %v3006_v41 = vmul.f32 %v5380_v13, %v5380_v13 }
 0xd49   : > { %v3014_v22 = vsel %vm683_vm4, %v3006_v41, 0.0 }
 0xd4a   : > { %3015 = vadd.xlane.f32.xlu0 %v3014_v22  ;;  %v2995_v37 = vpop.xlane.xlu0 %2994 }
 0xd4b   : > { %v2999_v54 = vmul.f32 %v2995_v37, %v4306_v62 }
 0xd4d   : > { %v5387_v56 = vsub.f32 %v5360_v52, %v2999_v54 }
 0xd4f   : > { %v3007_v16 = vmul.f32 %v5387_v56, %v5387_v56 }
 0xd51   : > { %v3017_v51 = vsel %vm693_vm3, %v3007_v16, 0.0 }
 0xd52   : > { %3018 = vadd.xlane.f32.xlu1 %v3017_v51 }
 0xdad   : > { %v3010_v36 = vpop.xlane.xlu1 %3009 }
 0xdae   : > { %v3020_v55 = vmul.f32 %v3010_v36, %v4336_v29 }
 0xdb0   : > { %3933 = vrsqrt.f32 %v3020_v55  ;;  %vm3031_vm15 = vcmp.eq.f32.partialorder %v3020_v55, inf  ;;  %v3034_v0 = vand.u32 2147483648, %v3020_v55  ;;  %vm3033_vm0 = vcmp.eq.f32.partialorder %v3020_v55, 0.0 }
 0xdb5   : > { %v3013_v53 = vpop.xlane.xlu2 %3012 }
 0xdb6   : > { %v3934_v2 = vpop.eup %3933  ;;  %v3021_v3 = vmul.f32 %v3013_v53, %v4336_v29 }
 0xdb7   : > { %v3025_v4 = vmul.f32 %v3934_v2, %v3020_v55 }
 0xdb8   : > { %3935 = vrsqrt.f32 %v3021_v3  ;;  %vm3043_vm1 = vcmp.eq.f32.partialorder %v3021_v3, inf  ;;  %v3046_v28 = vand.u32 2147483648, %v3021_v3  ;;  %vm3045_vm2 = vcmp.eq.f32.partialorder %v3021_v3, 0.0 }
 0xdb9   : > { %v3026_v59 = vmul.f32 %v3934_v2, %v3025_v4 }
 0xdbb   : > { %v3027_v42 = vmul.f32 0.5, %v3026_v59 }
 0xdbd   : > { %v3028_v46 = vsub.f32 1.5, %v3027_v42  ;;  %v3016_v25 = vpop.xlane.xlu0 %3015 }
 0xdbe   : > { %v3936_v18 = vpop.eup %3935  ;;  %v3022_v60 = vmul.f32 %v3016_v25, %v4336_v29 }
 0xdbf   : > { %v3029_v9 = vmul.f32 %v3934_v2, %v3028_v46  ;;  %v3037_v58 = vmul.f32 %v3936_v18, %v3021_v3 }
 0xdc0   : > { %3937 = vrsqrt.f32 %v3022_v60  ;;  %vm3055_vm11 = vcmp.eq.f32.partialorder %v3022_v60, inf  ;;  %v3058_v21 = vand.u32 2147483648, %v3022_v60  ;;  %vm3057_vm12 = vcmp.eq.f32.partialorder %v3022_v60, 0.0 }
 0xdc1   : > { %v3030_v33 = vmul.f32 %v3029_v9, %v3020_v55  ;;  %v3038_v50 = vmul.f32 %v3936_v18, %v3037_v58 }
 0xdc3   : > { %v3032_v7 = vsel %vm3031_vm15, %v3020_v55, %v3030_v33  ;;  %v3039_v11 = vmul.f32 0.5, %v3038_v50  ;;  %v3084_v50 = vmul.f32 %v3080_v49, %v5387_v56 }
 0xdc4   : > { %v3035_v27 = vsel %vm3033_vm0, %v3034_v0, %v3032_v7 }
 0xdc5   : > { %v3019_v6 = vpop.xlane.xlu1 %3018  ;;  %v3072_v26 = vadd.f32 1e-06, %v3035_v27  ;;  %v3040_v35 = vsub.f32 1.5, %v3039_v11  ;;  %v3552_v27 = vld [vmem:[%s4251_s22 + $0xa8] sm:$0xff] }
 0xdc6   : > { %v3938_v31 = vpop.eup %3937  ;;  %v3023_v47 = vmul.f32 %v3019_v6, %v4336_v29  ;;  %3167 = vmatpush.msrb.mxu2 %v3552_v27  ;;  %v3551_v6 = vld [vmem:[%s4251_s22 + $0xa0] sm:$0xff] }
 0xdc7   : > { %v3049_v1 = vmul.f32 %v3938_v31, %v3022_v60  ;;  %3939 = vrcp.f32 %v3072_v26  ;;  %v3041_v48 = vmul.f32 %v3936_v18, %v3040_v35  ;;  %v3083_v18 = vmul.f32 %v3080_v49, %v5380_v13  ;;  %v3538_v13 = vld [vmem:[%s4247_s18 + $0x18] sm:$0x3] }
 0xdc8   : > { %3941 = vrsqrt.f32 %v3023_v47  ;;  %vm3067_vm13 = vcmp.eq.f32.partialorder %v3023_v47, inf  ;;  %v3070_v46 = vand.u32 2147483648, %v3023_v47  ;;  %vm3069_vm14 = vcmp.eq.f32.partialorder %v3023_v47, 0.0  ;;  %3168 = vmatpush.msrb.mxu2 %v3551_v6 }
 0xdc9   : > { %v3050_v44 = vmul.f32 %v3938_v31, %v3049_v1  ;;  %v3042_v19 = vmul.f32 %v3041_v48, %v3021_v3  ;;  %v3094_v26 = vperm.slane %v3538_v13, 0 }
 0xdcb   : > { %v3051_v38 = vmul.f32 0.5, %v3050_v44  ;;  %v3044_v20 = vsel %vm3043_vm1, %v3021_v3, %v3042_v19 }
 0xdcc   : > { %v3047_v40 = vsel %vm3045_vm2, %v3046_v28, %v3044_v20 }
 0xdcd   : > { %v3940_v63 = vpop.eup %3939  ;;  %v3073_v32 = vadd.f32 1e-06, %v3047_v40  ;;  %v3052_v41 = vsub.f32 1.5, %v3051_v38  ;;  %v3140_v38 = vperm.slane %v3538_v13, 1 }
 0xdce   : > { %v3942_v22 = vpop.eup %3941  ;;  %v3085_v37 = vmul.f32 %v3940_v63, %v3081_v45 }
 0xdcf   : > { %v3061_v54 = vmul.f32 %v3942_v22, %v3023_v47  ;;  %3943 = vrcp.f32 %v3073_v32  ;;  %v3053_v16 = vmul.f32 %v3938_v31, %v3052_v41 }
 0xdd0   : > { %v3090_v51 = vadd.f32 %v3089_v10, %v3085_v37 }
 0xdd1   : > { %v3062_v39 = vmul.f32 %v3942_v22, %v3061_v54  ;;  %v3054_v36 = vmul.f32 %v3053_v16, %v3022_v60 }
 0xdd2   : > { %3627 = vmatmul.msk.f32.vlgmr.msra.gmra.mxu0 %vm683_vm4, %v3090_v51 }
 0xdd3   : > { %v3063_v8 = vmul.f32 0.5, %v3062_v39  ;;  %v3056_v55 = vsel %vm3055_vm11, %v3022_v60, %v3054_v36 }
 0xdd4   : > { %v3059_v30 = vsel %vm3057_vm12, %v3058_v21, %v3056_v55 }
 0xdd5   : > { %v3944_v17 = vpop.eup %3943  ;;  %v3074_v53 = vadd.f32 1e-06, %v3059_v30  ;;  %v3064_v2 = vsub.f32 1.5, %v3063_v8 }
 0xdd6   : > { %v3086_v3 = vmul.f32 %v3944_v17, %v3082_v57 }
 0xdd7   : > { %3945 = vrcp.f32 %v3074_v53  ;;  %v3065_v4 = vmul.f32 %v3942_v22, %v3064_v2 }
 0xdd8   : > { %v3091_v59 = vadd.f32 %v3089_v10, %v3086_v3 }
 0xdd9   : > { %v3066_v42 = vmul.f32 %v3065_v4, %v3023_v47 }
 0xdda   : > { %3628 = vmatmul.msk.f32.gmra.mxu0 %vm683_vm4, %v3091_v59 }
 0xddb   : > { %v3068_v25 = vsel %vm3067_vm13, %v3023_v47, %v3066_v42 }
 0xddc   : > { %v3071_v5 = vsel %vm3069_vm14, %v3070_v46, %v3068_v25 }
 0xddd   : > { %v3946_v60 = vpop.eup %3945  ;;  %v3075_v9 = vadd.f32 1e-06, %v3071_v5 }
 0xdde   : > { %v3087_v58 = vmul.f32 %v3946_v60, %v3083_v18 }
 0xddf   : > { %3947 = vrcp.f32 %v3075_v9 }
 0xde0   : > { %v3092_v33 = vadd.f32 %v3089_v10, %v3087_v58 }
 0xde2   : > { %3629 = vmatmul.msk.f32.gmra.mxu0 %vm683_vm4, %v3092_v33 }
 0xde5   : > { %v3948_v0 = vpop.eup %3947 }
 0xde6   : > { %v3088_v7 = vmul.f32 %v3948_v0, %v3084_v50 }
 0xde8   : > { %v3093_v11 = vadd.f32 %v3089_v10, %v3088_v7 }
 0xdea   : > { %3630 = vmatmul.msk.f32.gmra.mxu0 %vm683_vm4, %v3093_v11 }
 0xe4f   : > { %v3124_v35 = vpop.f32.mrf.mxu0 }
 0xe50   : > { %v3125_v31 = vadd.f32 %v3124_v35, %v3094_v26 }
 0xe52   : > { %v3136_v47 = vmax.f32 %v3125_v31, 0.0 }
 0xe54   : > { %3631 = vmatmul.msk.f32.vlgmr.msrb.gmra.mxu2 %vm683_vm4, %v3136_v47 }
 0xe57   : > { %v3127_v1 = vpop.f32.mrf.mxu0 }
 0xe58   : > { %v3128_v48 = vadd.f32 %v3127_v1, %v3094_v26 }
 0xe5a   : > { %v3137_v44 = vmax.f32 %v3128_v48, 0.0 }
 0xe5c   : > { %3632 = vmatmul.msk.f32.gmra.mxu2 %vm683_vm4, %v3137_v44 }
 0xe5f   : > { %v3130_v56 = vpop.f32.mrf.mxu0 }
 0xe60   : > { %v3131_v49 = vadd.f32 %v3130_v56, %v3094_v26 }
 0xe62   : > { %v3138_v19 = vmax.f32 %v3131_v49, 0.0 }
 0xe64   : > { %3633 = vmatmul.msk.f32.gmra.mxu2 %vm683_vm4, %v3138_v19 }
 0xe67   : > { %v3133_v28 = vpop.f32.mrf.mxu0 }
 0xe68   : > { %v3134_v15 = vadd.f32 %v3133_v28, %v3094_v26 }
 0xe6a   : > { %v3139_v24 = vmax.f32 %v3134_v15, 0.0 }
 0xe6c   : > { %3634 = vmatmul.msk.f32.gmra.mxu2 %vm683_vm4, %v3139_v24 }
 0xed7   : > { %v3170_v20 = vpop.f32.mrf.mxu2 }
 0xed8   : > { %v3171_v45 = vadd.f32 %v3170_v20, %v3140_v38 }
 0xeda   : > { %v3182_v10 = vadd.f32 %v3171_v45, %v5346_v61 }
 0xedc   : > { %3190 = vst.msk [vmem:[#allocation3] sm:$0xff] %vm683_vm4, %v3182_v10  ;;  %v3194_v40 = vadd.f32 %v3182_v10, %v5178_v34 }
 0xede   : > { %v3195_v63 = vmul.f32 0.5, %v3194_v40 }
 0xedf   : > { %v3173_v32 = vpop.f32.mrf.mxu2 }
 0xee0   : > { %3197 = vst.msk [vmem:[#allocation2] sm:$0xf] %vm3196_vm5, %v3195_v63  ;;  %v3174_v41 = vadd.f32 %v3173_v32, %v3140_v38 }
 0xee1   : > { %3198 = vst.msk [vmem:[#allocation3] sm:$0xf] %vm3196_vm5, %v3195_v63 }
 0xee2   : > { %v3183_v22 = vadd.f32 %v3174_v41, %v5351_v14 }
 0xee4   : > { %3191 = vst.msk [vmem:[#allocation3 + $0x8] sm:$0xff] %vm683_vm4, %v3183_v22  ;;  %v3199_v37 = vadd.f32 %v3183_v22, %v5185_v43 }
 0xee6   : > { %v3201_v61 = vmul.f32 0.5, %v3199_v37 }
 0xee7   : > { %v3176_v54 = vpop.f32.mrf.mxu2 }
 0xee8   : > { %3204 = vst.msk [vmem:[#allocation2 + $0x8] sm:$0xe0] %vm3203_vm6, %v3201_v61  ;;  %v3177_v16 = vadd.f32 %v3176_v54, %v3140_v38 }
 0xee9   : > { %3207 = vst.msk [vmem:[#allocation3 + $0x8] sm:$0xe0] %vm3203_vm6, %v3201_v61 }
 0xeea   : > { %v3184_v51 = vadd.f32 %v3177_v16, %v5356_v23 }
 0xeec   : > { %3192 = vst.msk [vmem:[#allocation3 + $0x10] sm:$0xff] %vm683_vm4, %v3184_v51  ;;  %v3200_v39 = vadd.f32 %v3184_v51, %v5191_v12 }
 0xeee   : > { %v3202_v14 = vmul.f32 0.5, %v3200_v39 }
 0xeef   : > { %v3179_v36 = vpop.f32.mrf.mxu2 }
 0xef0   : > { %3206 = vst.msk [vmem:[#allocation2 + $0x10] sm:$0x1] %vm3205_vm7, %v3202_v14  ;;  %v3180_v43 = vadd.f32 %v3179_v36, %v3140_v38  ;;  %3212 = sbr.rel (%p3635_p9) target bundleno = 4249 (0x1099), region = 178 }
 0xef1   : > { %3208 = vst.msk [vmem:[#allocation3 + $0x10] sm:$0x1] %vm3205_vm7, %v3202_v14 }
 0xef2   : > { %v3185_v21 = vadd.f32 %v3180_v43, %v5360_v52 }
 0xef4   : > { %3193 = vst.msk [vmem:[#allocation3 + $0x18] sm:$0x3] %vm693_vm3, %v3185_v21 }
 0xef5   : > { %v3218_v23 = vrot.slane %v5178_v34, 4  ;;  %vm3220_vm8 = vcmask 1040384   ;;  %v3223_v8 = vrot.slane %v3182_v10, 4  ;;  %3213 = vst.msk [vmem:[#allocation9] sm:$0xf] %vm3196_vm5, %v3195_v63  ;;  %v3293_v25 = vld [vmem:[%s5516_s7 + $0x18] sm:$0xff] }
 0xef6   : > { %3215 = vst.msk [vmem:[#allocation9 - $0x1] sm:$0xe0] %vm3203_vm6, %v3201_v61  ;;  %v3292_v18 = vld [vmem:[%s5516_s7 + $0x10] sm:$0xff]  ;;  %3313 = vmatpush.msra.mxu0 %v3293_v25  ;;  %v3291_v5 = vld [vmem:[%s5516_s7 + $0x8] sm:$0xff]  ;;  %v3963_v20 = vld [vmem:[%s5515_s6] ss:$0 sm:$0xff] }
 0xef7   : > { %v3221_v55 = vsel %vm3220_vm8, %v3218_v23, %v5191_v12  ;;  %3216 = vst.msk [vmem:[#allocation9 + $0x7] sm:$0x1] %vm3205_vm7, %v3202_v14  ;;  %v3225_v52 = vsel %vm3220_vm8, %v3223_v8, %v3184_v51  ;;  %v3964_v45 = vld [vmem:[%s5515_s6 + $0x2] ss:$0 sm:$0xff]  ;;  %v3965_v41 = vld [vmem:[%s5515_s6 + $0x1] ss:$0 sm:$0xff] }
 0xef8   : > { %v3228_v57 = vsel %vm693_vm3, %v3221_v55, 0.0  ;;  %v3259_v30 = vsel %vm693_vm3, %v3225_v52, 0.0  ;;  %3314 = vmatpush.msra.mxu0 %v3292_v18  ;;  %v3966_v22 = vld [vmem:[%s5515_s6 + $0x3] ss:$0 sm:$0xff]  ;;  %v3967_v14 = vld [vmem:[%s5517_s8] ss:$0 sm:$0xff] }
 0xef9   : > { %3229 = vadd.xlane.f32.xlu0 %v3228_v57  ;;  %vm3321_vm0 = vcmask 9216  }
 0xefa   : > { %3315 = vmatpush.msra.mxu0 %v3291_v5 }
 0xf01   : > { %3260 = vadd.xlane.f32.xlu0 %v3259_v30 }
 0xf6c   : > { %v3230_v17 = vpop.xlane.xlu0 %3229 }
 0xf6d   : > { %v3231_v34 = vmul.f32 %v3230_v17, %v4306_v62 }
 0xf6f   : > { %v3232_v53 = vsub.f32 %v3221_v55, %v3231_v34 }
 0xf71   : > { %v3233_v2 = vmul.f32 %v3232_v53, %v3232_v53  ;;  %v3253_v40 = vmul.f32 %v3963_v20, %v3232_v53 }
 0xf73   : > { %v3234_v3 = vsel %vm693_vm3, %v3233_v2, 0.0 }
 0xf74   : > { %3235 = vadd.xlane.f32.xlu1 %v3234_v3  ;;  %v3261_v12 = vpop.xlane.xlu0 %3260 }
 0xf75   : > { %v3262_v4 = vmul.f32 %v3261_v12, %v4306_v62  ;;  %v3290_v62 = vld [vmem:[%s5516_s7] sm:$0xff] }
 0xf76   : > { %3316 = vmatpush.msra.mxu0 %v3290_v62 }
 0xf77   : > { %v3263_v59 = vsub.f32 %v3225_v52, %v3262_v4 }
 0xf79   : > { %v3264_v42 = vmul.f32 %v3263_v59, %v3263_v59  ;;  %v3284_v63 = vmul.f32 %v3964_v45, %v3263_v59 }
 0xf7b   : > { %v3265_v46 = vsel %vm693_vm3, %v3264_v42, 0.0 }
 0xf7c   : > { %3266 = vadd.xlane.f32.xlu1 %v3265_v46 }
 0xfe7   : > { %v3236_v60 = vpop.xlane.xlu1 %3235 }
 0xfe8   : > { %v3237_v9 = vmul.f32 %v3236_v60, %v4336_v29 }
 0xfea   : > { %3968 = vrsqrt.f32 %v3237_v9  ;;  %vm3245_vm3 = vcmp.eq.f32.partialorder %v3237_v9, inf  ;;  %v3248_v47 = vand.u32 2147483648, %v3237_v9  ;;  %vm3247_vm9 = vcmp.eq.f32.partialorder %v3237_v9, 0.0 }
 0xfef   : > { %v3267_v58 = vpop.xlane.xlu1 %3266 }
 0xff0   : > { %v3969_v33 = vpop.eup %3968  ;;  %v3268_v50 = vmul.f32 %v3267_v58, %v4336_v29 }
 0xff1   : > { %v3239_v0 = vmul.f32 %v3969_v33, %v3237_v9 }
 0xff2   : > { %3970 = vrsqrt.f32 %v3268_v50  ;;  %vm3276_vm10 = vcmp.eq.f32.partialorder %v3268_v50, inf  ;;  %v3279_v28 = vand.u32 2147483648, %v3268_v50  ;;  %vm3278_vm15 = vcmp.eq.f32.partialorder %v3268_v50, 0.0 }
 0xff3   : > { %v3240_v7 = vmul.f32 %v3969_v33, %v3239_v0 }
 0xff5   : > { %v3241_v11 = vmul.f32 0.5, %v3240_v7 }
 0xff7   : > { %v3242_v27 = vsub.f32 1.5, %v3241_v11 }
 0xff8   : > { %v3971_v6 = vpop.eup %3970 }
 0xff9   : > { %v3270_v13 = vmul.f32 %v3971_v6, %v3268_v50  ;;  %v3243_v26 = vmul.f32 %v3969_v33, %v3242_v27 }
 0xffb   : > { %v3244_v35 = vmul.f32 %v3243_v26, %v3237_v9  ;;  %v3271_v31 = vmul.f32 %v3971_v6, %v3270_v13 }
 0xffd   : > { %v3246_v1 = vsel %vm3245_vm3, %v3237_v9, %v3244_v35  ;;  %v3272_v48 = vmul.f32 0.5, %v3271_v31 }
 0xffe   : > { %v3249_v44 = vsel %vm3247_vm9, %v3248_v47, %v3246_v1 }
 0xfff   : > { %v3273_v56 = vsub.f32 1.5, %v3272_v48  ;;  %v3250_v49 = vadd.f32 1e-06, %v3249_v44 }
0x1001   : > { %v3274_v19 = vmul.f32 %v3971_v6, %v3273_v56  ;;  %3972 = vrcp.f32 %v3250_v49 }
0x1003   : > { %v3275_v29 = vmul.f32 %v3274_v19, %v3268_v50 }
0x1005   : > { %v3277_v15 = vsel %vm3276_vm10, %v3268_v50, %v3275_v29 }
0x1006   : > { %v3280_v24 = vsel %vm3278_vm15, %v3279_v28, %v3277_v15 }
0x1007   : > { %v3281_v38 = vadd.f32 1e-06, %v3280_v24  ;;  %v3973_v10 = vpop.eup %3972 }
0x1008   : > { %v3254_v32 = vmul.f32 %v3973_v10, %v3253_v40 }
0x1009   : > { %3974 = vrcp.f32 %v3281_v38 }
0x100a   : > { %v3256_v54 = vadd.f32 %v3965_v41, %v3254_v32 }
0x100f   : > { %v3975_v37 = vpop.eup %3974 }
0x1010   : > { %v3285_v61 = vmul.f32 %v3975_v37, %v3284_v63 }
0x1012   : > { %v3287_v16 = vadd.f32 %v3966_v22, %v3285_v61 }
0x1014   : > { %v3288_v51 = vadd.f32 %v3287_v16, %v3256_v54 }
0x1016   : > { %v3289_v39 = vmul.f32 0.5, %v3288_v51 }
0x1018   : > { %3636 = vmatmul.msk.f32.vlgmr.msra.gmra.mxu0 %vm683_vm4, %v3289_v39 }
0x1095   : > { %v3318_v36 = vpop.f32.mrf.mxu0 }
0x1096   : > { %v3319_v43 = vadd.f32 %v3967_v14, %v3318_v36 }
0x1098   : > { %3322 = vst.msk [vmem:[#allocation7] sm:$0x3] %vm3321_vm0, %v3319_v43 }
0x1099 PF: > { %p3668_p10 = scmp.eq.s32.totalorder %s4152_s16, 1  ;;  %s4078_s30 = smov [#allocation7]  }
0x109a   : > { %s3329_s24 = sshll.u32 %s4078_s30, 4  ;;  %s3331_s13 = sshll.u32 %s5518_s9, 4  ;;  %s3330_s24 = int_to_ptr.vmem [resolvable:$true] %s3329_s24  ;;  %s3332_s13 = int_to_ptr.hbm [resolvable:$true] %s3331_s13 }
0x109b   : > { %3661 = dma.vmem_to_hbm [thread:$0]  (%p3668_p10), %s3330_s24, 32, %s3332_s13, [#allocation8]  }
0x109c   : > { %s3342_s28 = sshll.u32 %s5519_s10, 4  ;;  %s4079_s19 = smov [#allocation9]   ;;  %s3343_s28 = int_to_ptr.hbm [resolvable:$true] %s3342_s28 }
0x109d   : > { %s3340_s11 = sshll.u32 %s4079_s19, 4  ;;  %s4080_s12 = smov 4   ;;  %s3341_s11 = int_to_ptr.vmem [resolvable:$true] %s3340_s11 }
0x109e   : > { %3663 = dma.vmem_to_hbm [thread:$0]  (%p3668_p10), %s3341_s11, 128, %s3343_s28, [#allocation10], %s4068_s23, %s4068_s23, %s4080_s12  }
0x109f   : > { %4045 = dma.done.wait (%p3668_p10), [#allocation8], 32  }
0x10a0   : > { %4047 = vsyncadd (%p3668_p10), [#allocation8], 4294967264 }
0x10a1   : > { %4049 = dma.done.wait (%p3668_p10), [#allocation10], 128  }
0x10a2   : > { %4051 = vsyncadd (%p3668_p10), [#allocation10], 4294967168 }
0x10a3 PF: > { %p20_p11 = scmp.ge.s32.totalorder %s4155_s17, 4   ;;  %s5521_s13 = smov %s4058_s14 }
0x10a4   : > { %s5522_s14 = smov %s4164_s20  ;;  %s5523_s15 = smov %s4155_s17 }
0x10a5   :  { %22 = sbr.rel (!%p20_p11) target bundleno = 3 (0x3), region = 239 }
0x10aa   :  { %3364 = vsyncpa [#allocation8], 1 }
0x10ab   :  { %3366 = vsyncpa [#allocation8 + $0x1], 1 }
0x10ac   :  { %3367 = vsyncpa [#allocation10], 1 }

</bundles_post_ra>
